<compile_context>
chip_gen: v6e
topology: v6e:2x2x1
jax: 0.10.0
libtpu: 0.0.40
codegen_flags: <defaults>
</compile_context>

<pallas_src>
import functools

import jax
import jax.numpy as jnp
from jax import lax
from jax.experimental import pallas as pl
from jax.experimental.pallas import tpu as pltpu


def _round_up(x, m):
    return (x + m - 1) // m * m


def _pad_gates(w, h, h_pad):
    """Pad the stacked-gate axis 0 of a PyTorch LSTM weight/bias.

    w: (4*h, ...) stacked [i, f, g, o]  ->  (4*h_pad, ...) with zero rows
    appended *per gate* so each gate occupies a full h_pad lane span.
    """
    if h_pad == h:
        return w
    parts = jnp.split(w, 4, axis=0)
    pad = [(0, h_pad - h)] + [(0, 0)] * (w.ndim - 1)
    return jnp.concatenate([jnp.pad(p, pad) for p in parts], axis=0)


def _lstm_fc_kernel(x_ref, wih_ref, whh_ref, b_ref, wfc_ref, bfc_ref,
                    out_ref, h_sc, c_sc, hs_sc, gx_sc,
                    *, t_blk, b_blk, h_pad):
    """One grid step == one (batch block, time block) tile + fused FC.

    x_ref   : (t_blk*b_blk, I)      time-major input slab (weight dtype)
    wih_ref : (I, 4*h_pad)          W_ih^T (resident, gate-padded)
    whh_ref : (h_pad, 4*h_pad)      W_hh^T (resident, gate-padded)
    b_ref   : (1, 4*h_pad)          b_ih + b_hh (f32)
    wfc_ref : (h_pad, O_pad)        W_fc^T
    bfc_ref : (1, O_pad)            b_fc (f32)
    out_ref : (t_blk*b_blk, O_pad)  lane-dense output slab (unmasked store)
    h_sc/c_sc : (b_blk, h_pad) f32  recurrent state carried across time blocks
    hs_sc   : (t_blk*b_blk, h_pad)  per-step h history (weight dtype)
    gx_sc   : (t_blk*b_blk, 4*h_pad) f32  precomputed x-path gates
    """
    H = h_pad

    # New batch block (time axis == grid axis 1 restarts) -> reset the state.
    @pl.when(pl.program_id(1) == 0)
    def _():
        h_sc[...] = jnp.zeros_like(h_sc)
        c_sc[...] = jnp.zeros_like(c_sc)

    # Prologue: the x-path is not part of the recurrence -> one big MXU matmul
    # (M = t_blk*b_blk rows) covering every step of this block.
    gx_sc[...] = (jnp.dot(x_ref[...], wih_ref[...],
                          preferred_element_type=jnp.float32)
                  + b_ref[...])

    # TODO(synk): hold W_hh^T resident in the MXU across the block with
    # pltpu.matmul_push_rhs / matmul_acc_lhs / matmul_pop so the weight is not
    # re-streamed every serial step; kept as jnp.dot here for portable lowering.
    def step(s, carry):
        h_prev, c_prev = carry
        row = pl.multiple_of(s * b_blk, b_blk)
        gates = gx_sc[pl.ds(row, b_blk), :] + jnp.dot(
            h_prev.astype(whh_ref.dtype), whh_ref[...],
            preferred_element_type=jnp.float32)          # (b_blk, 4*H) f32

        # PyTorch gate order i, f, g, o; each slice is a full 128-lane span.
        i_g = jax.nn.sigmoid(gates[:, 0 * H:1 * H])
        f_g = jax.nn.sigmoid(gates[:, 1 * H:2 * H])
        g_g = jnp.tanh(gates[:, 2 * H:3 * H])
        o_g = jax.nn.sigmoid(gates[:, 3 * H:4 * H])

        c_new = f_g * c_prev + i_g * g_g
        h_new = o_g * jnp.tanh(c_new)
        hs_sc[pl.ds(row, b_blk), :] = h_new.astype(hs_sc.dtype)
        return h_new, c_new

    # Fully unroll small blocks (static offsets); partial unroll for big ones
    # (each step depends on the previous -> no ILP from full unrolling).
    unroll = True if t_blk <= 16 else 8
    h_fin, c_fin = lax.fori_loop(0, t_blk, step, (h_sc[...], c_sc[...]),
                                 unroll=unroll)
    h_sc[...] = h_fin
    c_sc[...] = c_fin

    # Epilogue: one lane-dense FC matmul + one unmasked slab store per block.
    y = (jnp.dot(hs_sc[...], wfc_ref[...], preferred_element_type=jnp.float32)
         + bfc_ref[...])
    out_ref[...] = y.astype(out_ref.dtype)


def music_lstm_forward(x, params, *, t_blk=None, b_blk=None,
                       weight_dtype=jnp.bfloat16, out_dtype=jnp.float32):
    """x: (B, T, I). Returns (B, T, O) in `out_dtype` (f32 by default).

    weight_dtype=jnp.bfloat16 (default) runs the MXU matmuls with bf16
    operands, f32 accumulation and f32 (h, c) state; weight_dtype=jnp.float32
    matches the f32 reference to tight tolerance.
    On v7x, pass b_blk = B_pad // 2 (B_pad >= 16) to shard the batch across
    the two TensorCores via the leading "parallel" grid axis.
    """
    B, T, I = x.shape
    w_ih, w_hh, b_ih, b_hh, w_fc, b_fc = (
        params["w_ih"], params["w_hh"], params["b_ih"],
        params["b_hh"], params["w_fc"], params["b_fc"])
    H = w_hh.shape[1]
    O = w_fc.shape[0]

    # Pad batch to sublane width (8), hidden/output to lane width (128).
    B_pad = _round_up(B, 8)
    H_pad = _round_up(H, 128)
    O_pad = _round_up(O, 128)

    if b_blk is None:
        b_blk = B_pad                       # one batch block (single TC)
    b_blk = _round_up(b_blk, 8)
    assert B_pad % b_blk == 0, "b_blk must divide the padded batch"
    n_bb = B_pad // b_blk

    wbytes = jnp.dtype(weight_dtype).itemsize
    obytes = jnp.dtype(out_dtype).itemsize

    def vmem_bytes(tb):
        weights = ((I * 4 * H_pad + H_pad * 4 * H_pad + H_pad * O_pad) * wbytes
                   + (4 * H_pad + O_pad) * 4)                 # single-buffered
        blocks = 2 * tb * b_blk * (I * wbytes + O_pad * obytes)   # x/out dbuf
        scratch = (2 * b_blk * H_pad * 4                      # h, c (f32)
                   + tb * b_blk * H_pad * wbytes              # h history
                   + tb * b_blk * 4 * H_pad * 4)              # x-path gates
        return weights + blocks + scratch

    try:
        vmem_phys = pltpu.get_tpu_info().vmem_capacity_bytes
    except Exception:
        vmem_phys = 64 * 2 ** 20            # conservative: v7x per-core VMEM

    # Time block: >= 32 steps so the hoisted matmuls present M >= 256 rows on
    # v6e/v7x; clamp so the working set stays well inside this generation's
    # VMEM (gx scratch grows linearly with t_blk -> matters on v7x's 64 MiB).
    if t_blk is None:
        t_blk = min(T, 32)
    while t_blk > 8 and vmem_bytes(t_blk) > vmem_phys // 2:
        t_blk //= 2
    T_pad = _round_up(T, t_blk)

    # Generation-aware scoped-VMEM limit: escape v5e's 16 MiB scoped default,
    # never exceed ~85% of physical (no hard 32 MiB ceiling).
    vmem_limit = int(min(0.85 * vmem_phys,
                         max(2 * vmem_bytes(t_blk), 64 * 2 ** 20)))

    # ---- weight / bias prep (plain JAX glue) -------------------------------
    wih_t = jnp.transpose(_pad_gates(w_ih, H, H_pad)).astype(weight_dtype)
    whh_t = jnp.transpose(
        jnp.pad(_pad_gates(w_hh, H, H_pad),
                ((0, 0), (0, H_pad - H)))).astype(weight_dtype)
    bias = _pad_gates((b_ih + b_hh).astype(jnp.float32), H,
                      H_pad).reshape(1, 4 * H_pad)
    wfc_t = jnp.transpose(
        jnp.pad(w_fc, ((0, O_pad - O), (0, H_pad - H)))).astype(weight_dtype)
    bfc = jnp.pad(b_fc.astype(jnp.float32), (0, O_pad - O)).reshape(1, O_pad)

    # ---- input prep: pad, (batch-block, time-major, batch-minor) slab ------
    # Cast to the weight dtype here so the HBM slab is half-size in bf16 mode.
    x_p = jnp.pad(x, ((0, B_pad - B), (0, T_pad - T), (0, 0)))
    x_slab = (jnp.transpose(x_p.reshape(n_bb, b_blk, T_pad, I), (0, 2, 1, 3))
              .reshape(n_bb, T_pad * b_blk, I).astype(weight_dtype))

    kernel = functools.partial(_lstm_fc_kernel, t_blk=t_blk, b_blk=b_blk,
                               h_pad=H_pad)

    def run(single_buffer_weights):
        # Resident weights: constant index_map; single-buffer them to halve
        # their VMEM footprint (no re-DMA happens either way).
        w_kwargs = (dict(pipeline_mode=pl.Buffered(1))
                    if single_buffer_weights else {})

        def resident(shape):
            return pl.BlockSpec(shape, lambda b, t: (0, 0), **w_kwargs)

        grid_spec = pltpu.PrefetchScalarGridSpec(
            num_scalar_prefetch=0,
            grid=(n_bb, T_pad // t_blk),
            in_specs=[
                pl.BlockSpec((None, t_blk * b_blk, I), lambda b, t: (b, t, 0)),
                resident((I, 4 * H_pad)),            # W_ih^T
                resident((H_pad, 4 * H_pad)),        # W_hh^T
                resident((1, 4 * H_pad)),            # bias
                resident((H_pad, O_pad)),            # W_fc^T
                resident((1, O_pad)),                # b_fc
            ],
            out_specs=pl.BlockSpec((None, t_blk * b_blk, O_pad),
                                   lambda b, t: (b, t, 0)),
            scratch_shapes=[
                pltpu.VMEM((b_blk, H_pad), jnp.float32),             # h carry
                pltpu.VMEM((b_blk, H_pad), jnp.float32),             # c carry
                pltpu.VMEM((t_blk * b_blk, H_pad), weight_dtype),    # h history
                pltpu.VMEM((t_blk * b_blk, 4 * H_pad), jnp.float32), # x gates
            ],
        )
        return pl.pallas_call(
            kernel,
            out_shape=jax.ShapeDtypeStruct((n_bb, T_pad * b_blk, O_pad),
                                           out_dtype),
            grid_spec=grid_spec,
            compiler_params=pltpu.CompilerParams(
                # batch blocks are independent ("parallel", 2 TCs on v7x);
                # the time recurrence is sequential ("arbitrary").
                dimension_semantics=("parallel", "arbitrary"),
                vmem_limit_bytes=vmem_limit,
            ),
        )(x_slab, wih_t, whh_t, bias, wfc_t, bfc)

    try:
        out3d = run(single_buffer_weights=True)
    except Exception:
        # Fallback for jax versions that reject pl.Buffered(1) on a BlockSpec:
        # identical kernel, default double-buffered resident weights.
        out3d = run(single_buffer_weights=False)

    # Unpack (n_bb, T_pad*b_blk, O_pad) -> (B, T, O), stripping padding.
    out = out3d.reshape(n_bb, T_pad, b_blk, O_pad)
    out = jnp.transpose(out, (0, 2, 1, 3)).reshape(B_pad, T_pad, O_pad)
    return out[:B, :T, :O]


def music_lstm_reference(x, params):
    """Pure-JAX reference mirroring torch.nn.LSTM(batch_first=True) + Linear."""
    w_ih, w_hh, b_ih, b_hh, w_fc, b_fc = (
        params["w_ih"], params["w_hh"], params["b_ih"],
        params["b_hh"], params["w_fc"], params["b_fc"])
    B, T, I = x.shape
    H = w_hh.shape[1]

    def step(carry, x_t):
        h, c = carry
        gates = x_t @ w_ih.T + b_ih + h @ w_hh.T + b_hh
        i_g = jax.nn.sigmoid(gates[:, 0 * H:1 * H])
        f_g = jax.nn.sigmoid(gates[:, 1 * H:2 * H])
        g_g = jnp.tanh(gates[:, 2 * H:3 * H])
        o_g = jax.nn.sigmoid(gates[:, 3 * H:4 * H])
        c = f_g * c + i_g * g_g
        h = o_g * jnp.tanh(c)
        return (h, c), h

    h0 = jnp.zeros((B, H), jnp.float32)
    c0 = jnp.zeros((B, H), jnp.float32)
    _, hs = jax.lax.scan(step, (h0, c0), jnp.transpose(x, (1, 0, 2)))
    hs = jnp.transpose(hs, (1, 0, 2))          # (B, T, H)
    return hs @ w_fc.T + b_fc


def init_params(key, input_size, hidden_size, output_size):
    """Deterministic init matching PyTorch parameter shapes (uniform +-1/sqrt(H))."""
    ks = jax.random.split(key, 6)
    k_lstm = 1.0 / jnp.sqrt(hidden_size)
    k_fc = 1.0 / jnp.sqrt(hidden_size)
    u = lambda k, shape, s: jax.random.uniform(k, shape, jnp.float32, -s, s)
    return {
        "w_ih": u(ks[0], (4 * hidden_size, input_size), k_lstm),
        "w_hh": u(ks[1], (4 * hidden_size, hidden_size), k_lstm),
        "b_ih": u(ks[2], (4 * hidden_size,), k_lstm),
        "b_hh": u(ks[3], (4 * hidden_size,), k_lstm),
        "w_fc": u(ks[4], (output_size, hidden_size), k_fc),
        "b_fc": u(ks[5], (output_size,), k_fc),
    }


if __name__ == "__main__":
    B, T = 2, 8
    input_size, hidden_size, output_size = 16, 32, 16

    key = jax.random.PRNGKey(0)
    kx, kp = jax.random.split(key)
    x = jax.random.normal(kx, (B, T, input_size), jnp.float32)
    params = init_params(kp, input_size, hidden_size, output_size)

    ref = music_lstm_reference(x, params)

    # Default fast path: bf16 weights on the MXU (f32 accumulation / state).
    out_bf16 = jax.block_until_ready(music_lstm_forward(x, params))
    assert out_bf16.shape == (B, T, output_size)
    assert jnp.allclose(out_bf16, ref, atol=5e-2, rtol=5e-2), \
        "bf16 kernel mismatch vs JAX reference"

    # f32 path: tight agreement with the f32 reference.
    out_f32 = jax.block_until_ready(
        music_lstm_forward(x, params, weight_dtype=jnp.float32))
    assert out_f32.shape == (B, T, output_size)
    assert jnp.allclose(out_f32, ref, atol=1e-4, rtol=1e-4), \
        "f32 kernel mismatch vs JAX reference"

    print("KERNEL_OK")
</pallas_src>

<mosaic_0001>
module attributes {stable_mosaic.version = 11 : i64} {
  func.func @_lstm_fc_kernel(%arg0: i32, %arg1: i32, %arg2: memref<1x64x16xbf16, #tpu.memory_space<vmem>>, %arg3: memref<16x512xbf16, #tpu.memory_space<vmem>>, %arg4: memref<128x512xbf16, #tpu.memory_space<vmem>>, %arg5: memref<1x512xf32, #tpu.memory_space<vmem>>, %arg6: memref<128x128xbf16, #tpu.memory_space<vmem>>, %arg7: memref<1x128xf32, #tpu.memory_space<vmem>>, %arg8: memref<1x64x128xf32, #tpu.memory_space<vmem>>, %arg9: memref<8x128xf32, #tpu.memory_space<vmem>>, %arg10: memref<8x128xf32, #tpu.memory_space<vmem>>, %arg11: memref<64x128xbf16, #tpu.memory_space<vmem>>, %arg12: memref<64x512xf32, #tpu.memory_space<vmem>>) attributes {dimension_semantics = [#tpu.dimension_semantics<parallel>, #tpu.dimension_semantics<arbitrary>], iteration_bounds = array<i64: 1, 1>, scalar_prefetch = 0 : i64, scratch_operands = 4 : i64, tpu.core_type = #tpu.core_type<tc>, window_params = [{transform_indices = @transform_0, window_bounds = array<i64: 1, 64, 16>}, {pipeline_mode = #tpu.pipeline_mode<synchronous>, transform_indices = @transform_1, window_bounds = array<i64: 16, 512>}, {pipeline_mode = #tpu.pipeline_mode<synchronous>, transform_indices = @transform_2, window_bounds = array<i64: 128, 512>}, {pipeline_mode = #tpu.pipeline_mode<synchronous>, transform_indices = @transform_3, window_bounds = array<i64: 1, 512>}, {pipeline_mode = #tpu.pipeline_mode<synchronous>, transform_indices = @transform_4, window_bounds = array<i64: 128, 128>}, {pipeline_mode = #tpu.pipeline_mode<synchronous>, transform_indices = @transform_5, window_bounds = array<i64: 1, 128>}, {transform_indices = @transform_6, window_bounds = array<i64: 1, 64, 128>}]} {
    %c0_i32 = arith.constant 0 : i32
    %0 = arith.cmpi eq, %arg1, %c0_i32 : i32
    %1 = arith.extui %0 : i1 to i32
    %c0_i32_0 = arith.constant 0 : i32
    %2 = arith.cmpi ne, %1, %c0_i32_0 : i32
    scf.if %2 {
      %cst_100 = arith.constant 0.000000e+00 : f32
      %312 = vector.broadcast %cst_100 : f32 to vector<8x128xf32>
      %c0_101 = arith.constant 0 : index
      %c0_102 = arith.constant 0 : index
      %313 = vector.load %arg9[%c0_101, %c0_102] : memref<8x128xf32, #tpu.memory_space<vmem>>, vector<8x128xf32>
      tpu.vector_store %arg9[%c0_101, %c0_102], %312 {strides = array<i32>} : memref<8x128xf32, #tpu.memory_space<vmem>>, vector<8x128xf32>,
      %cst_103 = arith.constant 0.000000e+00 : f32
      %314 = vector.broadcast %cst_103 : f32 to vector<8x128xf32>
      %c0_104 = arith.constant 0 : index
      %c0_105 = arith.constant 0 : index
      %315 = vector.load %arg10[%c0_104, %c0_105] : memref<8x128xf32, #tpu.memory_space<vmem>>, vector<8x128xf32>
      tpu.vector_store %arg10[%c0_104, %c0_105], %314 {strides = array<i32>} : memref<8x128xf32, #tpu.memory_space<vmem>>, vector<8x128xf32>,
    } else {
    }
    %c0 = arith.constant 0 : index
    %c0_1 = arith.constant 0 : index
    %c0_2 = arith.constant 0 : index
    %3 = vector.load %arg2[%c0, %c0_1, %c0_2] : memref<1x64x16xbf16, #tpu.memory_space<vmem>>, vector<1x64x16xbf16>
    %4 = vector.shape_cast %3 : vector<1x64x16xbf16> to vector<64x16xbf16>
    %c0_3 = arith.constant 0 : index
    %c0_4 = arith.constant 0 : index
    %5 = vector.load %arg3[%c0_3, %c0_4] : memref<16x512xbf16, #tpu.memory_space<vmem>>, vector<16x512xbf16>
    %cst = arith.constant dense<0.000000e+00> : vector<64x512xf32>
    %6 = tpu.matmul %4, %5, %cst {dimension_numbers = #tpu.dot_dimension_numbers<[1], [0], [0], [1], [0, 0, 1, 1], [], []>} : vector<64x16xbf16>, vector<16x512xbf16>, vector<64x512xf32> -> vector<64x512xf32>
    %c0_5 = arith.constant 0 : index
    %c0_6 = arith.constant 0 : index
    %7 = vector.load %arg5[%c0_5, %c0_6] : memref<1x512xf32, #tpu.memory_space<vmem>>, vector<1x512xf32>
    %8 = vector.broadcast %7 : vector<1x512xf32> to vector<64x512xf32>
    %9 = arith.addf %6, %8 : vector<64x512xf32>
    %c0_7 = arith.constant 0 : index
    %c0_8 = arith.constant 0 : index
    %10 = vector.load %arg12[%c0_7, %c0_8] : memref<64x512xf32, #tpu.memory_space<vmem>>, vector<64x512xf32>
    tpu.vector_store %arg12[%c0_7, %c0_8], %9 {strides = array<i32>} : memref<64x512xf32, #tpu.memory_space<vmem>>, vector<64x512xf32>,
    %c0_9 = arith.constant 0 : index
    %c0_10 = arith.constant 0 : index
    %11 = vector.load %arg9[%c0_9, %c0_10] : memref<8x128xf32, #tpu.memory_space<vmem>>, vector<8x128xf32>
    %c0_11 = arith.constant 0 : index
    %c0_12 = arith.constant 0 : index
    %12 = vector.load %arg10[%c0_11, %c0_12] : memref<8x128xf32, #tpu.memory_space<vmem>>, vector<8x128xf32>
    %c0_i32_13 = arith.constant 0 : i32
    %c8_i32 = arith.constant 8 : i32
    %13 = arith.muli %c0_i32_13, %c8_i32 : i32
    %14 = tpu.assume_multiple %13, 8 : i32
    %15 = arith.index_cast %14 : i32 to index
    %c0_14 = arith.constant 0 : index
    %16 = vector.load %arg12[%15, %c0_14] : memref<64x512xf32, #tpu.memory_space<vmem>>, vector<8x512xf32>
    %17 = arith.truncf %11 : vector<8x128xf32> to vector<8x128xbf16>
    %c0_15 = arith.constant 0 : index
    %c0_16 = arith.constant 0 : index
    %18 = vector.load %arg4[%c0_15, %c0_16] : memref<128x512xbf16, #tpu.memory_space<vmem>>, vector<128x512xbf16>
    %cst_17 = arith.constant dense<0.000000e+00> : vector<8x512xf32>
    %19 = tpu.matmul %17, %18, %cst_17 {dimension_numbers = #tpu.dot_dimension_numbers<[1], [0], [0], [1], [0, 0, 1, 1], [], []>} : vector<8x128xbf16>, vector<128x512xbf16>, vector<8x512xf32> -> vector<8x512xf32>
    %20 = arith.addf %16, %19 : vector<8x512xf32>
    %21 = vector.extract_strided_slice %20 {offsets = [0, 0], sizes = [8, 128], strides = [1, 1]} : vector<8x512xf32> to vector<8x128xf32>
    %22 = arith.negf %21 : vector<8x128xf32>
    %23 = math.exp %22 : vector<8x128xf32>
    %cst_18 = arith.constant 1.000000e+00 : f32
    %24 = vector.broadcast %cst_18 : f32 to vector<8x128xf32>
    %25 = arith.addf %24, %23 : vector<8x128xf32>
    %26 = arith.divf %24, %25 : vector<8x128xf32>
    %27 = vector.extract_strided_slice %20 {offsets = [0, 128], sizes = [8, 128], strides = [1, 1]} : vector<8x512xf32> to vector<8x128xf32>
    %28 = arith.negf %27 : vector<8x128xf32>
    %29 = math.exp %28 : vector<8x128xf32>
    %cst_19 = arith.constant 1.000000e+00 : f32
    %30 = vector.broadcast %cst_19 : f32 to vector<8x128xf32>
    %31 = arith.addf %30, %29 : vector<8x128xf32>
    %32 = arith.divf %30, %31 : vector<8x128xf32>
    %33 = vector.extract_strided_slice %20 {offsets = [0, 256], sizes = [8, 128], strides = [1, 1]} : vector<8x512xf32> to vector<8x128xf32>
    %34 = math.tanh %33 : vector<8x128xf32>
    %35 = vector.extract_strided_slice %20 {offsets = [0, 384], sizes = [8, 128], strides = [1, 1]} : vector<8x512xf32> to vector<8x128xf32>
    %36 = arith.negf %35 : vector<8x128xf32>
    %37 = math.exp %36 : vector<8x128xf32>
    %cst_20 = arith.constant 1.000000e+00 : f32
    %38 = vector.broadcast %cst_20 : f32 to vector<8x128xf32>
    %39 = arith.addf %38, %37 : vector<8x128xf32>
    %40 = arith.divf %38, %39 : vector<8x128xf32>
    %41 = arith.mulf %32, %12 : vector<8x128xf32>
    %42 = arith.mulf %26, %34 : vector<8x128xf32>
    %43 = arith.addf %41, %42 : vector<8x128xf32>
    %44 = math.tanh %43 : vector<8x128xf32>
    %45 = arith.mulf %40, %44 : vector<8x128xf32>
    %46 = arith.truncf %45 : vector<8x128xf32> to vector<8x128xbf16>
    %47 = arith.index_cast %14 : i32 to index
    %c0_21 = arith.constant 0 : index
    %48 = vector.load %arg11[%47, %c0_21] : memref<64x128xbf16, #tpu.memory_space<vmem>>, vector<8x128xbf16>
    tpu.vector_store %arg11[%47, %c0_21], %46 {strides = array<i32>} : memref<64x128xbf16, #tpu.memory_space<vmem>>, vector<8x128xbf16>,
    %c1_i32 = arith.constant 1 : i32
    %c8_i32_22 = arith.constant 8 : i32
    %49 = arith.muli %c1_i32, %c8_i32_22 : i32
    %50 = tpu.assume_multiple %49, 8 : i32
    %51 = arith.index_cast %50 : i32 to index
    %c0_23 = arith.constant 0 : index
    %52 = vector.load %arg12[%51, %c0_23] : memref<64x512xf32, #tpu.memory_space<vmem>>, vector<8x512xf32>
    %53 = arith.truncf %45 : vector<8x128xf32> to vector<8x128xbf16>
    %c0_24 = arith.constant 0 : index
    %c0_25 = arith.constant 0 : index
    %54 = vector.load %arg4[%c0_24, %c0_25] : memref<128x512xbf16, #tpu.memory_space<vmem>>, vector<128x512xbf16>
    %cst_26 = arith.constant dense<0.000000e+00> : vector<8x512xf32>
    %55 = tpu.matmul %53, %54, %cst_26 {dimension_numbers = #tpu.dot_dimension_numbers<[1], [0], [0], [1], [0, 0, 1, 1], [], []>} : vector<8x128xbf16>, vector<128x512xbf16>, vector<8x512xf32> -> vector<8x512xf32>
    %56 = arith.addf %52, %55 : vector<8x512xf32>
    %57 = vector.extract_strided_slice %56 {offsets = [0, 0], sizes = [8, 128], strides = [1, 1]} : vector<8x512xf32> to vector<8x128xf32>
    %58 = arith.negf %57 : vector<8x128xf32>
    %59 = math.exp %58 : vector<8x128xf32>
    %cst_27 = arith.constant 1.000000e+00 : f32
    %60 = vector.broadcast %cst_27 : f32 to vector<8x128xf32>
    %61 = arith.addf %60, %59 : vector<8x128xf32>
    %62 = arith.divf %60, %61 : vector<8x128xf32>
    %63 = vector.extract_strided_slice %56 {offsets = [0, 128], sizes = [8, 128], strides = [1, 1]} : vector<8x512xf32> to vector<8x128xf32>
    %64 = arith.negf %63 : vector<8x128xf32>
    %65 = math.exp %64 : vector<8x128xf32>
    %cst_28 = arith.constant 1.000000e+00 : f32
    %66 = vector.broadcast %cst_28 : f32 to vector<8x128xf32>
    %67 = arith.addf %66, %65 : vector<8x128xf32>
    %68 = arith.divf %66, %67 : vector<8x128xf32>
    %69 = vector.extract_strided_slice %56 {offsets = [0, 256], sizes = [8, 128], strides = [1, 1]} : vector<8x512xf32> to vector<8x128xf32>
    %70 = math.tanh %69 : vector<8x128xf32>
    %71 = vector.extract_strided_slice %56 {offsets = [0, 384], sizes = [8, 128], strides = [1, 1]} : vector<8x512xf32> to vector<8x128xf32>
    %72 = arith.negf %71 : vector<8x128xf32>
    %73 = math.exp %72 : vector<8x128xf32>
    %cst_29 = arith.constant 1.000000e+00 : f32
    %74 = vector.broadcast %cst_29 : f32 to vector<8x128xf32>
    %75 = arith.addf %74, %73 : vector<8x128xf32>
    %76 = arith.divf %74, %75 : vector<8x128xf32>
    %77 = arith.mulf %68, %43 : vector<8x128xf32>
    %78 = arith.mulf %62, %70 : vector<8x128xf32>
    %79 = arith.addf %77, %78 : vector<8x128xf32>
    %80 = math.tanh %79 : vector<8x128xf32>
    %81 = arith.mulf %76, %80 : vector<8x128xf32>
    %82 = arith.truncf %81 : vector<8x128xf32> to vector<8x128xbf16>
    %83 = arith.index_cast %50 : i32 to index
    %c0_30 = arith.constant 0 : index
    %84 = vector.load %arg11[%83, %c0_30] : memref<64x128xbf16, #tpu.memory_space<vmem>>, vector<8x128xbf16>
    tpu.vector_store %arg11[%83, %c0_30], %82 {strides = array<i32>} : memref<64x128xbf16, #tpu.memory_space<vmem>>, vector<8x128xbf16>,
    %c2_i32 = arith.constant 2 : i32
    %c8_i32_31 = arith.constant 8 : i32
    %85 = arith.muli %c2_i32, %c8_i32_31 : i32
    %86 = tpu.assume_multiple %85, 8 : i32
    %87 = arith.index_cast %86 : i32 to index
    %c0_32 = arith.constant 0 : index
    %88 = vector.load %arg12[%87, %c0_32] : memref<64x512xf32, #tpu.memory_space<vmem>>, vector<8x512xf32>
    %89 = arith.truncf %81 : vector<8x128xf32> to vector<8x128xbf16>
    %c0_33 = arith.constant 0 : index
    %c0_34 = arith.constant 0 : index
    %90 = vector.load %arg4[%c0_33, %c0_34] : memref<128x512xbf16, #tpu.memory_space<vmem>>, vector<128x512xbf16>
    %cst_35 = arith.constant dense<0.000000e+00> : vector<8x512xf32>
    %91 = tpu.matmul %89, %90, %cst_35 {dimension_numbers = #tpu.dot_dimension_numbers<[1], [0], [0], [1], [0, 0, 1, 1], [], []>} : vector<8x128xbf16>, vector<128x512xbf16>, vector<8x512xf32> -> vector<8x512xf32>
    %92 = arith.addf %88, %91 : vector<8x512xf32>
    %93 = vector.extract_strided_slice %92 {offsets = [0, 0], sizes = [8, 128], strides = [1, 1]} : vector<8x512xf32> to vector<8x128xf32>
    %94 = arith.negf %93 : vector<8x128xf32>
    %95 = math.exp %94 : vector<8x128xf32>
    %cst_36 = arith.constant 1.000000e+00 : f32
    %96 = vector.broadcast %cst_36 : f32 to vector<8x128xf32>
    %97 = arith.addf %96, %95 : vector<8x128xf32>
    %98 = arith.divf %96, %97 : vector<8x128xf32>
    %99 = vector.extract_strided_slice %92 {offsets = [0, 128], sizes = [8, 128], strides = [1, 1]} : vector<8x512xf32> to vector<8x128xf32>
    %100 = arith.negf %99 : vector<8x128xf32>
    %101 = math.exp %100 : vector<8x128xf32>
    %cst_37 = arith.constant 1.000000e+00 : f32
    %102 = vector.broadcast %cst_37 : f32 to vector<8x128xf32>
    %103 = arith.addf %102, %101 : vector<8x128xf32>
    %104 = arith.divf %102, %103 : vector<8x128xf32>
    %105 = vector.extract_strided_slice %92 {offsets = [0, 256], sizes = [8, 128], strides = [1, 1]} : vector<8x512xf32> to vector<8x128xf32>
    %106 = math.tanh %105 : vector<8x128xf32>
    %107 = vector.extract_strided_slice %92 {offsets = [0, 384], sizes = [8, 128], strides = [1, 1]} : vector<8x512xf32> to vector<8x128xf32>
    %108 = arith.negf %107 : vector<8x128xf32>
    %109 = math.exp %108 : vector<8x128xf32>
    %cst_38 = arith.constant 1.000000e+00 : f32
    %110 = vector.broadcast %cst_38 : f32 to vector<8x128xf32>
    %111 = arith.addf %110, %109 : vector<8x128xf32>
    %112 = arith.divf %110, %111 : vector<8x128xf32>
    %113 = arith.mulf %104, %79 : vector<8x128xf32>
    %114 = arith.mulf %98, %106 : vector<8x128xf32>
    %115 = arith.addf %113, %114 : vector<8x128xf32>
    %116 = math.tanh %115 : vector<8x128xf32>
    %117 = arith.mulf %112, %116 : vector<8x128xf32>
    %118 = arith.truncf %117 : vector<8x128xf32> to vector<8x128xbf16>
    %119 = arith.index_cast %86 : i32 to index
    %c0_39 = arith.constant 0 : index
    %120 = vector.load %arg11[%119, %c0_39] : memref<64x128xbf16, #tpu.memory_space<vmem>>, vector<8x128xbf16>
    tpu.vector_store %arg11[%119, %c0_39], %118 {strides = array<i32>} : memref<64x128xbf16, #tpu.memory_space<vmem>>, vector<8x128xbf16>,
    %c3_i32 = arith.constant 3 : i32
    %c8_i32_40 = arith.constant 8 : i32
    %121 = arith.muli %c3_i32, %c8_i32_40 : i32
    %122 = tpu.assume_multiple %121, 8 : i32
    %123 = arith.index_cast %122 : i32 to index
    %c0_41 = arith.constant 0 : index
    %124 = vector.load %arg12[%123, %c0_41] : memref<64x512xf32, #tpu.memory_space<vmem>>, vector<8x512xf32>
    %125 = arith.truncf %117 : vector<8x128xf32> to vector<8x128xbf16>
    %c0_42 = arith.constant 0 : index
    %c0_43 = arith.constant 0 : index
    %126 = vector.load %arg4[%c0_42, %c0_43] : memref<128x512xbf16, #tpu.memory_space<vmem>>, vector<128x512xbf16>
    %cst_44 = arith.constant dense<0.000000e+00> : vector<8x512xf32>
    %127 = tpu.matmul %125, %126, %cst_44 {dimension_numbers = #tpu.dot_dimension_numbers<[1], [0], [0], [1], [0, 0, 1, 1], [], []>} : vector<8x128xbf16>, vector<128x512xbf16>, vector<8x512xf32> -> vector<8x512xf32>
    %128 = arith.addf %124, %127 : vector<8x512xf32>
    %129 = vector.extract_strided_slice %128 {offsets = [0, 0], sizes = [8, 128], strides = [1, 1]} : vector<8x512xf32> to vector<8x128xf32>
    %130 = arith.negf %129 : vector<8x128xf32>
    %131 = math.exp %130 : vector<8x128xf32>
    %cst_45 = arith.constant 1.000000e+00 : f32
    %132 = vector.broadcast %cst_45 : f32 to vector<8x128xf32>
    %133 = arith.addf %132, %131 : vector<8x128xf32>
    %134 = arith.divf %132, %133 : vector<8x128xf32>
    %135 = vector.extract_strided_slice %128 {offsets = [0, 128], sizes = [8, 128], strides = [1, 1]} : vector<8x512xf32> to vector<8x128xf32>
    %136 = arith.negf %135 : vector<8x128xf32>
    %137 = math.exp %136 : vector<8x128xf32>
    %cst_46 = arith.constant 1.000000e+00 : f32
    %138 = vector.broadcast %cst_46 : f32 to vector<8x128xf32>
    %139 = arith.addf %138, %137 : vector<8x128xf32>
    %140 = arith.divf %138, %139 : vector<8x128xf32>
    %141 = vector.extract_strided_slice %128 {offsets = [0, 256], sizes = [8, 128], strides = [1, 1]} : vector<8x512xf32> to vector<8x128xf32>
    %142 = math.tanh %141 : vector<8x128xf32>
    %143 = vector.extract_strided_slice %128 {offsets = [0, 384], sizes = [8, 128], strides = [1, 1]} : vector<8x512xf32> to vector<8x128xf32>
    %144 = arith.negf %143 : vector<8x128xf32>
    %145 = math.exp %144 : vector<8x128xf32>
    %cst_47 = arith.constant 1.000000e+00 : f32
    %146 = vector.broadcast %cst_47 : f32 to vector<8x128xf32>
    %147 = arith.addf %146, %145 : vector<8x128xf32>
    %148 = arith.divf %146, %147 : vector<8x128xf32>
    %149 = arith.mulf %140, %115 : vector<8x128xf32>
    %150 = arith.mulf %134, %142 : vector<8x128xf32>
    %151 = arith.addf %149, %150 : vector<8x128xf32>
    %152 = math.tanh %151 : vector<8x128xf32>
    %153 = arith.mulf %148, %152 : vector<8x128xf32>
    %154 = arith.truncf %153 : vector<8x128xf32> to vector<8x128xbf16>
    %155 = arith.index_cast %122 : i32 to index
    %c0_48 = arith.constant 0 : index
    %156 = vector.load %arg11[%155, %c0_48] : memref<64x128xbf16, #tpu.memory_space<vmem>>, vector<8x128xbf16>
    tpu.vector_store %arg11[%155, %c0_48], %154 {strides = array<i32>} : memref<64x128xbf16, #tpu.memory_space<vmem>>, vector<8x128xbf16>,
    %c4_i32 = arith.constant 4 : i32
    %c8_i32_49 = arith.constant 8 : i32
    %157 = arith.muli %c4_i32, %c8_i32_49 : i32
    %158 = tpu.assume_multiple %157, 8 : i32
    %159 = arith.index_cast %158 : i32 to index
    %c0_50 = arith.constant 0 : index
    %160 = vector.load %arg12[%159, %c0_50] : memref<64x512xf32, #tpu.memory_space<vmem>>, vector<8x512xf32>
    %161 = arith.truncf %153 : vector<8x128xf32> to vector<8x128xbf16>
    %c0_51 = arith.constant 0 : index
    %c0_52 = arith.constant 0 : index
    %162 = vector.load %arg4[%c0_51, %c0_52] : memref<128x512xbf16, #tpu.memory_space<vmem>>, vector<128x512xbf16>
    %cst_53 = arith.constant dense<0.000000e+00> : vector<8x512xf32>
    %163 = tpu.matmul %161, %162, %cst_53 {dimension_numbers = #tpu.dot_dimension_numbers<[1], [0], [0], [1], [0, 0, 1, 1], [], []>} : vector<8x128xbf16>, vector<128x512xbf16>, vector<8x512xf32> -> vector<8x512xf32>
    %164 = arith.addf %160, %163 : vector<8x512xf32>
    %165 = vector.extract_strided_slice %164 {offsets = [0, 0], sizes = [8, 128], strides = [1, 1]} : vector<8x512xf32> to vector<8x128xf32>
    %166 = arith.negf %165 : vector<8x128xf32>
    %167 = math.exp %166 : vector<8x128xf32>
    %cst_54 = arith.constant 1.000000e+00 : f32
    %168 = vector.broadcast %cst_54 : f32 to vector<8x128xf32>
    %169 = arith.addf %168, %167 : vector<8x128xf32>
    %170 = arith.divf %168, %169 : vector<8x128xf32>
    %171 = vector.extract_strided_slice %164 {offsets = [0, 128], sizes = [8, 128], strides = [1, 1]} : vector<8x512xf32> to vector<8x128xf32>
    %172 = arith.negf %171 : vector<8x128xf32>
    %173 = math.exp %172 : vector<8x128xf32>
    %cst_55 = arith.constant 1.000000e+00 : f32
    %174 = vector.broadcast %cst_55 : f32 to vector<8x128xf32>
    %175 = arith.addf %174, %173 : vector<8x128xf32>
    %176 = arith.divf %174, %175 : vector<8x128xf32>
    %177 = vector.extract_strided_slice %164 {offsets = [0, 256], sizes = [8, 128], strides = [1, 1]} : vector<8x512xf32> to vector<8x128xf32>
    %178 = math.tanh %177 : vector<8x128xf32>
    %179 = vector.extract_strided_slice %164 {offsets = [0, 384], sizes = [8, 128], strides = [1, 1]} : vector<8x512xf32> to vector<8x128xf32>
    %180 = arith.negf %179 : vector<8x128xf32>
    %181 = math.exp %180 : vector<8x128xf32>
    %cst_56 = arith.constant 1.000000e+00 : f32
    %182 = vector.broadcast %cst_56 : f32 to vector<8x128xf32>
    %183 = arith.addf %182, %181 : vector<8x128xf32>
    %184 = arith.divf %182, %183 : vector<8x128xf32>
    %185 = arith.mulf %176, %151 : vector<8x128xf32>
    %186 = arith.mulf %170, %178 : vector<8x128xf32>
    %187 = arith.addf %185, %186 : vector<8x128xf32>
    %188 = math.tanh %187 : vector<8x128xf32>
    %189 = arith.mulf %184, %188 : vector<8x128xf32>
    %190 = arith.truncf %189 : vector<8x128xf32> to vector<8x128xbf16>
    %191 = arith.index_cast %158 : i32 to index
    %c0_57 = arith.constant 0 : index
    %192 = vector.load %arg11[%191, %c0_57] : memref<64x128xbf16, #tpu.memory_space<vmem>>, vector<8x128xbf16>
    tpu.vector_store %arg11[%191, %c0_57], %190 {strides = array<i32>} : memref<64x128xbf16, #tpu.memory_space<vmem>>, vector<8x128xbf16>,
    %c5_i32 = arith.constant 5 : i32
    %c8_i32_58 = arith.constant 8 : i32
    %193 = arith.muli %c5_i32, %c8_i32_58 : i32
    %194 = tpu.assume_multiple %193, 8 : i32
    %195 = arith.index_cast %194 : i32 to index
    %c0_59 = arith.constant 0 : index
    %196 = vector.load %arg12[%195, %c0_59] : memref<64x512xf32, #tpu.memory_space<vmem>>, vector<8x512xf32>
    %197 = arith.truncf %189 : vector<8x128xf32> to vector<8x128xbf16>
    %c0_60 = arith.constant 0 : index
    %c0_61 = arith.constant 0 : index
    %198 = vector.load %arg4[%c0_60, %c0_61] : memref<128x512xbf16, #tpu.memory_space<vmem>>, vector<128x512xbf16>
    %cst_62 = arith.constant dense<0.000000e+00> : vector<8x512xf32>
    %199 = tpu.matmul %197, %198, %cst_62 {dimension_numbers = #tpu.dot_dimension_numbers<[1], [0], [0], [1], [0, 0, 1, 1], [], []>} : vector<8x128xbf16>, vector<128x512xbf16>, vector<8x512xf32> -> vector<8x512xf32>
    %200 = arith.addf %196, %199 : vector<8x512xf32>
    %201 = vector.extract_strided_slice %200 {offsets = [0, 0], sizes = [8, 128], strides = [1, 1]} : vector<8x512xf32> to vector<8x128xf32>
    %202 = arith.negf %201 : vector<8x128xf32>
    %203 = math.exp %202 : vector<8x128xf32>
    %cst_63 = arith.constant 1.000000e+00 : f32
    %204 = vector.broadcast %cst_63 : f32 to vector<8x128xf32>
    %205 = arith.addf %204, %203 : vector<8x128xf32>
    %206 = arith.divf %204, %205 : vector<8x128xf32>
    %207 = vector.extract_strided_slice %200 {offsets = [0, 128], sizes = [8, 128], strides = [1, 1]} : vector<8x512xf32> to vector<8x128xf32>
    %208 = arith.negf %207 : vector<8x128xf32>
    %209 = math.exp %208 : vector<8x128xf32>
    %cst_64 = arith.constant 1.000000e+00 : f32
    %210 = vector.broadcast %cst_64 : f32 to vector<8x128xf32>
    %211 = arith.addf %210, %209 : vector<8x128xf32>
    %212 = arith.divf %210, %211 : vector<8x128xf32>
    %213 = vector.extract_strided_slice %200 {offsets = [0, 256], sizes = [8, 128], strides = [1, 1]} : vector<8x512xf32> to vector<8x128xf32>
    %214 = math.tanh %213 : vector<8x128xf32>
    %215 = vector.extract_strided_slice %200 {offsets = [0, 384], sizes = [8, 128], strides = [1, 1]} : vector<8x512xf32> to vector<8x128xf32>
    %216 = arith.negf %215 : vector<8x128xf32>
    %217 = math.exp %216 : vector<8x128xf32>
    %cst_65 = arith.constant 1.000000e+00 : f32
    %218 = vector.broadcast %cst_65 : f32 to vector<8x128xf32>
    %219 = arith.addf %218, %217 : vector<8x128xf32>
    %220 = arith.divf %218, %219 : vector<8x128xf32>
    %221 = arith.mulf %212, %187 : vector<8x128xf32>
    %222 = arith.mulf %206, %214 : vector<8x128xf32>
    %223 = arith.addf %221, %222 : vector<8x128xf32>
    %224 = math.tanh %223 : vector<8x128xf32>
    %225 = arith.mulf %220, %224 : vector<8x128xf32>
    %226 = arith.truncf %225 : vector<8x128xf32> to vector<8x128xbf16>
    %227 = arith.index_cast %194 : i32 to index
    %c0_66 = arith.constant 0 : index
    %228 = vector.load %arg11[%227, %c0_66] : memref<64x128xbf16, #tpu.memory_space<vmem>>, vector<8x128xbf16>
    tpu.vector_store %arg11[%227, %c0_66], %226 {strides = array<i32>} : memref<64x128xbf16, #tpu.memory_space<vmem>>, vector<8x128xbf16>,
    %c6_i32 = arith.constant 6 : i32
    %c8_i32_67 = arith.constant 8 : i32
    %229 = arith.muli %c6_i32, %c8_i32_67 : i32
    %230 = tpu.assume_multiple %229, 8 : i32
    %231 = arith.index_cast %230 : i32 to index
    %c0_68 = arith.constant 0 : index
    %232 = vector.load %arg12[%231, %c0_68] : memref<64x512xf32, #tpu.memory_space<vmem>>, vector<8x512xf32>
    %233 = arith.truncf %225 : vector<8x128xf32> to vector<8x128xbf16>
    %c0_69 = arith.constant 0 : index
    %c0_70 = arith.constant 0 : index
    %234 = vector.load %arg4[%c0_69, %c0_70] : memref<128x512xbf16, #tpu.memory_space<vmem>>, vector<128x512xbf16>
    %cst_71 = arith.constant dense<0.000000e+00> : vector<8x512xf32>
    %235 = tpu.matmul %233, %234, %cst_71 {dimension_numbers = #tpu.dot_dimension_numbers<[1], [0], [0], [1], [0, 0, 1, 1], [], []>} : vector<8x128xbf16>, vector<128x512xbf16>, vector<8x512xf32> -> vector<8x512xf32>
    %236 = arith.addf %232, %235 : vector<8x512xf32>
    %237 = vector.extract_strided_slice %236 {offsets = [0, 0], sizes = [8, 128], strides = [1, 1]} : vector<8x512xf32> to vector<8x128xf32>
    %238 = arith.negf %237 : vector<8x128xf32>
    %239 = math.exp %238 : vector<8x128xf32>
    %cst_72 = arith.constant 1.000000e+00 : f32
    %240 = vector.broadcast %cst_72 : f32 to vector<8x128xf32>
    %241 = arith.addf %240, %239 : vector<8x128xf32>
    %242 = arith.divf %240, %241 : vector<8x128xf32>
    %243 = vector.extract_strided_slice %236 {offsets = [0, 128], sizes = [8, 128], strides = [1, 1]} : vector<8x512xf32> to vector<8x128xf32>
    %244 = arith.negf %243 : vector<8x128xf32>
    %245 = math.exp %244 : vector<8x128xf32>
    %cst_73 = arith.constant 1.000000e+00 : f32
    %246 = vector.broadcast %cst_73 : f32 to vector<8x128xf32>
    %247 = arith.addf %246, %245 : vector<8x128xf32>
    %248 = arith.divf %246, %247 : vector<8x128xf32>
    %249 = vector.extract_strided_slice %236 {offsets = [0, 256], sizes = [8, 128], strides = [1, 1]} : vector<8x512xf32> to vector<8x128xf32>
    %250 = math.tanh %249 : vector<8x128xf32>
    %251 = vector.extract_strided_slice %236 {offsets = [0, 384], sizes = [8, 128], strides = [1, 1]} : vector<8x512xf32> to vector<8x128xf32>
    %252 = arith.negf %251 : vector<8x128xf32>
    %253 = math.exp %252 : vector<8x128xf32>
    %cst_74 = arith.constant 1.000000e+00 : f32
    %254 = vector.broadcast %cst_74 : f32 to vector<8x128xf32>
    %255 = arith.addf %254, %253 : vector<8x128xf32>
    %256 = arith.divf %254, %255 : vector<8x128xf32>
    %257 = arith.mulf %248, %223 : vector<8x128xf32>
    %258 = arith.mulf %242, %250 : vector<8x128xf32>
    %259 = arith.addf %257, %258 : vector<8x128xf32>
    %260 = math.tanh %259 : vector<8x128xf32>
    %261 = arith.mulf %256, %260 : vector<8x128xf32>
    %262 = arith.truncf %261 : vector<8x128xf32> to vector<8x128xbf16>
    %263 = arith.index_cast %230 : i32 to index
    %c0_75 = arith.constant 0 : index
    %264 = vector.load %arg11[%263, %c0_75] : memref<64x128xbf16, #tpu.memory_space<vmem>>, vector<8x128xbf16>
    tpu.vector_store %arg11[%263, %c0_75], %262 {strides = array<i32>} : memref<64x128xbf16, #tpu.memory_space<vmem>>, vector<8x128xbf16>,
    %c7_i32 = arith.constant 7 : i32
    %c8_i32_76 = arith.constant 8 : i32
    %265 = arith.muli %c7_i32, %c8_i32_76 : i32
    %266 = tpu.assume_multiple %265, 8 : i32
    %267 = arith.index_cast %266 : i32 to index
    %c0_77 = arith.constant 0 : index
    %268 = vector.load %arg12[%267, %c0_77] : memref<64x512xf32, #tpu.memory_space<vmem>>, vector<8x512xf32>
    %269 = arith.truncf %261 : vector<8x128xf32> to vector<8x128xbf16>
    %c0_78 = arith.constant 0 : index
    %c0_79 = arith.constant 0 : index
    %270 = vector.load %arg4[%c0_78, %c0_79] : memref<128x512xbf16, #tpu.memory_space<vmem>>, vector<128x512xbf16>
    %cst_80 = arith.constant dense<0.000000e+00> : vector<8x512xf32>
    %271 = tpu.matmul %269, %270, %cst_80 {dimension_numbers = #tpu.dot_dimension_numbers<[1], [0], [0], [1], [0, 0, 1, 1], [], []>} : vector<8x128xbf16>, vector<128x512xbf16>, vector<8x512xf32> -> vector<8x512xf32>
    %272 = arith.addf %268, %271 : vector<8x512xf32>
    %273 = vector.extract_strided_slice %272 {offsets = [0, 0], sizes = [8, 128], strides = [1, 1]} : vector<8x512xf32> to vector<8x128xf32>
    %274 = arith.negf %273 : vector<8x128xf32>
    %275 = math.exp %274 : vector<8x128xf32>
    %cst_81 = arith.constant 1.000000e+00 : f32
    %276 = vector.broadcast %cst_81 : f32 to vector<8x128xf32>
    %277 = arith.addf %276, %275 : vector<8x128xf32>
    %278 = arith.divf %276, %277 : vector<8x128xf32>
    %279 = vector.extract_strided_slice %272 {offsets = [0, 128], sizes = [8, 128], strides = [1, 1]} : vector<8x512xf32> to vector<8x128xf32>
    %280 = arith.negf %279 : vector<8x128xf32>
    %281 = math.exp %280 : vector<8x128xf32>
    %cst_82 = arith.constant 1.000000e+00 : f32
    %282 = vector.broadcast %cst_82 : f32 to vector<8x128xf32>
    %283 = arith.addf %282, %281 : vector<8x128xf32>
    %284 = arith.divf %282, %283 : vector<8x128xf32>
    %285 = vector.extract_strided_slice %272 {offsets = [0, 256], sizes = [8, 128], strides = [1, 1]} : vector<8x512xf32> to vector<8x128xf32>
    %286 = math.tanh %285 : vector<8x128xf32>
    %287 = vector.extract_strided_slice %272 {offsets = [0, 384], sizes = [8, 128], strides = [1, 1]} : vector<8x512xf32> to vector<8x128xf32>
    %288 = arith.negf %287 : vector<8x128xf32>
    %289 = math.exp %288 : vector<8x128xf32>
    %cst_83 = arith.constant 1.000000e+00 : f32
    %290 = vector.broadcast %cst_83 : f32 to vector<8x128xf32>
    %291 = arith.addf %290, %289 : vector<8x128xf32>
    %292 = arith.divf %290, %291 : vector<8x128xf32>
    %293 = arith.mulf %284, %259 : vector<8x128xf32>
    %294 = arith.mulf %278, %286 : vector<8x128xf32>
    %295 = arith.addf %293, %294 : vector<8x128xf32>
    %296 = math.tanh %295 : vector<8x128xf32>
    %297 = arith.mulf %292, %296 : vector<8x128xf32>
    %298 = arith.truncf %297 : vector<8x128xf32> to vector<8x128xbf16>
    %299 = arith.index_cast %266 : i32 to index
    %c0_84 = arith.constant 0 : index
    %300 = vector.load %arg11[%299, %c0_84] : memref<64x128xbf16, #tpu.memory_space<vmem>>, vector<8x128xbf16>
    tpu.vector_store %arg11[%299, %c0_84], %298 {strides = array<i32>} : memref<64x128xbf16, #tpu.memory_space<vmem>>, vector<8x128xbf16>,
    %c8_i32_85 = arith.constant 8 : i32
    %c0_86 = arith.constant 0 : index
    %c0_87 = arith.constant 0 : index
    %301 = vector.load %arg9[%c0_86, %c0_87] : memref<8x128xf32, #tpu.memory_space<vmem>>, vector<8x128xf32>
    tpu.vector_store %arg9[%c0_86, %c0_87], %297 {strides = array<i32>} : memref<8x128xf32, #tpu.memory_space<vmem>>, vector<8x128xf32>,
    %c0_88 = arith.constant 0 : index
    %c0_89 = arith.constant 0 : index
    %302 = vector.load %arg10[%c0_88, %c0_89] : memref<8x128xf32, #tpu.memory_space<vmem>>, vector<8x128xf32>
    tpu.vector_store %arg10[%c0_88, %c0_89], %295 {strides = array<i32>} : memref<8x128xf32, #tpu.memory_space<vmem>>, vector<8x128xf32>,
    %c0_90 = arith.constant 0 : index
    %c0_91 = arith.constant 0 : index
    %303 = vector.load %arg11[%c0_90, %c0_91] : memref<64x128xbf16, #tpu.memory_space<vmem>>, vector<64x128xbf16>
    %c0_92 = arith.constant 0 : index
    %c0_93 = arith.constant 0 : index
    %304 = vector.load %arg6[%c0_92, %c0_93] : memref<128x128xbf16, #tpu.memory_space<vmem>>, vector<128x128xbf16>
    %cst_94 = arith.constant dense<0.000000e+00> : vector<64x128xf32>
    %305 = tpu.matmul %303, %304, %cst_94 {dimension_numbers = #tpu.dot_dimension_numbers<[1], [0], [0], [1], [0, 0, 1, 1], [], []>} : vector<64x128xbf16>, vector<128x128xbf16>, vector<64x128xf32> -> vector<64x128xf32>
    %c0_95 = arith.constant 0 : index
    %c0_96 = arith.constant 0 : index
    %306 = vector.load %arg7[%c0_95, %c0_96] : memref<1x128xf32, #tpu.memory_space<vmem>>, vector<1x128xf32>
    %307 = vector.broadcast %306 : vector<1x128xf32> to vector<64x128xf32>
    %308 = arith.addf %305, %307 : vector<64x128xf32>
    %c0_97 = arith.constant 0 : index
    %c0_98 = arith.constant 0 : index
    %c0_99 = arith.constant 0 : index
    %309 = vector.load %arg8[%c0_97, %c0_98, %c0_99] : memref<1x64x128xf32, #tpu.memory_space<vmem>>, vector<1x64x128xf32>
    %310 = vector.shape_cast %309 : vector<1x64x128xf32> to vector<64x128xf32>
    %311 = vector.shape_cast %308 : vector<64x128xf32> to vector<1x64x128xf32>
    tpu.vector_store %arg8[%c0_97, %c0_98, %c0_99], %311 {strides = array<i32>} : memref<1x64x128xf32, #tpu.memory_space<vmem>>, vector<1x64x128xf32>,
    return
  }
  func.func @transform_0(%arg0: i32, %arg1: i32) -> (i32, i32, i32) {
    %c0_i32 = arith.constant 0 : i32
    %c0_i32_0 = arith.constant 0 : i32
    return %arg0, %arg1, %c0_i32 : i32, i32, i32
  }
  func.func @transform_1(%arg0: i32, %arg1: i32) -> (i32, i32) {
    %c0_i32 = arith.constant 0 : i32
    %c0_i32_0 = arith.constant 0 : i32
    %c0_i32_1 = arith.constant 0 : i32
    return %c0_i32, %c0_i32_0 : i32, i32
  }
  func.func @transform_2(%arg0: i32, %arg1: i32) -> (i32, i32) {
    %c0_i32 = arith.constant 0 : i32
    %c0_i32_0 = arith.constant 0 : i32
    %c0_i32_1 = arith.constant 0 : i32
    return %c0_i32, %c0_i32_0 : i32, i32
  }
  func.func @transform_3(%arg0: i32, %arg1: i32) -> (i32, i32) {
    %c0_i32 = arith.constant 0 : i32
    %c0_i32_0 = arith.constant 0 : i32
    %c0_i32_1 = arith.constant 0 : i32
    return %c0_i32, %c0_i32_0 : i32, i32
  }
  func.func @transform_4(%arg0: i32, %arg1: i32) -> (i32, i32) {
    %c0_i32 = arith.constant 0 : i32
    %c0_i32_0 = arith.constant 0 : i32
    %c0_i32_1 = arith.constant 0 : i32
    return %c0_i32, %c0_i32_0 : i32, i32
  }
  func.func @transform_5(%arg0: i32, %arg1: i32) -> (i32, i32) {
    %c0_i32 = arith.constant 0 : i32
    %c0_i32_0 = arith.constant 0 : i32
    %c0_i32_1 = arith.constant 0 : i32
    return %c0_i32, %c0_i32_0 : i32, i32
  }
  func.func @transform_6(%arg0: i32, %arg1: i32) -> (i32, i32, i32) {
    %c0_i32 = arith.constant 0 : i32
    %c0_i32_0 = arith.constant 0 : i32
    return %arg0, %arg1, %c0_i32 : i32, i32, i32
  }
}

module attributes {stable_mosaic.version = 11 : i64} {
  func.func @_lstm_fc_kernel(%arg0: i32, %arg1: i32, %arg2: memref<1x64x16xbf16, #tpu.memory_space<vmem>>, %arg3: memref<16x512xbf16, #tpu.memory_space<vmem>>, %arg4: memref<128x512xbf16, #tpu.memory_space<vmem>>, %arg5: memref<1x512xf32, #tpu.memory_space<vmem>>, %arg6: memref<128x128xbf16, #tpu.memory_space<vmem>>, %arg7: memref<1x128xf32, #tpu.memory_space<vmem>>, %arg8: memref<1x64x128xf32, #tpu.memory_space<vmem>>, %arg9: memref<8x128xf32, #tpu.memory_space<vmem>>, %arg10: memref<8x128xf32, #tpu.memory_space<vmem>>, %arg11: memref<64x128xbf16, #tpu.memory_space<vmem>>, %arg12: memref<64x512xf32, #tpu.memory_space<vmem>>) attributes {dimension_semantics = [#tpu.dimension_semantics<parallel>, #tpu.dimension_semantics<arbitrary>], iteration_bounds = array<i64: 1, 1>, scalar_prefetch = 0 : i64, scratch_operands = 4 : i64, tpu.core_type = #tpu.core_type<tc>, window_params = [{transform_indices = @transform_0, window_bounds = array<i64: 1, 64, 16>}, {pipeline_mode = #tpu.pipeline_mode<synchronous>, transform_indices = @transform_1, window_bounds = array<i64: 16, 512>}, {pipeline_mode = #tpu.pipeline_mode<synchronous>, transform_indices = @transform_2, window_bounds = array<i64: 128, 512>}, {pipeline_mode = #tpu.pipeline_mode<synchronous>, transform_indices = @transform_3, window_bounds = array<i64: 1, 512>}, {pipeline_mode = #tpu.pipeline_mode<synchronous>, transform_indices = @transform_4, window_bounds = array<i64: 128, 128>}, {pipeline_mode = #tpu.pipeline_mode<synchronous>, transform_indices = @transform_5, window_bounds = array<i64: 1, 128>}, {transform_indices = @transform_6, window_bounds = array<i64: 1, 64, 128>}]} {
    %c0_i32 = arith.constant 0 : i32
    %0 = arith.cmpi eq, %arg1, %c0_i32 : i32
    %1 = arith.extui %0 : i1 to i32
    %c0_i32_0 = arith.constant 0 : i32
    %2 = arith.cmpi ne, %1, %c0_i32_0 : i32
    scf.if %2 {
      %cst_100 = arith.constant 0.000000e+00 : f32
      %312 = vector.broadcast %cst_100 : f32 to vector<8x128xf32>
      %c0_101 = arith.constant 0 : index
      %c0_102 = arith.constant 0 : index
      %313 = vector.load %arg9[%c0_101, %c0_102] : memref<8x128xf32, #tpu.memory_space<vmem>>, vector<8x128xf32>
      tpu.vector_store %arg9[%c0_101, %c0_102], %312 {strides = array<i32>} : memref<8x128xf32, #tpu.memory_space<vmem>>, vector<8x128xf32>,
      %cst_103 = arith.constant 0.000000e+00 : f32
      %314 = vector.broadcast %cst_103 : f32 to vector<8x128xf32>
      %c0_104 = arith.constant 0 : index
      %c0_105 = arith.constant 0 : index
      %315 = vector.load %arg10[%c0_104, %c0_105] : memref<8x128xf32, #tpu.memory_space<vmem>>, vector<8x128xf32>
      tpu.vector_store %arg10[%c0_104, %c0_105], %314 {strides = array<i32>} : memref<8x128xf32, #tpu.memory_space<vmem>>, vector<8x128xf32>,
    } else {
    }
    %c0 = arith.constant 0 : index
    %c0_1 = arith.constant 0 : index
    %c0_2 = arith.constant 0 : index
    %3 = vector.load %arg2[%c0, %c0_1, %c0_2] : memref<1x64x16xbf16, #tpu.memory_space<vmem>>, vector<1x64x16xbf16>
    %4 = vector.shape_cast %3 : vector<1x64x16xbf16> to vector<64x16xbf16>
    %c0_3 = arith.constant 0 : index
    %c0_4 = arith.constant 0 : index
    %5 = vector.load %arg3[%c0_3, %c0_4] : memref<16x512xbf16, #tpu.memory_space<vmem>>, vector<16x512xbf16>
    %cst = arith.constant dense<0.000000e+00> : vector<64x512xf32>
    %6 = tpu.matmul %4, %5, %cst {dimension_numbers = #tpu.dot_dimension_numbers<[1], [0], [0], [1], [0, 0, 1, 1], [], []>} : vector<64x16xbf16>, vector<16x512xbf16>, vector<64x512xf32> -> vector<64x512xf32>
    %c0_5 = arith.constant 0 : index
    %c0_6 = arith.constant 0 : index
    %7 = vector.load %arg5[%c0_5, %c0_6] : memref<1x512xf32, #tpu.memory_space<vmem>>, vector<1x512xf32>
    %8 = vector.broadcast %7 : vector<1x512xf32> to vector<64x512xf32>
    %9 = arith.addf %6, %8 : vector<64x512xf32>
    %c0_7 = arith.constant 0 : index
    %c0_8 = arith.constant 0 : index
    %10 = vector.load %arg12[%c0_7, %c0_8] : memref<64x512xf32, #tpu.memory_space<vmem>>, vector<64x512xf32>
    tpu.vector_store %arg12[%c0_7, %c0_8], %9 {strides = array<i32>} : memref<64x512xf32, #tpu.memory_space<vmem>>, vector<64x512xf32>,
    %c0_9 = arith.constant 0 : index
    %c0_10 = arith.constant 0 : index
    %11 = vector.load %arg9[%c0_9, %c0_10] : memref<8x128xf32, #tpu.memory_space<vmem>>, vector<8x128xf32>
    %c0_11 = arith.constant 0 : index
    %c0_12 = arith.constant 0 : index
    %12 = vector.load %arg10[%c0_11, %c0_12] : memref<8x128xf32, #tpu.memory_space<vmem>>, vector<8x128xf32>
    %c0_i32_13 = arith.constant 0 : i32
    %c8_i32 = arith.constant 8 : i32
    %13 = arith.muli %c0_i32_13, %c8_i32 : i32
    %14 = tpu.assume_multiple %13, 8 : i32
    %15 = arith.index_cast %14 : i32 to index
    %c0_14 = arith.constant 0 : index
    %16 = vector.load %arg12[%15, %c0_14] : memref<64x512xf32, #tpu.memory_space<vmem>>, vector<8x512xf32>
    %17 = arith.truncf %11 : vector<8x128xf32> to vector<8x128xbf16>
    %c0_15 = arith.constant 0 : index
    %c0_16 = arith.constant 0 : index
    %18 = vector.load %arg4[%c0_15, %c0_16] : memref<128x512xbf16, #tpu.memory_space<vmem>>, vector<128x512xbf16>
    %cst_17 = arith.constant dense<0.000000e+00> : vector<8x512xf32>
    %19 = tpu.matmul %17, %18, %cst_17 {dimension_numbers = #tpu.dot_dimension_numbers<[1], [0], [0], [1], [0, 0, 1, 1], [], []>} : vector<8x128xbf16>, vector<128x512xbf16>, vector<8x512xf32> -> vector<8x512xf32>
    %20 = arith.addf %16, %19 : vector<8x512xf32>
    %21 = vector.extract_strided_slice %20 {offsets = [0, 0], sizes = [8, 128], strides = [1, 1]} : vector<8x512xf32> to vector<8x128xf32>
    %22 = arith.negf %21 : vector<8x128xf32>
    %23 = math.exp %22 : vector<8x128xf32>
    %cst_18 = arith.constant 1.000000e+00 : f32
    %24 = vector.broadcast %cst_18 : f32 to vector<8x128xf32>
    %25 = arith.addf %24, %23 : vector<8x128xf32>
    %26 = arith.divf %24, %25 : vector<8x128xf32>
    %27 = vector.extract_strided_slice %20 {offsets = [0, 128], sizes = [8, 128], strides = [1, 1]} : vector<8x512xf32> to vector<8x128xf32>
    %28 = arith.negf %27 : vector<8x128xf32>
    %29 = math.exp %28 : vector<8x128xf32>
    %cst_19 = arith.constant 1.000000e+00 : f32
    %30 = vector.broadcast %cst_19 : f32 to vector<8x128xf32>
    %31 = arith.addf %30, %29 : vector<8x128xf32>
    %32 = arith.divf %30, %31 : vector<8x128xf32>
    %33 = vector.extract_strided_slice %20 {offsets = [0, 256], sizes = [8, 128], strides = [1, 1]} : vector<8x512xf32> to vector<8x128xf32>
    %34 = math.tanh %33 : vector<8x128xf32>
    %35 = vector.extract_strided_slice %20 {offsets = [0, 384], sizes = [8, 128], strides = [1, 1]} : vector<8x512xf32> to vector<8x128xf32>
    %36 = arith.negf %35 : vector<8x128xf32>
    %37 = math.exp %36 : vector<8x128xf32>
    %cst_20 = arith.constant 1.000000e+00 : f32
    %38 = vector.broadcast %cst_20 : f32 to vector<8x128xf32>
    %39 = arith.addf %38, %37 : vector<8x128xf32>
    %40 = arith.divf %38, %39 : vector<8x128xf32>
    %41 = arith.mulf %32, %12 : vector<8x128xf32>
    %42 = arith.mulf %26, %34 : vector<8x128xf32>
    %43 = arith.addf %41, %42 : vector<8x128xf32>
    %44 = math.tanh %43 : vector<8x128xf32>
    %45 = arith.mulf %40, %44 : vector<8x128xf32>
    %46 = arith.truncf %45 : vector<8x128xf32> to vector<8x128xbf16>
    %47 = arith.index_cast %14 : i32 to index
    %c0_21 = arith.constant 0 : index
    %48 = vector.load %arg11[%47, %c0_21] : memref<64x128xbf16, #tpu.memory_space<vmem>>, vector<8x128xbf16>
    tpu.vector_store %arg11[%47, %c0_21], %46 {strides = array<i32>} : memref<64x128xbf16, #tpu.memory_space<vmem>>, vector<8x128xbf16>,
    %c1_i32 = arith.constant 1 : i32
    %c8_i32_22 = arith.constant 8 : i32
    %49 = arith.muli %c1_i32, %c8_i32_22 : i32
    %50 = tpu.assume_multiple %49, 8 : i32
    %51 = arith.index_cast %50 : i32 to index
    %c0_23 = arith.constant 0 : index
    %52 = vector.load %arg12[%51, %c0_23] : memref<64x512xf32, #tpu.memory_space<vmem>>, vector<8x512xf32>
    %53 = arith.truncf %45 : vector<8x128xf32> to vector<8x128xbf16>
    %c0_24 = arith.constant 0 : index
    %c0_25 = arith.constant 0 : index
    %54 = vector.load %arg4[%c0_24, %c0_25] : memref<128x512xbf16, #tpu.memory_space<vmem>>, vector<128x512xbf16>
    %cst_26 = arith.constant dense<0.000000e+00> : vector<8x512xf32>
    %55 = tpu.matmul %53, %54, %cst_26 {dimension_numbers = #tpu.dot_dimension_numbers<[1], [0], [0], [1], [0, 0, 1, 1], [], []>} : vector<8x128xbf16>, vector<128x512xbf16>, vector<8x512xf32> -> vector<8x512xf32>
    %56 = arith.addf %52, %55 : vector<8x512xf32>
    %57 = vector.extract_strided_slice %56 {offsets = [0, 0], sizes = [8, 128], strides = [1, 1]} : vector<8x512xf32> to vector<8x128xf32>
    %58 = arith.negf %57 : vector<8x128xf32>
    %59 = math.exp %58 : vector<8x128xf32>
    %cst_27 = arith.constant 1.000000e+00 : f32
    %60 = vector.broadcast %cst_27 : f32 to vector<8x128xf32>
    %61 = arith.addf %60, %59 : vector<8x128xf32>
    %62 = arith.divf %60, %61 : vector<8x128xf32>
    %63 = vector.extract_strided_slice %56 {offsets = [0, 128], sizes = [8, 128], strides = [1, 1]} : vector<8x512xf32> to vector<8x128xf32>
    %64 = arith.negf %63 : vector<8x128xf32>
    %65 = math.exp %64 : vector<8x128xf32>
    %cst_28 = arith.constant 1.000000e+00 : f32
    %66 = vector.broadcast %cst_28 : f32 to vector<8x128xf32>
    %67 = arith.addf %66, %65 : vector<8x128xf32>
    %68 = arith.divf %66, %67 : vector<8x128xf32>
    %69 = vector.extract_strided_slice %56 {offsets = [0, 256], sizes = [8, 128], strides = [1, 1]} : vector<8x512xf32> to vector<8x128xf32>
    %70 = math.tanh %69 : vector<8x128xf32>
    %71 = vector.extract_strided_slice %56 {offsets = [0, 384], sizes = [8, 128], strides = [1, 1]} : vector<8x512xf32> to vector<8x128xf32>
    %72 = arith.negf %71 : vector<8x128xf32>
    %73 = math.exp %72 : vector<8x128xf32>
    %cst_29 = arith.constant 1.000000e+00 : f32
    %74 = vector.broadcast %cst_29 : f32 to vector<8x128xf32>
    %75 = arith.addf %74, %73 : vector<8x128xf32>
    %76 = arith.divf %74, %75 : vector<8x128xf32>
    %77 = arith.mulf %68, %43 : vector<8x128xf32>
    %78 = arith.mulf %62, %70 : vector<8x128xf32>
    %79 = arith.addf %77, %78 : vector<8x128xf32>
    %80 = math.tanh %79 : vector<8x128xf32>
    %81 = arith.mulf %76, %80 : vector<8x128xf32>
    %82 = arith.truncf %81 : vector<8x128xf32> to vector<8x128xbf16>
    %83 = arith.index_cast %50 : i32 to index
    %c0_30 = arith.constant 0 : index
    %84 = vector.load %arg11[%83, %c0_30] : memref<64x128xbf16, #tpu.memory_space<vmem>>, vector<8x128xbf16>
    tpu.vector_store %arg11[%83, %c0_30], %82 {strides = array<i32>} : memref<64x128xbf16, #tpu.memory_space<vmem>>, vector<8x128xbf16>,
    %c2_i32 = arith.constant 2 : i32
    %c8_i32_31 = arith.constant 8 : i32
    %85 = arith.muli %c2_i32, %c8_i32_31 : i32
    %86 = tpu.assume_multiple %85, 8 : i32
    %87 = arith.index_cast %86 : i32 to index
    %c0_32 = arith.constant 0 : index
    %88 = vector.load %arg12[%87, %c0_32] : memref<64x512xf32, #tpu.memory_space<vmem>>, vector<8x512xf32>
    %89 = arith.truncf %81 : vector<8x128xf32> to vector<8x128xbf16>
    %c0_33 = arith.constant 0 : index
    %c0_34 = arith.constant 0 : index
    %90 = vector.load %arg4[%c0_33, %c0_34] : memref<128x512xbf16, #tpu.memory_space<vmem>>, vector<128x512xbf16>
    %cst_35 = arith.constant dense<0.000000e+00> : vector<8x512xf32>
    %91 = tpu.matmul %89, %90, %cst_35 {dimension_numbers = #tpu.dot_dimension_numbers<[1], [0], [0], [1], [0, 0, 1, 1], [], []>} : vector<8x128xbf16>, vector<128x512xbf16>, vector<8x512xf32> -> vector<8x512xf32>
    %92 = arith.addf %88, %91 : vector<8x512xf32>
    %93 = vector.extract_strided_slice %92 {offsets = [0, 0], sizes = [8, 128], strides = [1, 1]} : vector<8x512xf32> to vector<8x128xf32>
    %94 = arith.negf %93 : vector<8x128xf32>
    %95 = math.exp %94 : vector<8x128xf32>
    %cst_36 = arith.constant 1.000000e+00 : f32
    %96 = vector.broadcast %cst_36 : f32 to vector<8x128xf32>
    %97 = arith.addf %96, %95 : vector<8x128xf32>
    %98 = arith.divf %96, %97 : vector<8x128xf32>
    %99 = vector.extract_strided_slice %92 {offsets = [0, 128], sizes = [8, 128], strides = [1, 1]} : vector<8x512xf32> to vector<8x128xf32>
    %100 = arith.negf %99 : vector<8x128xf32>
    %101 = math.exp %100 : vector<8x128xf32>
    %cst_37 = arith.constant 1.000000e+00 : f32
    %102 = vector.broadcast %cst_37 : f32 to vector<8x128xf32>
    %103 = arith.addf %102, %101 : vector<8x128xf32>
    %104 = arith.divf %102, %103 : vector<8x128xf32>
    %105 = vector.extract_strided_slice %92 {offsets = [0, 256], sizes = [8, 128], strides = [1, 1]} : vector<8x512xf32> to vector<8x128xf32>
    %106 = math.tanh %105 : vector<8x128xf32>
    %107 = vector.extract_strided_slice %92 {offsets = [0, 384], sizes = [8, 128], strides = [1, 1]} : vector<8x512xf32> to vector<8x128xf32>
    %108 = arith.negf %107 : vector<8x128xf32>
    %109 = math.exp %108 : vector<8x128xf32>
    %cst_38 = arith.constant 1.000000e+00 : f32
    %110 = vector.broadcast %cst_38 : f32 to vector<8x128xf32>
    %111 = arith.addf %110, %109 : vector<8x128xf32>
    %112 = arith.divf %110, %111 : vector<8x128xf32>
    %113 = arith.mulf %104, %79 : vector<8x128xf32>
    %114 = arith.mulf %98, %106 : vector<8x128xf32>
    %115 = arith.addf %113, %114 : vector<8x128xf32>
    %116 = math.tanh %115 : vector<8x128xf32>
    %117 = arith.mulf %112, %116 : vector<8x128xf32>
    %118 = arith.truncf %117 : vector<8x128xf32> to vector<8x128xbf16>
    %119 = arith.index_cast %86 : i32 to index
    %c0_39 = arith.constant 0 : index
    %120 = vector.load %arg11[%119, %c0_39] : memref<64x128xbf16, #tpu.memory_space<vmem>>, vector<8x128xbf16>
    tpu.vector_store %arg11[%119, %c0_39], %118 {strides = array<i32>} : memref<64x128xbf16, #tpu.memory_space<vmem>>, vector<8x128xbf16>,
    %c3_i32 = arith.constant 3 : i32
    %c8_i32_40 = arith.constant 8 : i32
    %121 = arith.muli %c3_i32, %c8_i32_40 : i32
    %122 = tpu.assume_multiple %121, 8 : i32
    %123 = arith.index_cast %122 : i32 to index
    %c0_41 = arith.constant 0 : index
    %124 = vector.load %arg12[%123, %c0_41] : memref<64x512xf32, #tpu.memory_space<vmem>>, vector<8x512xf32>
    %125 = arith.truncf %117 : vector<8x128xf32> to vector<8x128xbf16>
    %c0_42 = arith.constant 0 : index
    %c0_43 = arith.constant 0 : index
    %126 = vector.load %arg4[%c0_42, %c0_43] : memref<128x512xbf16, #tpu.memory_space<vmem>>, vector<128x512xbf16>
    %cst_44 = arith.constant dense<0.000000e+00> : vector<8x512xf32>
    %127 = tpu.matmul %125, %126, %cst_44 {dimension_numbers = #tpu.dot_dimension_numbers<[1], [0], [0], [1], [0, 0, 1, 1], [], []>} : vector<8x128xbf16>, vector<128x512xbf16>, vector<8x512xf32> -> vector<8x512xf32>
    %128 = arith.addf %124, %127 : vector<8x512xf32>
    %129 = vector.extract_strided_slice %128 {offsets = [0, 0], sizes = [8, 128], strides = [1, 1]} : vector<8x512xf32> to vector<8x128xf32>
    %130 = arith.negf %129 : vector<8x128xf32>
    %131 = math.exp %130 : vector<8x128xf32>
    %cst_45 = arith.constant 1.000000e+00 : f32
    %132 = vector.broadcast %cst_45 : f32 to vector<8x128xf32>
    %133 = arith.addf %132, %131 : vector<8x128xf32>
    %134 = arith.divf %132, %133 : vector<8x128xf32>
    %135 = vector.extract_strided_slice %128 {offsets = [0, 128], sizes = [8, 128], strides = [1, 1]} : vector<8x512xf32> to vector<8x128xf32>
    %136 = arith.negf %135 : vector<8x128xf32>
    %137 = math.exp %136 : vector<8x128xf32>
    %cst_46 = arith.constant 1.000000e+00 : f32
    %138 = vector.broadcast %cst_46 : f32 to vector<8x128xf32>
    %139 = arith.addf %138, %137 : vector<8x128xf32>
    %140 = arith.divf %138, %139 : vector<8x128xf32>
    %141 = vector.extract_strided_slice %128 {offsets = [0, 256], sizes = [8, 128], strides = [1, 1]} : vector<8x512xf32> to vector<8x128xf32>
    %142 = math.tanh %141 : vector<8x128xf32>
    %143 = vector.extract_strided_slice %128 {offsets = [0, 384], sizes = [8, 128], strides = [1, 1]} : vector<8x512xf32> to vector<8x128xf32>
    %144 = arith.negf %143 : vector<8x128xf32>
    %145 = math.exp %144 : vector<8x128xf32>
    %cst_47 = arith.constant 1.000000e+00 : f32
    %146 = vector.broadcast %cst_47 : f32 to vector<8x128xf32>
    %147 = arith.addf %146, %145 : vector<8x128xf32>
    %148 = arith.divf %146, %147 : vector<8x128xf32>
    %149 = arith.mulf %140, %115 : vector<8x128xf32>
    %150 = arith.mulf %134, %142 : vector<8x128xf32>
    %151 = arith.addf %149, %150 : vector<8x128xf32>
    %152 = math.tanh %151 : vector<8x128xf32>
    %153 = arith.mulf %148, %152 : vector<8x128xf32>
    %154 = arith.truncf %153 : vector<8x128xf32> to vector<8x128xbf16>
    %155 = arith.index_cast %122 : i32 to index
    %c0_48 = arith.constant 0 : index
    %156 = vector.load %arg11[%155, %c0_48] : memref<64x128xbf16, #tpu.memory_space<vmem>>, vector<8x128xbf16>
    tpu.vector_store %arg11[%155, %c0_48], %154 {strides = array<i32>} : memref<64x128xbf16, #tpu.memory_space<vmem>>, vector<8x128xbf16>,
    %c4_i32 = arith.constant 4 : i32
    %c8_i32_49 = arith.constant 8 : i32
    %157 = arith.muli %c4_i32, %c8_i32_49 : i32
    %158 = tpu.assume_multiple %157, 8 : i32
    %159 = arith.index_cast %158 : i32 to index
    %c0_50 = arith.constant 0 : index
    %160 = vector.load %arg12[%159, %c0_50] : memref<64x512xf32, #tpu.memory_space<vmem>>, vector<8x512xf32>
    %161 = arith.truncf %153 : vector<8x128xf32> to vector<8x128xbf16>
    %c0_51 = arith.constant 0 : index
    %c0_52 = arith.constant 0 : index
    %162 = vector.load %arg4[%c0_51, %c0_52] : memref<128x512xbf16, #tpu.memory_space<vmem>>, vector<128x512xbf16>
    %cst_53 = arith.constant dense<0.000000e+00> : vector<8x512xf32>
    %163 = tpu.matmul %161, %162, %cst_53 {dimension_numbers = #tpu.dot_dimension_numbers<[1], [0], [0], [1], [0, 0, 1, 1], [], []>} : vector<8x128xbf16>, vector<128x512xbf16>, vector<8x512xf32> -> vector<8x512xf32>
    %164 = arith.addf %160, %163 : vector<8x512xf32>
    %165 = vector.extract_strided_slice %164 {offsets = [0, 0], sizes = [8, 128], strides = [1, 1]} : vector<8x512xf32> to vector<8x128xf32>
    %166 = arith.negf %165 : vector<8x128xf32>
    %167 = math.exp %166 : vector<8x128xf32>
    %cst_54 = arith.constant 1.000000e+00 : f32
    %168 = vector.broadcast %cst_54 : f32 to vector<8x128xf32>
    %169 = arith.addf %168, %167 : vector<8x128xf32>
    %170 = arith.divf %168, %169 : vector<8x128xf32>
    %171 = vector.extract_strided_slice %164 {offsets = [0, 128], sizes = [8, 128], strides = [1, 1]} : vector<8x512xf32> to vector<8x128xf32>
    %172 = arith.negf %171 : vector<8x128xf32>
    %173 = math.exp %172 : vector<8x128xf32>
    %cst_55 = arith.constant 1.000000e+00 : f32
    %174 = vector.broadcast %cst_55 : f32 to vector<8x128xf32>
    %175 = arith.addf %174, %173 : vector<8x128xf32>
    %176 = arith.divf %174, %175 : vector<8x128xf32>
    %177 = vector.extract_strided_slice %164 {offsets = [0, 256], sizes = [8, 128], strides = [1, 1]} : vector<8x512xf32> to vector<8x128xf32>
    %178 = math.tanh %177 : vector<8x128xf32>
    %179 = vector.extract_strided_slice %164 {offsets = [0, 384], sizes = [8, 128], strides = [1, 1]} : vector<8x512xf32> to vector<8x128xf32>
    %180 = arith.negf %179 : vector<8x128xf32>
    %181 = math.exp %180 : vector<8x128xf32>
    %cst_56 = arith.constant 1.000000e+00 : f32
    %182 = vector.broadcast %cst_56 : f32 to vector<8x128xf32>
    %183 = arith.addf %182, %181 : vector<8x128xf32>
    %184 = arith.divf %182, %183 : vector<8x128xf32>
    %185 = arith.mulf %176, %151 : vector<8x128xf32>
    %186 = arith.mulf %170, %178 : vector<8x128xf32>
    %187 = arith.addf %185, %186 : vector<8x128xf32>
    %188 = math.tanh %187 : vector<8x128xf32>
    %189 = arith.mulf %184, %188 : vector<8x128xf32>
    %190 = arith.truncf %189 : vector<8x128xf32> to vector<8x128xbf16>
    %191 = arith.index_cast %158 : i32 to index
    %c0_57 = arith.constant 0 : index
    %192 = vector.load %arg11[%191, %c0_57] : memref<64x128xbf16, #tpu.memory_space<vmem>>, vector<8x128xbf16>
    tpu.vector_store %arg11[%191, %c0_57], %190 {strides = array<i32>} : memref<64x128xbf16, #tpu.memory_space<vmem>>, vector<8x128xbf16>,
    %c5_i32 = arith.constant 5 : i32
    %c8_i32_58 = arith.constant 8 : i32
    %193 = arith.muli %c5_i32, %c8_i32_58 : i32
    %194 = tpu.assume_multiple %193, 8 : i32
    %195 = arith.index_cast %194 : i32 to index
    %c0_59 = arith.constant 0 : index
    %196 = vector.load %arg12[%195, %c0_59] : memref<64x512xf32, #tpu.memory_space<vmem>>, vector<8x512xf32>
    %197 = arith.truncf %189 : vector<8x128xf32> to vector<8x128xbf16>
    %c0_60 = arith.constant 0 : index
    %c0_61 = arith.constant 0 : index
    %198 = vector.load %arg4[%c0_60, %c0_61] : memref<128x512xbf16, #tpu.memory_space<vmem>>, vector<128x512xbf16>
    %cst_62 = arith.constant dense<0.000000e+00> : vector<8x512xf32>
    %199 = tpu.matmul %197, %198, %cst_62 {dimension_numbers = #tpu.dot_dimension_numbers<[1], [0], [0], [1], [0, 0, 1, 1], [], []>} : vector<8x128xbf16>, vector<128x512xbf16>, vector<8x512xf32> -> vector<8x512xf32>
    %200 = arith.addf %196, %199 : vector<8x512xf32>
    %201 = vector.extract_strided_slice %200 {offsets = [0, 0], sizes = [8, 128], strides = [1, 1]} : vector<8x512xf32> to vector<8x128xf32>
    %202 = arith.negf %201 : vector<8x128xf32>
    %203 = math.exp %202 : vector<8x128xf32>
    %cst_63 = arith.constant 1.000000e+00 : f32
    %204 = vector.broadcast %cst_63 : f32 to vector<8x128xf32>
    %205 = arith.addf %204, %203 : vector<8x128xf32>
    %206 = arith.divf %204, %205 : vector<8x128xf32>
    %207 = vector.extract_strided_slice %200 {offsets = [0, 128], sizes = [8, 128], strides = [1, 1]} : vector<8x512xf32> to vector<8x128xf32>
    %208 = arith.negf %207 : vector<8x128xf32>
    %209 = math.exp %208 : vector<8x128xf32>
    %cst_64 = arith.constant 1.000000e+00 : f32
    %210 = vector.broadcast %cst_64 : f32 to vector<8x128xf32>
    %211 = arith.addf %210, %209 : vector<8x128xf32>
    %212 = arith.divf %210, %211 : vector<8x128xf32>
    %213 = vector.extract_strided_slice %200 {offsets = [0, 256], sizes = [8, 128], strides = [1, 1]} : vector<8x512xf32> to vector<8x128xf32>
    %214 = math.tanh %213 : vector<8x128xf32>
    %215 = vector.extract_strided_slice %200 {offsets = [0, 384], sizes = [8, 128], strides = [1, 1]} : vector<8x512xf32> to vector<8x128xf32>
    %216 = arith.negf %215 : vector<8x128xf32>
    %217 = math.exp %216 : vector<8x128xf32>
    %cst_65 = arith.constant 1.000000e+00 : f32
    %218 = vector.broadcast %cst_65 : f32 to vector<8x128xf32>
    %219 = arith.addf %218, %217 : vector<8x128xf32>
    %220 = arith.divf %218, %219 : vector<8x128xf32>
    %221 = arith.mulf %212, %187 : vector<8x128xf32>
    %222 = arith.mulf %206, %214 : vector<8x128xf32>
    %223 = arith.addf %221, %222 : vector<8x128xf32>
    %224 = math.tanh %223 : vector<8x128xf32>
    %225 = arith.mulf %220, %224 : vector<8x128xf32>
    %226 = arith.truncf %225 : vector<8x128xf32> to vector<8x128xbf16>
    %227 = arith.index_cast %194 : i32 to index
    %c0_66 = arith.constant 0 : index
    %228 = vector.load %arg11[%227, %c0_66] : memref<64x128xbf16, #tpu.memory_space<vmem>>, vector<8x128xbf16>
    tpu.vector_store %arg11[%227, %c0_66], %226 {strides = array<i32>} : memref<64x128xbf16, #tpu.memory_space<vmem>>, vector<8x128xbf16>,
    %c6_i32 = arith.constant 6 : i32
    %c8_i32_67 = arith.constant 8 : i32
    %229 = arith.muli %c6_i32, %c8_i32_67 : i32
    %230 = tpu.assume_multiple %229, 8 : i32
    %231 = arith.index_cast %230 : i32 to index
    %c0_68 = arith.constant 0 : index
    %232 = vector.load %arg12[%231, %c0_68] : memref<64x512xf32, #tpu.memory_space<vmem>>, vector<8x512xf32>
    %233 = arith.truncf %225 : vector<8x128xf32> to vector<8x128xbf16>
    %c0_69 = arith.constant 0 : index
    %c0_70 = arith.constant 0 : index
    %234 = vector.load %arg4[%c0_69, %c0_70] : memref<128x512xbf16, #tpu.memory_space<vmem>>, vector<128x512xbf16>
    %cst_71 = arith.constant dense<0.000000e+00> : vector<8x512xf32>
    %235 = tpu.matmul %233, %234, %cst_71 {dimension_numbers = #tpu.dot_dimension_numbers<[1], [0], [0], [1], [0, 0, 1, 1], [], []>} : vector<8x128xbf16>, vector<128x512xbf16>, vector<8x512xf32> -> vector<8x512xf32>
    %236 = arith.addf %232, %235 : vector<8x512xf32>
    %237 = vector.extract_strided_slice %236 {offsets = [0, 0], sizes = [8, 128], strides = [1, 1]} : vector<8x512xf32> to vector<8x128xf32>
    %238 = arith.negf %237 : vector<8x128xf32>
    %239 = math.exp %238 : vector<8x128xf32>
    %cst_72 = arith.constant 1.000000e+00 : f32
    %240 = vector.broadcast %cst_72 : f32 to vector<8x128xf32>
    %241 = arith.addf %240, %239 : vector<8x128xf32>
    %242 = arith.divf %240, %241 : vector<8x128xf32>
    %243 = vector.extract_strided_slice %236 {offsets = [0, 128], sizes = [8, 128], strides = [1, 1]} : vector<8x512xf32> to vector<8x128xf32>
    %244 = arith.negf %243 : vector<8x128xf32>
    %245 = math.exp %244 : vector<8x128xf32>
    %cst_73 = arith.constant 1.000000e+00 : f32
    %246 = vector.broadcast %cst_73 : f32 to vector<8x128xf32>
    %247 = arith.addf %246, %245 : vector<8x128xf32>
    %248 = arith.divf %246, %247 : vector<8x128xf32>
    %249 = vector.extract_strided_slice %236 {offsets = [0, 256], sizes = [8, 128], strides = [1, 1]} : vector<8x512xf32> to vector<8x128xf32>
    %250 = math.tanh %249 : vector<8x128xf32>
    %251 = vector.extract_strided_slice %236 {offsets = [0, 384], sizes = [8, 128], strides = [1, 1]} : vector<8x512xf32> to vector<8x128xf32>
    %252 = arith.negf %251 : vector<8x128xf32>
    %253 = math.exp %252 : vector<8x128xf32>
    %cst_74 = arith.constant 1.000000e+00 : f32
    %254 = vector.broadcast %cst_74 : f32 to vector<8x128xf32>
    %255 = arith.addf %254, %253 : vector<8x128xf32>
    %256 = arith.divf %254, %255 : vector<8x128xf32>
    %257 = arith.mulf %248, %223 : vector<8x128xf32>
    %258 = arith.mulf %242, %250 : vector<8x128xf32>
    %259 = arith.addf %257, %258 : vector<8x128xf32>
    %260 = math.tanh %259 : vector<8x128xf32>
    %261 = arith.mulf %256, %260 : vector<8x128xf32>
    %262 = arith.truncf %261 : vector<8x128xf32> to vector<8x128xbf16>
    %263 = arith.index_cast %230 : i32 to index
    %c0_75 = arith.constant 0 : index
    %264 = vector.load %arg11[%263, %c0_75] : memref<64x128xbf16, #tpu.memory_space<vmem>>, vector<8x128xbf16>
    tpu.vector_store %arg11[%263, %c0_75], %262 {strides = array<i32>} : memref<64x128xbf16, #tpu.memory_space<vmem>>, vector<8x128xbf16>,
    %c7_i32 = arith.constant 7 : i32
    %c8_i32_76 = arith.constant 8 : i32
    %265 = arith.muli %c7_i32, %c8_i32_76 : i32
    %266 = tpu.assume_multiple %265, 8 : i32
    %267 = arith.index_cast %266 : i32 to index
    %c0_77 = arith.constant 0 : index
    %268 = vector.load %arg12[%267, %c0_77] : memref<64x512xf32, #tpu.memory_space<vmem>>, vector<8x512xf32>
    %269 = arith.truncf %261 : vector<8x128xf32> to vector<8x128xbf16>
    %c0_78 = arith.constant 0 : index
    %c0_79 = arith.constant 0 : index
    %270 = vector.load %arg4[%c0_78, %c0_79] : memref<128x512xbf16, #tpu.memory_space<vmem>>, vector<128x512xbf16>
    %cst_80 = arith.constant dense<0.000000e+00> : vector<8x512xf32>
    %271 = tpu.matmul %269, %270, %cst_80 {dimension_numbers = #tpu.dot_dimension_numbers<[1], [0], [0], [1], [0, 0, 1, 1], [], []>} : vector<8x128xbf16>, vector<128x512xbf16>, vector<8x512xf32> -> vector<8x512xf32>
    %272 = arith.addf %268, %271 : vector<8x512xf32>
    %273 = vector.extract_strided_slice %272 {offsets = [0, 0], sizes = [8, 128], strides = [1, 1]} : vector<8x512xf32> to vector<8x128xf32>
    %274 = arith.negf %273 : vector<8x128xf32>
    %275 = math.exp %274 : vector<8x128xf32>
    %cst_81 = arith.constant 1.000000e+00 : f32
    %276 = vector.broadcast %cst_81 : f32 to vector<8x128xf32>
    %277 = arith.addf %276, %275 : vector<8x128xf32>
    %278 = arith.divf %276, %277 : vector<8x128xf32>
    %279 = vector.extract_strided_slice %272 {offsets = [0, 128], sizes = [8, 128], strides = [1, 1]} : vector<8x512xf32> to vector<8x128xf32>
    %280 = arith.negf %279 : vector<8x128xf32>
    %281 = math.exp %280 : vector<8x128xf32>
    %cst_82 = arith.constant 1.000000e+00 : f32
    %282 = vector.broadcast %cst_82 : f32 to vector<8x128xf32>
    %283 = arith.addf %282, %281 : vector<8x128xf32>
    %284 = arith.divf %282, %283 : vector<8x128xf32>
    %285 = vector.extract_strided_slice %272 {offsets = [0, 256], sizes = [8, 128], strides = [1, 1]} : vector<8x512xf32> to vector<8x128xf32>
    %286 = math.tanh %285 : vector<8x128xf32>
    %287 = vector.extract_strided_slice %272 {offsets = [0, 384], sizes = [8, 128], strides = [1, 1]} : vector<8x512xf32> to vector<8x128xf32>
    %288 = arith.negf %287 : vector<8x128xf32>
    %289 = math.exp %288 : vector<8x128xf32>
    %cst_83 = arith.constant 1.000000e+00 : f32
    %290 = vector.broadcast %cst_83 : f32 to vector<8x128xf32>
    %291 = arith.addf %290, %289 : vector<8x128xf32>
    %292 = arith.divf %290, %291 : vector<8x128xf32>
    %293 = arith.mulf %284, %259 : vector<8x128xf32>
    %294 = arith.mulf %278, %286 : vector<8x128xf32>
    %295 = arith.addf %293, %294 : vector<8x128xf32>
    %296 = math.tanh %295 : vector<8x128xf32>
    %297 = arith.mulf %292, %296 : vector<8x128xf32>
    %298 = arith.truncf %297 : vector<8x128xf32> to vector<8x128xbf16>
    %299 = arith.index_cast %266 : i32 to index
    %c0_84 = arith.constant 0 : index
    %300 = vector.load %arg11[%299, %c0_84] : memref<64x128xbf16, #tpu.memory_space<vmem>>, vector<8x128xbf16>
    tpu.vector_store %arg11[%299, %c0_84], %298 {strides = array<i32>} : memref<64x128xbf16, #tpu.memory_space<vmem>>, vector<8x128xbf16>,
    %c8_i32_85 = arith.constant 8 : i32
    %c0_86 = arith.constant 0 : index
    %c0_87 = arith.constant 0 : index
    %301 = vector.load %arg9[%c0_86, %c0_87] : memref<8x128xf32, #tpu.memory_space<vmem>>, vector<8x128xf32>
    tpu.vector_store %arg9[%c0_86, %c0_87], %297 {strides = array<i32>} : memref<8x128xf32, #tpu.memory_space<vmem>>, vector<8x128xf32>,
    %c0_88 = arith.constant 0 : index
    %c0_89 = arith.constant 0 : index
    %302 = vector.load %arg10[%c0_88, %c0_89] : memref<8x128xf32, #tpu.memory_space<vmem>>, vector<8x128xf32>
    tpu.vector_store %arg10[%c0_88, %c0_89], %295 {strides = array<i32>} : memref<8x128xf32, #tpu.memory_space<vmem>>, vector<8x128xf32>,
    %c0_90 = arith.constant 0 : index
    %c0_91 = arith.constant 0 : index
    %303 = vector.load %arg11[%c0_90, %c0_91] : memref<64x128xbf16, #tpu.memory_space<vmem>>, vector<64x128xbf16>
    %c0_92 = arith.constant 0 : index
    %c0_93 = arith.constant 0 : index
    %304 = vector.load %arg6[%c0_92, %c0_93] : memref<128x128xbf16, #tpu.memory_space<vmem>>, vector<128x128xbf16>
    %cst_94 = arith.constant dense<0.000000e+00> : vector<64x128xf32>
    %305 = tpu.matmul %303, %304, %cst_94 {dimension_numbers = #tpu.dot_dimension_numbers<[1], [0], [0], [1], [0, 0, 1, 1], [], []>} : vector<64x128xbf16>, vector<128x128xbf16>, vector<64x128xf32> -> vector<64x128xf32>
    %c0_95 = arith.constant 0 : index
    %c0_96 = arith.constant 0 : index
    %306 = vector.load %arg7[%c0_95, %c0_96] : memref<1x128xf32, #tpu.memory_space<vmem>>, vector<1x128xf32>
    %307 = vector.broadcast %306 : vector<1x128xf32> to vector<64x128xf32>
    %308 = arith.addf %305, %307 : vector<64x128xf32>
    %c0_97 = arith.constant 0 : index
    %c0_98 = arith.constant 0 : index
    %c0_99 = arith.constant 0 : index
    %309 = vector.load %arg8[%c0_97, %c0_98, %c0_99] : memref<1x64x128xf32, #tpu.memory_space<vmem>>, vector<1x64x128xf32>
    %310 = vector.shape_cast %309 : vector<1x64x128xf32> to vector<64x128xf32>
    %311 = vector.shape_cast %308 : vector<64x128xf32> to vector<1x64x128xf32>
    tpu.vector_store %arg8[%c0_97, %c0_98, %c0_99], %311 {strides = array<i32>} : memref<1x64x128xf32, #tpu.memory_space<vmem>>, vector<1x64x128xf32>,
    return
  }
  func.func @transform_0(%arg0: i32, %arg1: i32) -> (i32, i32, i32) {
    %c0_i32 = arith.constant 0 : i32
    %c0_i32_0 = arith.constant 0 : i32
    return %arg0, %arg1, %c0_i32 : i32, i32, i32
  }
  func.func @transform_1(%arg0: i32, %arg1: i32) -> (i32, i32) {
    %c0_i32 = arith.constant 0 : i32
    %c0_i32_0 = arith.constant 0 : i32
    %c0_i32_1 = arith.constant 0 : i32
    return %c0_i32, %c0_i32_0 : i32, i32
  }
  func.func @transform_2(%arg0: i32, %arg1: i32) -> (i32, i32) {
    %c0_i32 = arith.constant 0 : i32
    %c0_i32_0 = arith.constant 0 : i32
    %c0_i32_1 = arith.constant 0 : i32
    return %c0_i32, %c0_i32_0 : i32, i32
  }
  func.func @transform_3(%arg0: i32, %arg1: i32) -> (i32, i32) {
    %c0_i32 = arith.constant 0 : i32
    %c0_i32_0 = arith.constant 0 : i32
    %c0_i32_1 = arith.constant 0 : i32
    return %c0_i32, %c0_i32_0 : i32, i32
  }
  func.func @transform_4(%arg0: i32, %arg1: i32) -> (i32, i32) {
    %c0_i32 = arith.constant 0 : i32
    %c0_i32_0 = arith.constant 0 : i32
    %c0_i32_1 = arith.constant 0 : i32
    return %c0_i32, %c0_i32_0 : i32, i32
  }
  func.func @transform_5(%arg0: i32, %arg1: i32) -> (i32, i32) {
    %c0_i32 = arith.constant 0 : i32
    %c0_i32_0 = arith.constant 0 : i32
    %c0_i32_1 = arith.constant 0 : i32
    return %c0_i32, %c0_i32_0 : i32, i32
  }
  func.func @transform_6(%arg0: i32, %arg1: i32) -> (i32, i32, i32) {
    %c0_i32 = arith.constant 0 : i32
    %c0_i32_0 = arith.constant 0 : i32
    return %arg0, %arg1, %c0_i32 : i32, i32, i32
  }
}

</mosaic_0001>

<bundles_post_ra>
// kernel: tpu_custom_call.1
= control target key start
LH: loop header
LB: loop body
LE: loop exit
PB: predicated region body
PF: predicated region fallthrough
CT: control target
= control target key end

     0   :  { %11 = vsyncpa [#allocation7], 0  ;;  %s4355_s0 = inlined_call_operand.vmem [shape: bf16[1,64,16], index: 0, kind: input, shape index: {}]   ;;  %s4356_s1 = inlined_call_operand.vmem [shape: bf16[16,512], index: 1, kind: input, shape index: {}]   ;;  %s4357_s2 = inlined_call_operand.hbm [shape: bf16[128,512], index: 2, kind: input, shape index: {}]   ;;  %s4358_s3 = inlined_call_operand.vmem [shape: f32[1,512], index: 3, kind: input, shape index: {}]   ;;  %s4359_s4 = inlined_call_operand.hbm [shape: bf16[128,128], index: 4, kind: input, shape index: {}]   ;;  %s4360_s5 = inlined_call_operand.vmem [shape: f32[1,128], index: 5, kind: input, shape index: {}]   ;;  %s4361_s6 = inlined_call_operand.hbm [shape: f32[1,64,128], index: 6, kind: output, shape index: {}]  }
   0x1   :  { %12 = vsyncpa [#allocation10], 0 }
   0x2   :  { %13 = vsyncpa [#allocation8], 0  ;;  %s3702_s21 = smov [#allocation6]  }
   0x3   :  { %s23_s22 = sshll.u32 %s3702_s21, 4  ;;  %s24_s22 = int_to_ptr.vmem [resolvable:$true] %s23_s22 }
   0x4   :  { %s3644_s23 = scalar_lea.vmem %s24_s22, 4096  ;;  %p3649_p1 = scmp.lt.s32.totalorder %s24_s22, %s24_s22 }
   0x5   :  { %p3645_p0 = scmp.ne.s32.totalorder %s24_s22, %s3644_s23  ;;  %p3650_p2 = scmp.lt.s32.totalorder %s3644_s23, %s3644_s23 }
   0x7   :  { %p3651_p3 = por %p3650_p2, %p3649_p1 }
   0x9   :  { %p3652_p4 = pnand %p3651_p3, %p3645_p0 }
   0xb   :  { %3655 = shalt.err (!%p3652_p4)
}
   0xc   :  { %s3703_s24 = smov 256   ;;  %s3704_s25 = smov 16  }
   0xd   :  { %29 = dma.hbm_to_vmem [thread:$0]  %s4357_s2, 4096, %s24_s22, [#allocation7], %s3703_s24, %s3703_s24, %s3704_s25  }
   0xe   :  { %s3705_s28 = smov [#allocation9]  }
   0xf   :  { %s37_s29 = sshll.u32 %s3705_s28, 4  ;;  %s38_s29 = int_to_ptr.vmem [resolvable:$true] %s37_s29 }
  0x10   :  { %s3664_s30 = scalar_lea.vmem %s38_s29, 1024  ;;  %p3669_p6 = scmp.lt.s32.totalorder %s38_s29, %s38_s29 }
  0x11   :  { %p3665_p5 = scmp.ne.s32.totalorder %s38_s29, %s3664_s30  ;;  %p3670_p7 = scmp.lt.s32.totalorder %s3664_s30, %s3664_s30 }
  0x13   :  { %p3671_p8 = por %p3670_p7, %p3669_p6 }
  0x15   :  { %p3672_p9 = pnand %p3671_p8, %p3665_p5 }
  0x17   :  { %3675 = shalt.err (!%p3672_p9)
}
  0x18   :  { %s3706_s7 = smov 64   ;;  %s3707_s8 = smov 4  }
  0x19   :  { %43 = dma.hbm_to_vmem [thread:$0]  %s4359_s4, 1024, %s38_s29, [#allocation10], %s3706_s7, %s3706_s7, %s3707_s8  }
  0x1a   :  { %3696 = dma.done.wait [#allocation7], 4096  }
  0x1b   :  { %3697 = vsyncadd [#allocation7], 4294963200 }
  0x1c   :  { %3698 = dma.done.wait [#allocation10], 1024  }
  0x1d   :  { %3699 = vsyncadd [#allocation10], 4294966272  ;;  %v4362_v0 = vmov 0   ;;  %v3381_v1 = vld [vmem:[%s4356_s1 + $0xc] ss:$16 sps:$4 sm:$0xff]   ;;  %v3384_v3 = vld [vmem:[%s4355_s0] sm:$0xff]   ;;  %v73_v42 = vlaneseq }
  0x1e   :  { %251 = vmatprep.mubr.bf16.mxu1 %v4362_v0  ;;  %178 = vmatprep.mubr.bf16.mxu0 %v4362_v0  ;;  %v3383_v2 = vld [vmem:[%s4356_s1 + $0x8] ss:$16 sps:$4 sm:$0xff]   ;;  %vm133_vm0 = vcmask 130048   ;;  %v3765_v4 = vld [vmem:[#allocation6 + $0xe0] ss:$16 sps:$4 sm:$0xff]   ;;  %v3709_v29 = vmov 0.0|0.0  }
  0x1f   :  { %233 = vmatprep.subr.bf16.mxu1 %v3381_v1  ;;  %v3767_v5 = vld [vmem:[#allocation6 + $0xe4] ss:$16 sps:$4 sm:$0xff]   ;;  %v3774_v7 = vld [vmem:[#allocation6 + $0xc0] ss:$16 sps:$4 sm:$0xff]   ;;  %v3391_v9 = vld [vmem:[%s4355_s0 + $0x8] sm:$0xff]   ;;  %v74_v43 = vshrl.u32 %v73_v42, 7 }
  0x20   :  { %234 = vmatpush1.bf16.msra.mxu1 %v3383_v2  ;;  %v3769_v6 = vld [vmem:[#allocation6 + $0xc4] ss:$16 sps:$4 sm:$0xff]   ;;  %v3784_v10 = vld [vmem:[#allocation6 + $0xa0] ss:$16 sps:$4 sm:$0xff]   ;;  %v3405_v21 = vld [vmem:[%s4355_s0 + $0x18] sm:$0xff]  }
  0x21   :  { %526 = vmatprep.subr.bf16.mxu1 %v3767_v5  ;;  %v3778_v8 = vld [vmem:[#allocation6 + $0xa4] ss:$16 sps:$4 sm:$0xff]   ;;  %v3790_v12 = vld [vmem:[#allocation6 + $0x80] ss:$16 sps:$4 sm:$0xff]   ;;  %v3840_v25 = vld [vmem:[#allocation6 + $0xec] ss:$16 sps:$4 sm:$0xff]  }
  0x22   :  { %v3787_v11 = vld [vmem:[#allocation6 + $0x84] ss:$16 sps:$4 sm:$0xff]   ;;  %v3411_v14 = vld [vmem:[%s4356_s1] ss:$16 sps:$4 sm:$0xff]   ;;  %v3847_v26 = vld [vmem:[#allocation6 + $0xe8] ss:$16 sps:$4 sm:$0xff]  }
  0x23   :  { %3037 = vmatmul.mubr.msk.bf16.vlgmr.msra.gmra.mxu1 %vm133_vm0, %v3384_v3  ;;  %v3409_v13 = vld [vmem:[%s4356_s1 + $0x4] ss:$16 sps:$4 sm:$0xff]   ;;  %v3807_v17 = vld [vmem:[#allocation6 + $0x60] ss:$16 sps:$4 sm:$0xff]   ;;  %v3850_v27 = vld [vmem:[#allocation6 + $0xcc] ss:$16 sps:$4 sm:$0xff]  }
  0x24   :  { %527 = vmatpush1.bf16.msra.mxu1 %v3765_v4  ;;  %261 = vmatprep.mubr.bf16.mxu1 %v4362_v0  ;;  %v3801_v15 = vld [vmem:[#allocation6 + $0x64] ss:$16 sps:$4 sm:$0xff]   ;;  %v3817_v19 = vld [vmem:[#allocation6 + $0x40] ss:$16 sps:$4 sm:$0xff]   ;;  %v3856_v28 = vld [vmem:[#allocation6 + $0xc8] ss:$16 sps:$4 sm:$0xff]  }
  0x25   :  { %528 = vmatprep.subr.bf16.mxu1 %v3769_v6  ;;  %160 = vmatprep.subr.bf16.mxu0 %v3409_v13  ;;  %v3398_v16 = vld [vmem:[%s4355_s0 + $0x10] sm:$0xff]   ;;  %v3859_v30 = vld [vmem:[#allocation6 + $0xac] ss:$16 sps:$4 sm:$0xff]   ;;  %v3866_v31 = vld [vmem:[#allocation6 + $0xa8] ss:$16 sps:$4 sm:$0xff]   ;;  %v83_v44 = vsub.s32 2, %v74_v43 }
  0x26   :  { %161 = vmatpush1.bf16.msra.mxu0 %v3411_v14  ;;  %v3811_v18 = vld [vmem:[#allocation6 + $0x44] ss:$16 sps:$4 sm:$0xff]   ;;  %v3830_v22 = vld [vmem:[#allocation6 + $0x20] ss:$16 sps:$4 sm:$0xff]   ;;  %v3869_v32 = vld [vmem:[#allocation6 + $0x8c] ss:$16 sps:$4 sm:$0xff]  }
  0x27   :  { %837 = vmatprep.subr.bf16.mxu0 %v3767_v5  ;;  %v3821_v20 = vld [vmem:[#allocation6 + $0x24] ss:$16 sps:$4 sm:$0xff]   ;;  %v3836_v24 = vld [vmem:[#allocation6] ss:$16 sps:$4 sm:$0xff]   ;;  %v3879_v33 = vld [vmem:[#allocation6 + $0x88] ss:$16 sps:$4 sm:$0xff]  }
  0x28   :  { %529 = vmatpush1.bf16.msra.mxu1 %v3774_v7  ;;  %v3834_v23 = vld [vmem:[#allocation6 + $0x4] ss:$16 sps:$4 sm:$0xff]   ;;  %v3883_v34 = vld [vmem:[#allocation6 + $0x6c] ss:$16 sps:$4 sm:$0xff]   ;;  %v3887_v35 = vld [vmem:[#allocation6 + $0x68] ss:$16 sps:$4 sm:$0xff]  }
  0x29   :  { %530 = vmatprep.subr.bf16.mxu1 %v3778_v8  ;;  %3033 = vmatmul.mubr.msk.bf16.vlgmr.msra.gmra.mxu0 %vm133_vm0, %v3384_v3  ;;  %v3891_v36 = vld [vmem:[#allocation6 + $0x4c] ss:$16 sps:$4 sm:$0xff]   ;;  %v3894_v37 = vld [vmem:[#allocation6 + $0x48] ss:$16 sps:$4 sm:$0xff]   ;;  %v71_v45 = vld [vmem:[%s4358_s3] sm:$0xf] }
  0x2a   :  { %838 = vmatpush1.bf16.msra.mxu0 %v3765_v4  ;;  %188 = vmatprep.mubr.bf16.mxu0 %v4362_v0  ;;  %v3897_v38 = vld [vmem:[#allocation6 + $0x2c] ss:$16 sps:$4 sm:$0xff]   ;;  %v3900_v39 = vld [vmem:[#allocation6 + $0x28] ss:$16 sps:$4 sm:$0xff]   ;;  %v87_v47 = vsub.s32 3, %v74_v43  ;;  %v3935_v49 = vrot.slane %v71_v45, %v83_v44  ;;  %v75_v13 = vsub.s32 0, %v74_v43 }
  0x2b   :  { %3038 = vmatmul.mubr.msk.bf16.gmra.mxu1 %vm133_vm0, %v3391_v9  ;;  %839 = vmatprep.subr.bf16.mxu0 %v3769_v6  ;;  %v3903_v40 = vld [vmem:[#allocation6 + $0xc] ss:$16 sps:$4 sm:$0xff]   ;;  %v3906_v41 = vld [vmem:[#allocation6 + $0x8] ss:$16 sps:$4 sm:$0xff]  }
  0x2c   :  { %531 = vmatpush1.bf16.msra.mxu1 %v3784_v10  ;;  %271 = vmatprep.mubr.bf16.mxu1 %v4362_v0  ;;  %v3937_v51 = vrot.slane %v71_v45, %v87_v47 }
  0x2d   :  { %532 = vmatprep.subr.bf16.mxu1 %v3787_v11 }
  0x2e   :  { %840 = vmatpush1.bf16.msra.mxu0 %v3774_v7 }
  0x2f   :  { %841 = vmatprep.subr.bf16.mxu0 %v3778_v8 }
  0x30   :  { %533 = vmatpush1.bf16.msra.mxu1 %v3790_v12 }
  0x31   :  { %534 = vmatprep.subr.bf16.mxu1 %v3801_v15  ;;  %3034 = vmatmul.mubr.msk.bf16.gmra.mxu0 %vm133_vm0, %v3391_v9 }
  0x32   :  { %842 = vmatpush1.bf16.msra.mxu0 %v3784_v10  ;;  %198 = vmatprep.mubr.bf16.mxu0 %v4362_v0 }
  0x33   :  { %3039 = vmatmul.mubr.msk.bf16.gmra.mxu1 %vm133_vm0, %v3398_v16  ;;  %843 = vmatprep.subr.bf16.mxu0 %v3787_v11 }
  0x34   :  { %535 = vmatpush1.bf16.msra.mxu1 %v3807_v17  ;;  %281 = vmatprep.mubr.bf16.mxu1 %v4362_v0 }
  0x35   :  { %536 = vmatprep.subr.bf16.mxu1 %v3811_v18 }
  0x36   :  { %844 = vmatpush1.bf16.msra.mxu0 %v3790_v12 }
  0x37   :  { %845 = vmatprep.subr.bf16.mxu0 %v3801_v15 }
  0x38   :  { %537 = vmatpush1.bf16.msra.mxu1 %v3817_v19 }
  0x39   :  { %538 = vmatprep.subr.bf16.mxu1 %v3821_v20  ;;  %3035 = vmatmul.mubr.msk.bf16.gmra.mxu0 %vm133_vm0, %v3398_v16 }
  0x3a   :  { %846 = vmatpush1.bf16.msra.mxu0 %v3807_v17  ;;  %208 = vmatprep.mubr.bf16.mxu0 %v4362_v0 }
  0x3b   :  { %3040 = vmatmul.mubr.msk.bf16.gmra.mxu1 %vm133_vm0, %v3405_v21  ;;  %847 = vmatprep.subr.bf16.mxu0 %v3811_v18 }
  0x3c   :  { %539 = vmatpush1.bf16.msra.mxu1 %v3830_v22  ;;  %558 = vmatprep.mubr.bf16.mxu1 %v4362_v0 }
  0x3d   :  { %540 = vmatprep.subr.bf16.mxu1 %v3834_v23 }
  0x3e   :  { %848 = vmatpush1.bf16.msra.mxu0 %v3817_v19 }
  0x3f   :  { %849 = vmatprep.subr.bf16.mxu0 %v3821_v20 }
  0x40   :  { %541 = vmatpush1.bf16.msra.mxu1 %v3836_v24 }
  0x41   :  { %567 = vmatprep.subr.bf16.mxu1 %v3840_v25  ;;  %3036 = vmatmul.mubr.msk.bf16.gmra.mxu0 %vm133_vm0, %v3405_v21 }
  0x42   :  { %850 = vmatpush1.bf16.msra.mxu0 %v3830_v22  ;;  %869 = vmatprep.mubr.bf16.mxu0 %v4362_v0 }
  0x43   :  { %559 = vmatmul.mubr.bf16.vlgmr.msra.gmra.mxu1 %v3709_v29  ;;  %851 = vmatprep.subr.bf16.mxu0 %v3834_v23 }
  0x44   :  { %568 = vmatpush1.bf16.msra.mxu1 %v3847_v26  ;;  %599 = vmatprep.mubr.bf16.mxu1 %v4362_v0 }
  0x45   :  { %569 = vmatprep.subr.bf16.mxu1 %v3850_v27 }
  0x46   :  { %852 = vmatpush1.bf16.msra.mxu0 %v3836_v24 }
  0x47   :  { %1149 = vmatprep.subr.bf16.mxu0 %v3767_v5 }
  0x48   :  { %570 = vmatpush1.bf16.msra.mxu1 %v3856_v28 }
  0x49   :  { %571 = vmatprep.subr.bf16.mxu1 %v3859_v30 }
  0x4c   :  { %572 = vmatpush1.bf16.msra.mxu1 %v3866_v31 }
  0x4d   :  { %573 = vmatprep.subr.bf16.mxu1 %v3869_v32 }
  0x50   :  { %574 = vmatpush1.bf16.msra.mxu1 %v3879_v33 }
  0x51   :  { %575 = vmatprep.subr.bf16.mxu1 %v3883_v34 }
  0x54   :  { %576 = vmatpush1.bf16.msra.mxu1 %v3887_v35 }
  0x55   :  { %577 = vmatprep.subr.bf16.mxu1 %v3891_v36 }
  0x58   :  { %578 = vmatpush1.bf16.msra.mxu1 %v3894_v37 }
  0x59   :  { %579 = vmatprep.subr.bf16.mxu1 %v3897_v38 }
  0x5c   :  { %580 = vmatpush1.bf16.msra.mxu1 %v3900_v39 }
  0x5d   :  { %581 = vmatprep.subr.bf16.mxu1 %v3903_v40 }
  0x60   :  { %582 = vmatpush1.bf16.msra.mxu1 %v3906_v41 }
  0x61   :  { %878 = vmatprep.subr.bf16.mxu1 %v3840_v25 }
  0x63   :  { %600 = vmatmul.mubr.bf16.vlgmr.msra.gmra.mxu1 %v3709_v29  ;;  %v79_v29 = vsub.s32 1, %v74_v43 }
  0x64   :  { %879 = vmatpush1.bf16.msra.mxu1 %v3847_v26  ;;  %910 = vmatprep.mubr.bf16.mxu1 %v4362_v0 }
  0x65   :  { %880 = vmatprep.subr.bf16.mxu1 %v3850_v27 }
  0x68   :  { %881 = vmatpush1.bf16.msra.mxu1 %v3856_v28 }
  0x69   :  { %882 = vmatprep.subr.bf16.mxu1 %v3859_v30 }
  0x6c   :  { %883 = vmatpush1.bf16.msra.mxu1 %v3866_v31 }
  0x6d   :  { %884 = vmatprep.subr.bf16.mxu1 %v3869_v32 }
  0x70   :  { %885 = vmatpush1.bf16.msra.mxu1 %v3879_v33 }
  0x71   :  { %886 = vmatprep.subr.bf16.mxu1 %v3883_v34 }
  0x74   :  { %887 = vmatpush1.bf16.msra.mxu1 %v3887_v35 }
  0x75   :  { %888 = vmatprep.subr.bf16.mxu1 %v3891_v36 }
  0x78   :  { %889 = vmatpush1.bf16.msra.mxu1 %v3894_v37 }
  0x79   :  { %890 = vmatprep.subr.bf16.mxu1 %v3897_v38 }
  0x7c   :  { %891 = vmatpush1.bf16.msra.mxu1 %v3900_v39 }
  0x7d   :  { %892 = vmatprep.subr.bf16.mxu1 %v3903_v40 }
  0x80   :  { %893 = vmatpush1.bf16.msra.mxu1 %v3906_v41 }
  0x81   :  { %1190 = vmatprep.subr.bf16.mxu1 %v3840_v25 }
  0xe3   :  { %v3931_v46 = vpop.f32.mrf.mxu1 }
  0xe5   :  { %v3933_v48 = vpop.f32.mrf.mxu1 }
  0xe7   :  { %v257_v50 = vpop.f32.mrf.mxu1 }
  0xe8   :  { %v3940_v52 = vadd.f32 %v257_v50, %v3935_v49  ;;  %v3970_v50 = vrot.slane %v71_v45, %v75_v13 }
  0xe9   :  { %v259_v53 = vpop.f32.mrf.mxu1  ;;  %v180_v63 = vpop.f32.mrf.mxu0 }
  0xea   :  { %v3943_v54 = vadd.f32 %v259_v53, %v3937_v51 }
  0xeb   :  { %v263_v55 = vpop.f32.mrf.mxu1  ;;  %v182_v3 = vpop.f32.mrf.mxu0 }
  0xec   :  { %v3946_v56 = vadd.f32 %v263_v55, %v3935_v49 }
  0xed   :  { %v265_v57 = vpop.f32.mrf.mxu1  ;;  %v3963_v16 = vpop.f32.mrf.mxu0 }
  0xee   :  { %v3949_v58 = vadd.f32 %v265_v57, %v3937_v51 }
  0xef   :  { %v267_v59 = vpop.f32.mrf.mxu1  ;;  %v3968_v44 = vpop.f32.mrf.mxu0 }
  0xf0   :  { %v3952_v60 = vadd.f32 %v267_v59, %v3935_v49  ;;  %v3975_v59 = vrot.slane %v71_v45, %v79_v29 }
  0xf1   :  { %v269_v61 = vpop.f32.mrf.mxu1  ;;  %v190_v55 = vpop.f32.mrf.mxu0 }
  0xf2   :  { %4364 = vst [vmem:[#allocation15_spill] sm:$0xff] %v3952_v60  ;;  %v3955_v62 = vadd.f32 %v269_v61, %v3937_v51  ;;  %v3978_v61 = vadd.f32 %v190_v55, %v3970_v50 }
  0xf3   :  { %v273_v1 = vpop.f32.mrf.mxu1 }
  0xf4   :  { %4365 = vst [vmem:[#allocation16_spill] sm:$0xff] %v3955_v62  ;;  %v3958_v2 = vadd.f32 %v273_v1, %v3935_v49  ;;  %v192_v1 = vpop.f32.mrf.mxu0 }
  0xf5   :  { %v275_v9 = vpop.f32.mrf.mxu1 }
  0xf6   :  { %4366 = vst [vmem:[#allocation17_spill] sm:$0xff] %v3958_v2  ;;  %v3961_v14 = vadd.f32 %v275_v9, %v3937_v51  ;;  %v181_v2 = vadd.f32 %v180_v63, %v3970_v50 }
  0xf7   :  { %v277_v21 = vpop.f32.mrf.mxu1 }
  0xf8   :  { %4367 = vst [vmem:[#allocation18_spill] sm:$0xff] %v3961_v14  ;;  %v3966_v42 = vadd.f32 %v277_v21, %v3935_v49  ;;  %v3984_v21 = vadd.f32 %v192_v1, %v3975_v59 }
  0xf9   :  { %v279_v47 = vpop.f32.mrf.mxu1 }
  0xfa   :  { %4368 = vst [vmem:[#allocation19_spill] sm:$0xff] %v3966_v42  ;;  %v3973_v53 = vadd.f32 %v279_v47, %v3937_v51  ;;  %v194_v47 = vpop.f32.mrf.mxu0 }
  0xfb   :  { %v283_v57 = vpop.f32.mrf.mxu1  ;;  %v3990_v42 = vadd.f32 %v194_v47, %v3970_v50 }
  0xfc   :  { %4369 = vst [vmem:[#allocation20_spill] sm:$0xff] %v3973_v53  ;;  %v3981_v43 = vadd.f32 %v283_v57, %v3935_v49  ;;  %v196_v29 = vpop.f32.mrf.mxu0 }
  0xfd   :  { %v285_v9 = vpop.f32.mrf.mxu1  ;;  %4372 = vst [vmem:[#allocation23_spill] sm:$0xff] %v3990_v42  ;;  %v3996_v57 = vadd.f32 %v196_v29, %v3975_v59 }
  0xfe   :  { %4370 = vst [vmem:[#allocation21_spill] sm:$0xff] %v3981_v43  ;;  %v3987_v13 = vadd.f32 %v285_v9, %v3937_v51  ;;  %v200_v1 = vpop.f32.mrf.mxu0 }
  0xff   :  { %v287_v0 = vpop.f32.mrf.mxu1  ;;  %4374 = vst [vmem:[#allocation25_spill] sm:$0xff] %v3996_v57  ;;  %v4002_v9 = vadd.f32 %v200_v1, %v3970_v50 }
 0x100   :  { %4371 = vst [vmem:[#allocation22_spill] sm:$0xff] %v3987_v13  ;;  %v3993_v45 = vadd.f32 %v287_v0, %v3935_v49  ;;  %v183_v13 = vadd.f32 %v182_v3, %v3975_v59  ;;  %v202_v47 = vpop.f32.mrf.mxu0 }
 0x101   :  { %v289_v55 = vpop.f32.mrf.mxu1  ;;  %4376 = vst [vmem:[#allocation27_spill] sm:$0xff] %v4002_v9 }
 0x102   :  { %4373 = vst [vmem:[#allocation24_spill] sm:$0xff] %v3993_v45  ;;  %v3999_v43 = vadd.f32 %v289_v55, %v3937_v51  ;;  %v4007_v45 = vadd.f32 %v202_v47, %v3975_v59  ;;  %v204_v14 = vpop.f32.mrf.mxu0 }
 0x103   :  { %v560_v53 = vpop.f32.mrf.mxu1  ;;  %v4010_v60 = vadd.f32 %v204_v14, %v3970_v50 }
 0x104   :  { %4375 = vst [vmem:[#allocation26_spill] sm:$0xff] %v3999_v43  ;;  %4377 = vst [vmem:[#allocation28_spill] sm:$0xff] %v4007_v45  ;;  %v206_v43 = vpop.f32.mrf.mxu0  ;;  %v608_v62 = vadd.f32 %v560_v53, %v181_v2 }
 0x105   :  { %v562_v0 = vpop.f32.mrf.mxu1  ;;  %v4013_v1 = vadd.f32 %v206_v43, %v3975_v59 }
 0x106   :  { %v609_v55 = vadd.f32 %v562_v0, %v183_v13  ;;  %v210_v3 = vpop.f32.mrf.mxu0  ;;  %v3073_v47 = vmul.f32 -1.442695, %v608_v62  ;;  %v256_v62 = vadd.f32 %v3933_v48, %v3937_v51 }
 0x107   :  { %v564_v29 = vpop.f32.mrf.mxu1  ;;  %4378 = vst [vmem:[#allocation29_spill] sm:$0xff] %v4013_v1  ;;  %v4016_v9 = vadd.f32 %v210_v3, %v3970_v50 }
 0x108   :  { %v3074_v63 = vmul.f32 -1.442695, %v609_v55  ;;  %v212_v42 = vpop.f32.mrf.mxu0 }
 0x109   :  { %v565_v57 = vpop.f32.mrf.mxu1  ;;  %4379 = vst [vmem:[#allocation30_spill] sm:$0xff] %v4016_v9  ;;  %v4019_v45 = vadd.f32 %v212_v42, %v3975_v59 }
 0x10a   :  { %v214_v29 = vpop.f32.mrf.mxu0  ;;  %3508 = vpow2.f32 %v3074_v63  ;;  %v254_v57 = vadd.f32 %v3931_v46, %v3935_v49 }
 0x10b   :  { %4380 = vst [vmem:[#allocation31_spill] sm:$0xff] %v4019_v45  ;;  %v4022_v14 = vadd.f32 %v214_v29, %v3970_v50  ;;  %3510 = vpow2.f32 %v3073_v47 }
 0x10d   :  { %4381 = vst [vmem:[#allocation32_spill] sm:$0xff] %v4022_v14 }
 0x117   :  { %v3509_v2 = vpop.eup %3508 }
 0x118   :  { %v3511_v53 = vpop.eup %3510  ;;  %v621_v43 = vadd.f32 1.0, %v3509_v2 }
 0x119   :  { %v615_v13 = vadd.f32 1.0, %v3511_v53 }
 0x11a   :  { %3512 = vrcp.f32 %v621_v43 }
 0x11b   :  { %3514 = vrcp.f32 %v615_v13 }
 0x123   :  { %v601_v0 = vpop.f32.mrf.mxu1 }
 0x124   :  { %v610_v42 = vadd.f32 %v601_v0, %v254_v57 }
 0x125   :  { %v603_v55 = vpop.f32.mrf.mxu1 }
 0x126   :  { %3516 = vtanh.f32 %v610_v42  ;;  %v611_v3 = vadd.f32 %v603_v55, %v256_v62 }
 0x127   :  { %v605_v29 = vpop.f32.mrf.mxu1  ;;  %v3513_v14 = vpop.eup %3512 }
 0x128   :  { %v3075_v63 = vmul.f32 -1.442695, %v611_v3  ;;  %v3515_v2 = vpop.eup %3514  ;;  %v631_v45 = vmul.f32 0.0, %v3513_v14 }
 0x129   :  { %v606_v47 = vpop.f32.mrf.mxu1 }
 0x12a   :  { %3518 = vpow2.f32 %v3075_v63 }
 0x133   :  { %v3517_v53 = vpop.eup %3516 }
 0x134   :  { %v632_v9 = vmul.f32 %v3517_v53, %v3515_v2 }
 0x136   :  { %v4028_v46 = vadd.f32 %v632_v9, %v631_v45  ;;  %v4382_v45 = vmov 0  }
 0x137   :  { %v3519_v49 = vpop.eup %3518 }
 0x138   :  { %v628_v1 = vadd.f32 1.0, %v3519_v49  ;;  %3520 = vtanh.f32 %v4028_v46 }
 0x13a   :  { %3522 = vrcp.f32 %v628_v1 }
 0x145   :  { %v3521_v48 = vpop.eup %3520 }
 0x147   :  { %v3523_v51 = vpop.eup %3522 }
 0x148   :  { %v635_v43 = vmul.f32 %v3523_v51, %v3521_v48 }
 0x14a   :  { %v636_v13 = vpack.c.bf16 %v635_v43, %v635_v43 }
 0x14c   :  { %637 = vst [vmem:[#allocation4] sm:$0xf] %v636_v13  ;;  %870 = vmatmul.mubr.bf16.vlgmr.msra.gmra.mxu0 %v636_v13  ;;  %911 = vmatmul.mubr.bf16.vlgmr.msra.gmra.mxu1 %v636_v13 }
 0x14d   :  { %1150 = vmatpush1.bf16.msra.mxu0 %v3765_v4  ;;  %1191 = vmatpush1.bf16.msra.mxu1 %v3847_v26 }
 0x14e   :  { %1151 = vmatprep.subr.bf16.mxu0 %v3769_v6  ;;  %1192 = vmatprep.subr.bf16.mxu1 %v3850_v27 }
 0x14f   :  { %1181 = vmatprep.mubr.bf16.mxu0 %v4382_v45  ;;  %1222 = vmatprep.mubr.bf16.mxu1 %v4382_v45 }
 0x151   :  { %1152 = vmatpush1.bf16.msra.mxu0 %v3774_v7  ;;  %1193 = vmatpush1.bf16.msra.mxu1 %v3856_v28 }
 0x152   :  { %1153 = vmatprep.subr.bf16.mxu0 %v3778_v8  ;;  %1194 = vmatprep.subr.bf16.mxu1 %v3859_v30 }
 0x155   :  { %1154 = vmatpush1.bf16.msra.mxu0 %v3784_v10  ;;  %1195 = vmatpush1.bf16.msra.mxu1 %v3866_v31 }
 0x156   :  { %1155 = vmatprep.subr.bf16.mxu0 %v3787_v11  ;;  %1196 = vmatprep.subr.bf16.mxu1 %v3869_v32 }
 0x159   :  { %1156 = vmatpush1.bf16.msra.mxu0 %v3790_v12  ;;  %1197 = vmatpush1.bf16.msra.mxu1 %v3879_v33 }
 0x15a   :  { %1157 = vmatprep.subr.bf16.mxu0 %v3801_v15  ;;  %1198 = vmatprep.subr.bf16.mxu1 %v3883_v34 }
 0x15d   :  { %1158 = vmatpush1.bf16.msra.mxu0 %v3807_v17  ;;  %1199 = vmatpush1.bf16.msra.mxu1 %v3887_v35 }
 0x15e   :  { %1159 = vmatprep.subr.bf16.mxu0 %v3811_v18  ;;  %1200 = vmatprep.subr.bf16.mxu1 %v3891_v36  ;;  %v4065_v18 = vpop.f32.mrf.mxu0 }
 0x161   :  { %1160 = vmatpush1.bf16.msra.mxu0 %v3817_v19  ;;  %1201 = vmatpush1.bf16.msra.mxu1 %v3894_v37  ;;  %v185_v19 = vadd.f32 %v3963_v16, %v3970_v50 }
 0x162   :  { %1161 = vmatprep.subr.bf16.mxu0 %v3821_v20  ;;  %1202 = vmatprep.subr.bf16.mxu1 %v3897_v38 }
 0x165   :  { %1162 = vmatpush1.bf16.msra.mxu0 %v3830_v22  ;;  %1203 = vmatpush1.bf16.msra.mxu1 %v3900_v39 }
 0x166   :  { %1163 = vmatprep.subr.bf16.mxu0 %v3834_v23  ;;  %1204 = vmatprep.subr.bf16.mxu1 %v3903_v40  ;;  %v187_v23 = vadd.f32 %v3968_v44, %v3975_v59 }
 0x169   :  { %1164 = vmatpush1.bf16.msra.mxu0 %v3836_v24  ;;  %1205 = vmatpush1.bf16.msra.mxu1 %v3906_v41 }
 0x16a   :  { %1461 = vmatprep.subr.bf16.mxu0 %v3767_v5  ;;  %1502 = vmatprep.subr.bf16.mxu1 %v3840_v25 }
 0x20c   :  { %v871_v20 = vpop.f32.mrf.mxu0  ;;  %v912_v22 = vpop.f32.mrf.mxu1 }
 0x20d   :  { %v919_v9 = vadd.f32 %v871_v20, %v185_v19  ;;  %v921_v16 = vadd.f32 %v912_v22, %v3940_v52 }
 0x20e   :  { %v873_v1 = vpop.f32.mrf.mxu0  ;;  %v914_v14 = vpop.f32.mrf.mxu1 }
 0x20f   :  { %v3108_v24 = vmul.f32 -1.442695, %v919_v9  ;;  %v920_v57 = vadd.f32 %v873_v1, %v187_v23  ;;  %v922_v55 = vadd.f32 %v914_v14, %v3943_v54 }
 0x210   :  { %v875_v0 = vpop.f32.mrf.mxu0  ;;  %v916_v62 = vpop.f32.mrf.mxu1 }
 0x211   :  { %3524 = vpow2.f32 %v3108_v24  ;;  %v3109_v5 = vmul.f32 -1.442695, %v920_v57  ;;  %v3110_v50 = vmul.f32 -1.442695, %v922_v55  ;;  %v4131_v62 = vld [vmem:[#allocation6 + $0xe4] ss:$16 sps:$4 sm:$0xff]  }
 0x212   :  { %v876_v25 = vpop.f32.mrf.mxu0  ;;  %v917_v42 = vpop.f32.mrf.mxu1  ;;  %v4143_v55 = vld [vmem:[#allocation6 + $0xc4] ss:$16 sps:$4 sm:$0xff]  }
 0x213   :  { %3526 = vpow2.f32 %v3109_v5  ;;  %v4133_v5 = vld [vmem:[#allocation6 + $0xec] ss:$16 sps:$4 sm:$0xff]   ;;  %v4135_v25 = vld [vmem:[#allocation6 + $0xe0] ss:$16 sps:$4 sm:$0xff]   ;;  %v4137_v42 = vld [vmem:[#allocation6 + $0xe8] ss:$16 sps:$4 sm:$0xff]  }
 0x214   :  { %3528 = vtanh.f32 %v921_v16  ;;  %v4145_v16 = vld [vmem:[#allocation6 + $0xcc] ss:$16 sps:$4 sm:$0xff]  }
 0x215   :  { %3530 = vpow2.f32 %v3110_v50  ;;  %v4147_v50 = vld [vmem:[#allocation6 + $0xc0] ss:$16 sps:$4 sm:$0xff]  }
 0x21e   :  { %v3525_v3 = vpop.eup %3524 }
 0x21f   :  { %v926_v29 = vadd.f32 1.0, %v3525_v3  ;;  %v4149_v3 = vld [vmem:[#allocation6 + $0xc8] ss:$16 sps:$4 sm:$0xff]  }
 0x220   :  { %v3527_v44 = vpop.eup %3526 }
 0x221   :  { %3532 = vrcp.f32 %v926_v29  ;;  %v932_v63 = vadd.f32 1.0, %v3527_v44  ;;  %v3529_v47 = vpop.eup %3528  ;;  %v4155_v29 = vld [vmem:[#allocation6 + $0xa4] ss:$16 sps:$4 sm:$0xff]   ;;  %v4157_v44 = vld [vmem:[#allocation6 + $0xac] ss:$16 sps:$4 sm:$0xff]  }
 0x222   :  { %v3531_v2 = vpop.eup %3530 }
 0x223   :  { %3534 = vrcp.f32 %v932_v63  ;;  %v939_v51 = vadd.f32 1.0, %v3531_v2  ;;  %v4159_v63 = vld [vmem:[#allocation6 + $0xa0] ss:$16 sps:$4 sm:$0xff]   ;;  %v4167_v2 = vld [vmem:[#allocation6 + $0x84] ss:$16 sps:$4 sm:$0xff]  }
 0x225   :  { %3536 = vrcp.f32 %v939_v51  ;;  %v4177_v51 = vld [vmem:[#allocation6 + $0x64] ss:$16 sps:$4 sm:$0xff]  }
 0x22e   :  { %v3533_v53 = vpop.eup %3532 }
 0x22f   :  { %v943_v49 = vmul.f32 %v3533_v53, %v3529_v47  ;;  %v4161_v47 = vld [vmem:[#allocation6 + $0xa8] ss:$16 sps:$4 sm:$0xff]   ;;  %v4169_v53 = vld [vmem:[#allocation6 + $0x8c] ss:$16 sps:$4 sm:$0xff]  }
 0x230   :  { %v3535_v48 = vpop.eup %3534 }
 0x231   :  { %v942_v43 = vmul.f32 %v3535_v48, %v4028_v46  ;;  %v4173_v48 = vld [vmem:[#allocation6 + $0x88] ss:$16 sps:$4 sm:$0xff]  }
 0x232   :  { %v3537_v52 = vpop.eup %3536 }
 0x233   :  { %v4074_v54 = vadd.f32 %v943_v49, %v942_v43  ;;  %v4171_v49 = vld [vmem:[#allocation6 + $0x80] ss:$16 sps:$4 sm:$0xff]   ;;  %v4179_v43 = vld [vmem:[#allocation6 + $0x6c] ss:$16 sps:$4 sm:$0xff]  }
 0x235   :  { %3538 = vtanh.f32 %v4074_v54 }
 0x242   :  { %v3539_v13 = vpop.eup %3538 }
 0x243   :  { %v946_v19 = vmul.f32 %v3539_v13, %v3537_v52  ;;  %v4185_v52 = vld [vmem:[#allocation6 + $0x68] ss:$16 sps:$4 sm:$0xff]   ;;  %v4189_v13 = vld [vmem:[#allocation6 + $0x4c] ss:$16 sps:$4 sm:$0xff]  }
 0x245   :  { %v947_v20 = vpack.c.bf16 %v946_v19, %v946_v19  ;;  %v4193_v19 = vld [vmem:[#allocation6 + $0x48] ss:$16 sps:$4 sm:$0xff]  }
 0x247   :  { %949 = vst [vmem:[#allocation4 + $0x4] sm:$0xf] %v947_v20  ;;  %1182 = vmatmul.mubr.bf16.vlgmr.msra.gmra.mxu0 %v947_v20  ;;  %1223 = vmatmul.mubr.bf16.vlgmr.msra.gmra.mxu1 %v947_v20  ;;  %v4197_v20 = vld [vmem:[#allocation6 + $0x2c] ss:$16 sps:$4 sm:$0xff]  }
 0x248   :  { %1462 = vmatpush1.bf16.msra.mxu0 %v3765_v4  ;;  %1503 = vmatpush1.bf16.msra.mxu1 %v3847_v26  ;;  %v4103_v4 = vld [vmem:[#allocation6 + $0x40] ss:$16 sps:$4 sm:$0xff]  }
 0x249   :  { %1463 = vmatprep.subr.bf16.mxu0 %v3769_v6  ;;  %1504 = vmatprep.subr.bf16.mxu1 %v3850_v27  ;;  %v4105_v6 = vld [vmem:[#allocation6 + $0x44] ss:$16 sps:$4 sm:$0xff]  }
 0x24a   :  { %1493 = vmatprep.mubr.bf16.mxu0 %v4382_v45  ;;  %1534 = vmatprep.mubr.bf16.mxu1 %v4382_v45 }
 0x24c   :  { %1464 = vmatpush1.bf16.msra.mxu0 %v3774_v7  ;;  %1505 = vmatpush1.bf16.msra.mxu1 %v3856_v28  ;;  %v4107_v7 = vld [vmem:[#allocation6 + $0x24] ss:$16 sps:$4 sm:$0xff]  }
 0x24d   :  { %1465 = vmatprep.subr.bf16.mxu0 %v3778_v8  ;;  %1506 = vmatprep.subr.bf16.mxu1 %v3859_v30  ;;  %v4111_v8 = vld [vmem:[#allocation6 + $0x20] ss:$16 sps:$4 sm:$0xff]  }
 0x250   :  { %1466 = vmatpush1.bf16.msra.mxu0 %v3784_v10  ;;  %1507 = vmatpush1.bf16.msra.mxu1 %v3866_v31  ;;  %v4114_v10 = vld [vmem:[#allocation6 + $0x4] ss:$16 sps:$4 sm:$0xff]  }
 0x251   :  { %1467 = vmatprep.subr.bf16.mxu0 %v3787_v11  ;;  %1508 = vmatprep.subr.bf16.mxu1 %v3869_v32  ;;  %v4117_v11 = vld [vmem:[#allocation6] ss:$16 sps:$4 sm:$0xff]  }
 0x254   :  { %1468 = vmatpush1.bf16.msra.mxu0 %v3790_v12  ;;  %1509 = vmatpush1.bf16.msra.mxu1 %v3879_v33 }
 0x255   :  { %1469 = vmatprep.subr.bf16.mxu0 %v3801_v15  ;;  %1510 = vmatprep.subr.bf16.mxu1 %v3883_v34 }
 0x258   :  { %1470 = vmatpush1.bf16.msra.mxu0 %v3807_v17  ;;  %1511 = vmatpush1.bf16.msra.mxu1 %v3887_v35 }
 0x259   :  { %1512 = vmatprep.subr.bf16.mxu1 %v3891_v36  ;;  %1471 = vmatprep.subr.bf16.mxu0 %v4105_v6 }
 0x25c   :  { %1513 = vmatpush1.bf16.msra.mxu1 %v3894_v37  ;;  %1472 = vmatpush1.bf16.msra.mxu0 %v4103_v4 }
 0x25d   :  { %1514 = vmatprep.subr.bf16.mxu1 %v3897_v38  ;;  %1473 = vmatprep.subr.bf16.mxu0 %v4107_v7 }
 0x260   :  { %1515 = vmatpush1.bf16.msra.mxu1 %v3900_v39  ;;  %1474 = vmatpush1.bf16.msra.mxu0 %v4111_v8 }
 0x261   :  { %1516 = vmatprep.subr.bf16.mxu1 %v3903_v40  ;;  %1475 = vmatprep.subr.bf16.mxu0 %v4114_v10 }
 0x264   :  { %1517 = vmatpush1.bf16.msra.mxu1 %v3906_v41  ;;  %1476 = vmatpush1.bf16.msra.mxu0 %v4117_v11 }
 0x265   :  { %1773 = vmatprep.subr.bf16.mxu0 %v4131_v62  ;;  %1814 = vmatprep.subr.bf16.mxu1 %v4133_v5 }
 0x307   :  { %v1183_v12 = vpop.f32.mrf.mxu0  ;;  %v1224_v15 = vpop.f32.mrf.mxu1 }
 0x308   :  { %v1231_v17 = vadd.f32 %v1183_v12, %v3978_v61  ;;  %v1233_v37 = vadd.f32 %v1224_v15, %v3946_v56  ;;  %v4201_v12 = vld [vmem:[#allocation6 + $0x28] ss:$16 sps:$4 sm:$0xff]   ;;  %v4205_v15 = vld [vmem:[#allocation6 + $0xc] ss:$16 sps:$4 sm:$0xff]  }
 0x309   :  { %v1185_v26 = vpop.f32.mrf.mxu0  ;;  %v1226_v27 = vpop.f32.mrf.mxu1 }
 0x30a   :  { %v3143_v28 = vmul.f32 -1.442695, %v1231_v17  ;;  %v1232_v30 = vadd.f32 %v1185_v26, %v3984_v21  ;;  %v1234_v36 = vadd.f32 %v1226_v27, %v3949_v58  ;;  %v4209_v17 = vld [vmem:[#allocation6 + $0x8] ss:$16 sps:$4 sm:$0xff]  }
 0x30b   :  { %v1187_v31 = vpop.f32.mrf.mxu0  ;;  %v1228_v32 = vpop.f32.mrf.mxu1 }
 0x30c   :  { %3540 = vpow2.f32 %v3143_v28  ;;  %v3144_v33 = vmul.f32 -1.442695, %v1232_v30  ;;  %v3145_v38 = vmul.f32 -1.442695, %v1234_v36  ;;  %v4383_v28 = vld [vmem:[#allocation23_spill] sm:$0xff] }
 0x30d   :  { %v1188_v34 = vpop.f32.mrf.mxu0  ;;  %v1229_v35 = vpop.f32.mrf.mxu1 }
 0x30e   :  { %3542 = vpow2.f32 %v3144_v33  ;;  %v4384_v34 = vld [vmem:[#allocation25_spill] sm:$0xff] }
 0x30f   :  { %3544 = vtanh.f32 %v1233_v37 }
 0x310   :  { %3546 = vpow2.f32 %v3145_v38 }
 0x319   :  { %v3541_v39 = vpop.eup %3540 }
 0x31a   :  { %v1238_v40 = vadd.f32 1.0, %v3541_v39 }
 0x31b   :  { %v3543_v41 = vpop.eup %3542 }
 0x31c   :  { %3548 = vrcp.f32 %v1238_v40  ;;  %v1244_v61 = vadd.f32 1.0, %v3543_v41  ;;  %v3545_v21 = vpop.eup %3544  ;;  %v4385_v41 = vld [vmem:[#allocation16_spill] sm:$0xff] }
 0x31d   :  { %v3547_v46 = vpop.eup %3546 }
 0x31e   :  { %3550 = vrcp.f32 %v1244_v61  ;;  %v1251_v1 = vadd.f32 1.0, %v3547_v46 }
 0x320   :  { %3552 = vrcp.f32 %v1251_v1 }
 0x329   :  { %v3549_v22 = vpop.eup %3548 }
 0x32a   :  { %v1255_v23 = vmul.f32 %v3549_v22, %v3545_v21  ;;  %v4386_v21 = vld [vmem:[#allocation15_spill] sm:$0xff] }
 0x32b   :  { %v3551_v9 = vpop.eup %3550 }
 0x32c   :  { %v1254_v14 = vmul.f32 %v3551_v9, %v4074_v54  ;;  %v4183_v54 = vld [vmem:[#allocation6 + $0x60] ss:$16 sps:$4 sm:$0xff]  }
 0x32d   :  { %v3553_v56 = vpop.eup %3552 }
 0x32e   :  { %v4126_v58 = vadd.f32 %v1255_v23, %v1254_v14 }
 0x330   :  { %3554 = vtanh.f32 %v4126_v58 }
 0x33d   :  { %v3555_v24 = vpop.eup %3554 }
 0x33e   :  { %v1258_v57 = vmul.f32 %v3555_v24, %v3553_v56 }
 0x340   :  { %v1259_v0 = vpack.c.bf16 %v1258_v57, %v1258_v57 }
 0x342   :  { %1261 = vst [vmem:[#allocation4 + $0x8] sm:$0xf] %v1259_v0  ;;  %1494 = vmatmul.mubr.bf16.vlgmr.msra.gmra.mxu0 %v1259_v0  ;;  %1535 = vmatmul.mubr.bf16.vlgmr.msra.gmra.mxu1 %v1259_v0 }
 0x343   :  { %1805 = vmatprep.mubr.bf16.mxu0 %v4382_v45  ;;  %1846 = vmatprep.mubr.bf16.mxu1 %v4382_v45 }
 0x344   :  { %1774 = vmatpush1.bf16.msra.mxu0 %v4135_v25  ;;  %1815 = vmatpush1.bf16.msra.mxu1 %v4137_v42 }
 0x345   :  { %1775 = vmatprep.subr.bf16.mxu0 %v4143_v55  ;;  %1816 = vmatprep.subr.bf16.mxu1 %v4145_v16 }
 0x348   :  { %1776 = vmatpush1.bf16.msra.mxu0 %v4147_v50  ;;  %1817 = vmatpush1.bf16.msra.mxu1 %v4149_v3 }
 0x349   :  { %1777 = vmatprep.subr.bf16.mxu0 %v4155_v29  ;;  %1818 = vmatprep.subr.bf16.mxu1 %v4157_v44 }
 0x34c   :  { %1778 = vmatpush1.bf16.msra.mxu0 %v4159_v63  ;;  %1819 = vmatpush1.bf16.msra.mxu1 %v4161_v47 }
 0x34d   :  { %1779 = vmatprep.subr.bf16.mxu0 %v4167_v2  ;;  %1820 = vmatprep.subr.bf16.mxu1 %v4169_v53 }
 0x350   :  { %1780 = vmatpush1.bf16.msra.mxu0 %v4171_v49  ;;  %1821 = vmatpush1.bf16.msra.mxu1 %v4173_v48 }
 0x351   :  { %1781 = vmatprep.subr.bf16.mxu0 %v4177_v51  ;;  %1822 = vmatprep.subr.bf16.mxu1 %v4179_v43 }
 0x354   :  { %1782 = vmatpush1.bf16.msra.mxu0 %v4183_v54  ;;  %1823 = vmatpush1.bf16.msra.mxu1 %v4185_v52 }
 0x355   :  { %1783 = vmatprep.subr.bf16.mxu0 %v4105_v6  ;;  %1824 = vmatprep.subr.bf16.mxu1 %v4189_v13 }
 0x358   :  { %1784 = vmatpush1.bf16.msra.mxu0 %v4103_v4  ;;  %1825 = vmatpush1.bf16.msra.mxu1 %v4193_v19 }
 0x359   :  { %1785 = vmatprep.subr.bf16.mxu0 %v4107_v7  ;;  %1826 = vmatprep.subr.bf16.mxu1 %v4197_v20 }
 0x35c   :  { %1786 = vmatpush1.bf16.msra.mxu0 %v4111_v8  ;;  %1827 = vmatpush1.bf16.msra.mxu1 %v4201_v12 }
 0x35d   :  { %1787 = vmatprep.subr.bf16.mxu0 %v4114_v10  ;;  %1828 = vmatprep.subr.bf16.mxu1 %v4205_v15 }
 0x360   :  { %1788 = vmatpush1.bf16.msra.mxu0 %v4117_v11  ;;  %1829 = vmatpush1.bf16.msra.mxu1 %v4209_v17 }
 0x361   :  { %2085 = vmatprep.subr.bf16.mxu0 %v4131_v62  ;;  %2126 = vmatprep.subr.bf16.mxu1 %v4133_v5 }
 0x402   :  { %v1495_v26 = vpop.f32.mrf.mxu0  ;;  %v1536_v27 = vpop.f32.mrf.mxu1 }
 0x403   :  { %v1543_v30 = vadd.f32 %v1495_v26, %v4383_v28  ;;  %v1545_v46 = vadd.f32 %v1536_v27, %v4386_v21 }
 0x404   :  { %v1497_v31 = vpop.f32.mrf.mxu0  ;;  %v1538_v32 = vpop.f32.mrf.mxu1 }
 0x405   :  { %v3178_v33 = vmul.f32 -1.442695, %v1543_v30  ;;  %v1544_v35 = vadd.f32 %v1497_v31, %v4384_v34  ;;  %v1546_v61 = vadd.f32 %v1538_v32, %v4385_v41  ;;  %v4388_v41 = vld [vmem:[#allocation28_spill] sm:$0xff] }
 0x406   :  { %v1499_v36 = vpop.f32.mrf.mxu0  ;;  %v1540_v37 = vpop.f32.mrf.mxu1 }
 0x407   :  { %3556 = vpow2.f32 %v3178_v33  ;;  %v3179_v38 = vmul.f32 -1.442695, %v1544_v35  ;;  %v3180_v22 = vmul.f32 -1.442695, %v1546_v61  ;;  %v4387_v36 = vld [vmem:[#allocation27_spill] sm:$0xff] }
 0x408   :  { %v1500_v39 = vpop.f32.mrf.mxu0  ;;  %v1541_v40 = vpop.f32.mrf.mxu1 }
 0x409   :  { %3558 = vpow2.f32 %v3179_v38 }
 0x40a   :  { %3560 = vtanh.f32 %v1545_v46 }
 0x40b   :  { %3562 = vpow2.f32 %v3180_v22 }
 0x414   :  { %v3557_v23 = vpop.eup %3556 }
 0x415   :  { %v1550_v9 = vadd.f32 1.0, %v3557_v23 }
 0x416   :  { %v3559_v1 = vpop.eup %3558 }
 0x417   :  { %3564 = vrcp.f32 %v1550_v9  ;;  %v1556_v14 = vadd.f32 1.0, %v3559_v1  ;;  %v3561_v56 = vpop.eup %3560  ;;  %v4389_v1 = vld [vmem:[#allocation18_spill] sm:$0xff] }
 0x418   :  { %v3563_v24 = vpop.eup %3562 }
 0x419   :  { %3566 = vrcp.f32 %v1556_v14  ;;  %v1563_v28 = vadd.f32 1.0, %v3563_v24 }
 0x41b   :  { %3568 = vrcp.f32 %v1563_v28 }
 0x424   :  { %v3565_v57 = vpop.eup %3564 }
 0x425   :  { %v1567_v0 = vmul.f32 %v3565_v57, %v3561_v56  ;;  %v4390_v56 = vld [vmem:[#allocation17_spill] sm:$0xff] }
 0x426   :  { %v3567_v26 = vpop.eup %3566 }
 0x427   :  { %v1566_v30 = vmul.f32 %v3567_v26, %v4126_v58 }
 0x428   :  { %v3569_v27 = vpop.eup %3568 }
 0x429   :  { %v4222_v31 = vadd.f32 %v1567_v0, %v1566_v30 }
 0x42b   :  { %3570 = vtanh.f32 %v4222_v31 }
 0x438   :  { %v3571_v32 = vpop.eup %3570 }
 0x439   :  { %v1570_v33 = vmul.f32 %v3571_v32, %v3569_v27 }
 0x43b   :  { %v1571_v34 = vpack.c.bf16 %v1570_v33, %v1570_v33 }
 0x43d   :  { %1573 = vst [vmem:[#allocation4 + $0xc] sm:$0xf] %v1571_v34  ;;  %1806 = vmatmul.mubr.bf16.vlgmr.msra.gmra.mxu0 %v1571_v34  ;;  %1847 = vmatmul.mubr.bf16.vlgmr.msra.gmra.mxu1 %v1571_v34 }
 0x43e   :  { %2086 = vmatpush1.bf16.msra.mxu0 %v4135_v25  ;;  %2127 = vmatpush1.bf16.msra.mxu1 %v4137_v42 }
 0x43f   :  { %2087 = vmatprep.subr.bf16.mxu0 %v4143_v55  ;;  %2128 = vmatprep.subr.bf16.mxu1 %v4145_v16 }
 0x440   :  { %2117 = vmatprep.mubr.bf16.mxu0 %v4382_v45  ;;  %2158 = vmatprep.mubr.bf16.mxu1 %v4382_v45 }
 0x442   :  { %2088 = vmatpush1.bf16.msra.mxu0 %v4147_v50  ;;  %2129 = vmatpush1.bf16.msra.mxu1 %v4149_v3 }
 0x443   :  { %2089 = vmatprep.subr.bf16.mxu0 %v4155_v29  ;;  %2130 = vmatprep.subr.bf16.mxu1 %v4157_v44 }
 0x446   :  { %2090 = vmatpush1.bf16.msra.mxu0 %v4159_v63  ;;  %2131 = vmatpush1.bf16.msra.mxu1 %v4161_v47 }
 0x447   :  { %2091 = vmatprep.subr.bf16.mxu0 %v4167_v2  ;;  %2132 = vmatprep.subr.bf16.mxu1 %v4169_v53 }
 0x44a   :  { %2092 = vmatpush1.bf16.msra.mxu0 %v4171_v49  ;;  %2133 = vmatpush1.bf16.msra.mxu1 %v4173_v48 }
 0x44b   :  { %2093 = vmatprep.subr.bf16.mxu0 %v4177_v51  ;;  %2134 = vmatprep.subr.bf16.mxu1 %v4179_v43 }
 0x44e   :  { %2094 = vmatpush1.bf16.msra.mxu0 %v4183_v54  ;;  %2135 = vmatpush1.bf16.msra.mxu1 %v4185_v52 }
 0x44f   :  { %2095 = vmatprep.subr.bf16.mxu0 %v4105_v6  ;;  %2136 = vmatprep.subr.bf16.mxu1 %v4189_v13 }
 0x452   :  { %2096 = vmatpush1.bf16.msra.mxu0 %v4103_v4  ;;  %2137 = vmatpush1.bf16.msra.mxu1 %v4193_v19 }
 0x453   :  { %2097 = vmatprep.subr.bf16.mxu0 %v4107_v7  ;;  %2138 = vmatprep.subr.bf16.mxu1 %v4197_v20 }
 0x456   :  { %2098 = vmatpush1.bf16.msra.mxu0 %v4111_v8  ;;  %2139 = vmatpush1.bf16.msra.mxu1 %v4201_v12 }
 0x457   :  { %2099 = vmatprep.subr.bf16.mxu0 %v4114_v10  ;;  %2140 = vmatprep.subr.bf16.mxu1 %v4205_v15 }
 0x45a   :  { %2100 = vmatpush1.bf16.msra.mxu0 %v4117_v11  ;;  %2141 = vmatpush1.bf16.msra.mxu1 %v4209_v17 }
 0x45b   :  { %2397 = vmatprep.subr.bf16.mxu0 %v4131_v62  ;;  %2438 = vmatprep.subr.bf16.mxu1 %v4133_v5 }
 0x4fd   :  { %v1807_v58 = vpop.f32.mrf.mxu0  ;;  %v1848_v35 = vpop.f32.mrf.mxu1 }
 0x4fe   :  { %v1855_v37 = vadd.f32 %v1807_v58, %v4387_v36  ;;  %v1857_v24 = vadd.f32 %v1848_v35, %v4390_v56 }
 0x4ff   :  { %v1809_v38 = vpop.f32.mrf.mxu0  ;;  %v1850_v39 = vpop.f32.mrf.mxu1 }
 0x500   :  { %v3213_v40 = vmul.f32 -1.442695, %v1855_v37  ;;  %v1856_v61 = vadd.f32 %v1809_v38, %v4388_v41  ;;  %v1858_v14 = vadd.f32 %v1850_v39, %v4389_v1  ;;  %v4392_v1 = vld [vmem:[#allocation20_spill] sm:$0xff] }
 0x501   :  { %v1811_v21 = vpop.f32.mrf.mxu0  ;;  %v1852_v46 = vpop.f32.mrf.mxu1 }
 0x502   :  { %3572 = vpow2.f32 %v3213_v40  ;;  %v3214_v22 = vmul.f32 -1.442695, %v1856_v61  ;;  %v3215_v57 = vmul.f32 -1.442695, %v1858_v14  ;;  %v4391_v21 = vld [vmem:[#allocation29_spill] sm:$0xff]  ;;  %v4393_v14 = vld [vmem:[#allocation19_spill] sm:$0xff] }
 0x503   :  { %v1812_v23 = vpop.f32.mrf.mxu0  ;;  %v1853_v9 = vpop.f32.mrf.mxu1 }
 0x504   :  { %3574 = vpow2.f32 %v3214_v22 }
 0x505   :  { %3576 = vtanh.f32 %v1857_v24 }
 0x506   :  { %3578 = vpow2.f32 %v3215_v57 }
 0x50f   :  { %v3573_v0 = vpop.eup %3572 }
 0x510   :  { %v1862_v26 = vadd.f32 1.0, %v3573_v0 }
 0x511   :  { %v3575_v28 = vpop.eup %3574 }
 0x512   :  { %3580 = vrcp.f32 %v1862_v26  ;;  %v1868_v30 = vadd.f32 1.0, %v3575_v28  ;;  %v3577_v27 = vpop.eup %3576 }
 0x513   :  { %v3579_v32 = vpop.eup %3578 }
 0x514   :  { %3582 = vrcp.f32 %v1868_v30  ;;  %v1875_v36 = vadd.f32 1.0, %v3579_v32 }
 0x516   :  { %3584 = vrcp.f32 %v1875_v36 }
 0x51f   :  { %v3581_v33 = vpop.eup %3580 }
 0x520   :  { %v1879_v34 = vmul.f32 %v3581_v33, %v3577_v27 }
 0x521   :  { %v3583_v58 = vpop.eup %3582 }
 0x522   :  { %v1878_v37 = vmul.f32 %v3583_v58, %v4222_v31 }
 0x523   :  { %v3585_v35 = vpop.eup %3584 }
 0x524   :  { %v4264_v38 = vadd.f32 %v1879_v34, %v1878_v37 }
 0x526   :  { %3586 = vtanh.f32 %v4264_v38 }
 0x533   :  { %v3587_v39 = vpop.eup %3586 }
 0x534   :  { %v1882_v40 = vmul.f32 %v3587_v39, %v3585_v35 }
 0x536   :  { %v1883_v41 = vpack.c.bf16 %v1882_v40, %v1882_v40 }
 0x538   :  { %1885 = vst [vmem:[#allocation4 + $0x10] sm:$0xf] %v1883_v41  ;;  %2118 = vmatmul.mubr.bf16.vlgmr.msra.gmra.mxu0 %v1883_v41  ;;  %2159 = vmatmul.mubr.bf16.vlgmr.msra.gmra.mxu1 %v1883_v41 }
 0x539   :  { %2398 = vmatpush1.bf16.msra.mxu0 %v4135_v25  ;;  %2439 = vmatpush1.bf16.msra.mxu1 %v4137_v42 }
 0x53a   :  { %2399 = vmatprep.subr.bf16.mxu0 %v4143_v55  ;;  %2440 = vmatprep.subr.bf16.mxu1 %v4145_v16 }
 0x53b   :  { %2429 = vmatprep.mubr.bf16.mxu0 %v4382_v45  ;;  %2470 = vmatprep.mubr.bf16.mxu1 %v4382_v45 }
 0x53d   :  { %2400 = vmatpush1.bf16.msra.mxu0 %v4147_v50  ;;  %2441 = vmatpush1.bf16.msra.mxu1 %v4149_v3 }
 0x53e   :  { %2401 = vmatprep.subr.bf16.mxu0 %v4155_v29  ;;  %2442 = vmatprep.subr.bf16.mxu1 %v4157_v44 }
 0x541   :  { %2402 = vmatpush1.bf16.msra.mxu0 %v4159_v63  ;;  %2443 = vmatpush1.bf16.msra.mxu1 %v4161_v47 }
 0x542   :  { %2403 = vmatprep.subr.bf16.mxu0 %v4167_v2  ;;  %2444 = vmatprep.subr.bf16.mxu1 %v4169_v53 }
 0x545   :  { %2404 = vmatpush1.bf16.msra.mxu0 %v4171_v49  ;;  %2445 = vmatpush1.bf16.msra.mxu1 %v4173_v48 }
 0x546   :  { %2405 = vmatprep.subr.bf16.mxu0 %v4177_v51  ;;  %2446 = vmatprep.subr.bf16.mxu1 %v4179_v43 }
 0x549   :  { %2406 = vmatpush1.bf16.msra.mxu0 %v4183_v54  ;;  %2447 = vmatpush1.bf16.msra.mxu1 %v4185_v52 }
 0x54a   :  { %2407 = vmatprep.subr.bf16.mxu0 %v4105_v6  ;;  %2448 = vmatprep.subr.bf16.mxu1 %v4189_v13 }
 0x54d   :  { %2408 = vmatpush1.bf16.msra.mxu0 %v4103_v4  ;;  %2449 = vmatpush1.bf16.msra.mxu1 %v4193_v19 }
 0x54e   :  { %2409 = vmatprep.subr.bf16.mxu0 %v4107_v7  ;;  %2450 = vmatprep.subr.bf16.mxu1 %v4197_v20 }
 0x551   :  { %2410 = vmatpush1.bf16.msra.mxu0 %v4111_v8  ;;  %2451 = vmatpush1.bf16.msra.mxu1 %v4201_v12 }
 0x552   :  { %2411 = vmatprep.subr.bf16.mxu0 %v4114_v10  ;;  %2452 = vmatprep.subr.bf16.mxu1 %v4205_v15 }
 0x555   :  { %2412 = vmatpush1.bf16.msra.mxu0 %v4117_v11  ;;  %2453 = vmatpush1.bf16.msra.mxu1 %v4209_v17 }
 0x556   :  { %2709 = vmatprep.subr.bf16.mxu0 %v4131_v62  ;;  %2750 = vmatprep.subr.bf16.mxu1 %v4133_v5 }
 0x5f8   :  { %v2119_v4 = vpop.f32.mrf.mxu0  ;;  %v2160_v6 = vpop.f32.mrf.mxu1 }
 0x5f9   :  { %v2167_v7 = vadd.f32 %v2119_v4, %v4010_v60  ;;  %v2169_v5 = vadd.f32 %v2160_v6, %v4393_v14  ;;  %v3497_v14 = vld [vmem:[#allocation4] sm:$0xff]  }
 0x5fa   :  { %v2121_v31 = vpop.f32.mrf.mxu0  ;;  %v2162_v8 = vpop.f32.mrf.mxu1 }
 0x5fb   :  { %v3248_v61 = vmul.f32 -1.442695, %v2167_v7  ;;  %v2168_v46 = vadd.f32 %v2121_v31, %v4391_v21  ;;  %v2170_v62 = vadd.f32 %v2162_v8, %v4392_v1 }
 0x5fc   :  { %v2123_v10 = vpop.f32.mrf.mxu0  ;;  %v2164_v22 = vpop.f32.mrf.mxu1 }
 0x5fd   :  { %3588 = vpow2.f32 %v3248_v61  ;;  %v3249_v23 = vmul.f32 -1.442695, %v2168_v46  ;;  %v3250_v56 = vmul.f32 -1.442695, %v2170_v62  ;;  %v3498_v62 = vld [vmem:[#allocation9 + $0x30] sm:$0xff]  }
 0x5fe   :  { %v2124_v11 = vpop.f32.mrf.mxu0  ;;  %v2165_v9 = vpop.f32.mrf.mxu1 }
 0x5ff   :  { %3590 = vpow2.f32 %v3249_v23 }
 0x600   :  { %3592 = vtanh.f32 %v2169_v5  ;;  %v3499_v5 = vld [vmem:[#allocation9 + $0x28] sm:$0xff]  }
 0x601   :  { %3594 = vpow2.f32 %v3250_v56  ;;  %v3500_v56 = vld [vmem:[#allocation9 + $0x20] sm:$0xff]  }
 0x60a   :  { %v3589_v24 = vpop.eup %3588 }
 0x60b   :  { %v2174_v57 = vadd.f32 1.0, %v3589_v24  ;;  %v3501_v24 = vld [vmem:[#allocation9 + $0x18] sm:$0xff]  }
 0x60c   :  { %v3591_v60 = vpop.eup %3590 }
 0x60d   :  { %3596 = vrcp.f32 %v2174_v57  ;;  %v2180_v0 = vadd.f32 1.0, %v3591_v60  ;;  %v3593_v26 = vpop.eup %3592  ;;  %v3502_v57 = vld [vmem:[#allocation9 + $0x10] sm:$0xff]   ;;  %v3503_v60 = vld [vmem:[#allocation9 + $0x8] sm:$0xff]  }
 0x60e   :  { %v3595_v28 = vpop.eup %3594 }
 0x60f   :  { %3598 = vrcp.f32 %v2180_v0  ;;  %v2187_v33 = vadd.f32 1.0, %v3595_v28  ;;  %v3504_v0 = vld [vmem:[#allocation9] sm:$0xff]  }
 0x611   :  { %3600 = vrcp.f32 %v2187_v33  ;;  %v4398_v33 = vld [vmem:[#allocation32_spill] sm:$0xff] }
 0x61a   :  { %v3597_v30 = vpop.eup %3596 }
 0x61b   :  { %v2191_v27 = vmul.f32 %v3597_v30, %v3593_v26  ;;  %v3505_v26 = vld [vmem:[#allocation4 + $0x8] sm:$0xff]  }
 0x61c   :  { %v3599_v32 = vpop.eup %3598 }
 0x61d   :  { %v2190_v34 = vmul.f32 %v3599_v32, %v4264_v38  ;;  %v217_v32 = vadd.f32 %v4065_v18, %v3975_v59 }
 0x61e   :  { %v3601_v36 = vpop.eup %3600 }
 0x61f   :  { %v4306_v58 = vadd.f32 %v2191_v27, %v2190_v34 }
 0x621   :  { %3602 = vtanh.f32 %v4306_v58 }
 0x62e   :  { %v3603_v37 = vpop.eup %3602 }
 0x62f   :  { %v2194_v35 = vmul.f32 %v3603_v37, %v3601_v36 }
 0x631   :  { %v2195_v39 = vpack.c.bf16 %v2194_v35, %v2194_v35 }
 0x633   :  { %2197 = vst [vmem:[#allocation4 + $0x14] sm:$0xf] %v2195_v39  ;;  %2430 = vmatmul.mubr.bf16.vlgmr.msra.gmra.mxu0 %v2195_v39  ;;  %2471 = vmatmul.mubr.bf16.vlgmr.msra.gmra.mxu1 %v2195_v39 }
 0x634   :  { %2710 = vmatpush1.bf16.msra.mxu0 %v4135_v25  ;;  %2751 = vmatpush1.bf16.msra.mxu1 %v4137_v42  ;;  %v3489_v25 = vld [vmem:[#allocation6 + $0x44] ss:$16 sps:$4 sm:$0xff]  }
 0x635   :  { %2711 = vmatprep.subr.bf16.mxu0 %v4143_v55  ;;  %2752 = vmatprep.subr.bf16.mxu1 %v4145_v16  ;;  %v3492_v42 = vld [vmem:[#allocation6 + $0x24] ss:$16 sps:$4 sm:$0xff]   ;;  %v3490_v55 = vld [vmem:[#allocation6 + $0x20] ss:$16 sps:$4 sm:$0xff]  }
 0x636   :  { %2741 = vmatprep.mubr.bf16.mxu0 %v4382_v45  ;;  %2782 = vmatprep.mubr.bf16.mxu1 %v4382_v45  ;;  %v3487_v45 = vld [vmem:[#allocation6 + $0x40] ss:$16 sps:$4 sm:$0xff]   ;;  %v3495_v16 = vld [vmem:[#allocation6 + $0x4] ss:$16 sps:$4 sm:$0xff]  }
 0x638   :  { %2712 = vmatpush1.bf16.msra.mxu0 %v4147_v50  ;;  %2753 = vmatpush1.bf16.msra.mxu1 %v4149_v3  ;;  %v3493_v50 = vld [vmem:[#allocation6] ss:$16 sps:$4 sm:$0xff]   ;;  %v3496_v3 = vld [vmem:[#allocation9 + $0x38] sm:$0xff]  }
 0x639   :  { %2713 = vmatprep.subr.bf16.mxu0 %v4155_v29  ;;  %2754 = vmatprep.subr.bf16.mxu1 %v4157_v44 }
 0x63a   :  { %v3506_v28 = vld [vmem:[#allocation4 + $0x10] sm:$0xff]  }
 0x63c   :  { %2714 = vmatpush1.bf16.msra.mxu0 %v4159_v63  ;;  %2755 = vmatpush1.bf16.msra.mxu1 %v4161_v47  ;;  %v4394_v63 = vld [vmem:[#allocation30_spill] sm:$0xff] }
 0x63d   :  { %2715 = vmatprep.subr.bf16.mxu0 %v4167_v2  ;;  %2756 = vmatprep.subr.bf16.mxu1 %v4169_v53 }
 0x640   :  { %2716 = vmatpush1.bf16.msra.mxu0 %v4171_v49  ;;  %2757 = vmatpush1.bf16.msra.mxu1 %v4173_v48  ;;  %v4395_v48 = vld [vmem:[#allocation31_spill] sm:$0xff] }
 0x641   :  { %2717 = vmatprep.subr.bf16.mxu0 %v4177_v51  ;;  %2758 = vmatprep.subr.bf16.mxu1 %v4179_v43 }
 0x644   :  { %2718 = vmatpush1.bf16.msra.mxu0 %v4183_v54  ;;  %2759 = vmatpush1.bf16.msra.mxu1 %v4185_v52 }
 0x645   :  { %2760 = vmatprep.subr.bf16.mxu1 %v4189_v13  ;;  %2719 = vmatprep.subr.bf16.mxu0 %v3489_v25 }
 0x648   :  { %2761 = vmatpush1.bf16.msra.mxu1 %v4193_v19  ;;  %2720 = vmatpush1.bf16.msra.mxu0 %v3487_v45 }
 0x649   :  { %2762 = vmatprep.subr.bf16.mxu1 %v4197_v20  ;;  %2721 = vmatprep.subr.bf16.mxu0 %v3492_v42  ;;  %v4396_v20 = vld [vmem:[#allocation22_spill] sm:$0xff] }
 0x64c   :  { %2763 = vmatpush1.bf16.msra.mxu1 %v4201_v12  ;;  %2722 = vmatpush1.bf16.msra.mxu0 %v3490_v55 }
 0x64d   :  { %2764 = vmatprep.subr.bf16.mxu1 %v4205_v15  ;;  %2723 = vmatprep.subr.bf16.mxu0 %v3495_v16  ;;  %v4397_v15 = vld [vmem:[#allocation21_spill] sm:$0xff]  ;;  %v4399_v16 = vld [vmem:[#allocation26_spill] sm:$0xff] }
 0x650   :  { %2765 = vmatpush1.bf16.msra.mxu1 %v4209_v17  ;;  %2724 = vmatpush1.bf16.msra.mxu0 %v3493_v50 }
 0x651   :  { %3346 = vmatprep.subr.bf16.mxu0 %v3496_v3 }
 0x6f3   :  { %v2431_v29 = vpop.f32.mrf.mxu0  ;;  %v2472_v44 = vpop.f32.mrf.mxu1 }
 0x6f4   :  { %v2479_v47 = vadd.f32 %v2431_v29, %v4394_v63  ;;  %v2481_v17 = vadd.f32 %v2472_v44, %v4397_v15 }
 0x6f5   :  { %v2433_v2 = vpop.f32.mrf.mxu0  ;;  %v2474_v53 = vpop.f32.mrf.mxu1 }
 0x6f6   :  { %v3283_v49 = vmul.f32 -1.442695, %v2479_v47  ;;  %v2480_v51 = vadd.f32 %v2433_v2, %v4395_v48  ;;  %v2482_v12 = vadd.f32 %v2474_v53, %v4396_v20  ;;  %v3321_v2 = vld [vmem:[%s4360_s5] ss:$0 sm:$0xff]  ;;  %s3710_s5 = smov [#allocation11]  }
 0x6f7   :  { %v2435_v43 = vpop.f32.mrf.mxu0  ;;  %v2476_v54 = vpop.f32.mrf.mxu1  ;;  %s3005_s26 = sshll.u32 %s3710_s5, 4  ;;  %s3006_s26 = int_to_ptr.vmem [resolvable:$true] %s3005_s26 }
 0x6f8   :  { %3604 = vpow2.f32 %v3283_v49  ;;  %v3284_v52 = vmul.f32 -1.442695, %v2480_v51  ;;  %v3285_v38 = vmul.f32 -1.442695, %v2482_v12  ;;  %s3676_s27 = scalar_lea.vmem %s3006_s26, 1024  ;;  %p3681_p11 = scmp.lt.s32.totalorder %s3006_s26, %s3006_s26 }
 0x6f9   :  { %v2436_v13 = vpop.f32.mrf.mxu0  ;;  %v2477_v19 = vpop.f32.mrf.mxu1  ;;  %p3677_p10 = scmp.ne.s32.totalorder %s3006_s26, %s3676_s27  ;;  %p3682_p12 = scmp.lt.s32.totalorder %s3676_s27, %s3676_s27 }
 0x6fa   :  { %3606 = vpow2.f32 %v3284_v52 }
 0x6fb   :  { %3608 = vtanh.f32 %v2481_v17  ;;  %p3683_p13 = por %p3682_p12, %p3681_p11 }
 0x6fc   :  { %3610 = vpow2.f32 %v3285_v38 }
 0x6fd   :  { %p3684_p0 = pnand %p3683_p13, %p3677_p10 }
 0x705   :  { %v3605_v40 = vpop.eup %3604 }
 0x706   :  { %v2486_v41 = vadd.f32 1.0, %v3605_v40 }
 0x707   :  { %v3607_v4 = vpop.eup %3606 }
 0x708   :  { %3612 = vrcp.f32 %v2486_v41  ;;  %v2492_v6 = vadd.f32 1.0, %v3607_v4  ;;  %v3609_v7 = vpop.eup %3608 }
 0x709   :  { %v3611_v31 = vpop.eup %3610 }
 0x70a   :  { %3614 = vrcp.f32 %v2492_v6  ;;  %v2499_v46 = vadd.f32 1.0, %v3611_v31 }
 0x70c   :  { %3616 = vrcp.f32 %v2499_v46 }
 0x715   :  { %v3613_v8 = vpop.eup %3612 }
 0x716   :  { %v2503_v61 = vmul.f32 %v3613_v8, %v3609_v7 }
 0x717   :  { %v3615_v21 = vpop.eup %3614 }
 0x718   :  { %v2502_v10 = vmul.f32 %v3615_v21, %v4306_v58 }
 0x719   :  { %v3617_v23 = vpop.eup %3616 }
 0x71a   :  { %v4340_v22 = vadd.f32 %v2503_v61, %v2502_v10 }
 0x71c   :  { %3618 = vtanh.f32 %v4340_v22 }
 0x729   :  { %v3619_v11 = vpop.eup %3618 }
 0x72a   :  { %v2506_v9 = vmul.f32 %v3619_v11, %v3617_v23 }
 0x72c   :  { %v2507_v1 = vpack.c.bf16 %v2506_v9, %v2506_v9 }
 0x72e   :  { %2509 = vst [vmem:[#allocation4 + $0x18] sm:$0xf] %v2507_v1  ;;  %2742 = vmatmul.mubr.bf16.vlgmr.msra.gmra.mxu0 %v2507_v1  ;;  %2783 = vmatmul.mubr.bf16.vlgmr.msra.gmra.mxu1 %v2507_v1 }
 0x72f   :  { %3347 = vmatpush3.bf16.msra.mxu0 %v3496_v3  ;;  %3362 = vmatprep.mubr.bf16.mxu0 %v3497_v14  ;;  %v4400_v3 = vld [vmem:[#allocation24_spill] sm:$0xff] }
 0x730   :  { %3348 = vmatprep.subr.bf16.mxu0 %v3498_v62 }
 0x733   :  { %3349 = vmatpush3.bf16.msra.mxu0 %v3498_v62 }
 0x734   :  { %3350 = vmatprep.subr.bf16.mxu0 %v3499_v5 }
 0x737   :  { %3351 = vmatpush3.bf16.msra.mxu0 %v3499_v5 }
 0x738   :  { %3352 = vmatprep.subr.bf16.mxu0 %v3500_v56 }
 0x73b   :  { %3353 = vmatpush3.bf16.msra.mxu0 %v3500_v56 }
 0x73c   :  { %3354 = vmatprep.subr.bf16.mxu0 %v3501_v24 }
 0x73f   :  { %3355 = vmatpush3.bf16.msra.mxu0 %v3501_v24 }
 0x740   :  { %3356 = vmatprep.subr.bf16.mxu0 %v3502_v57 }
 0x743   :  { %3357 = vmatpush3.bf16.msra.mxu0 %v3502_v57 }
 0x744   :  { %3358 = vmatprep.subr.bf16.mxu0 %v3503_v60 }
 0x747   :  { %3359 = vmatpush3.bf16.msra.mxu0 %v3503_v60 }
 0x748   :  { %3360 = vmatprep.subr.bf16.mxu0 %v3504_v0 }
 0x74b   :  { %3361 = vmatpush3.bf16.msra.mxu0 %v3504_v0 }
 0x74e   :  { %3363 = vmatmul.mubr.bf16.vlgmr.msra.gmra.mxu0 %v3505_v26 }
 0x74f   :  { %3366 = vmatprep.mubr.bf16.mxu0 %v3506_v28 }
 0x7ee   :  { %v2743_v30 = vpop.f32.mrf.mxu0  ;;  %v2784_v27 = vpop.f32.mrf.mxu1 }
 0x7ef   :  { %v2791_v34 = vadd.f32 %v2743_v30, %v4398_v33  ;;  %v2793_v29 = vadd.f32 %v2784_v27, %v4400_v3 }
 0x7f0   :  { %v2745_v58 = vpop.f32.mrf.mxu0  ;;  %v2786_v36 = vpop.f32.mrf.mxu1 }
 0x7f1   :  { %v3318_v37 = vmul.f32 -1.442695, %v2791_v34  ;;  %v2792_v35 = vadd.f32 %v2745_v58, %v217_v32  ;;  %v2794_v50 = vadd.f32 %v2786_v36, %v4399_v16 }
 0x7f2   :  { %v2747_v39 = vpop.f32.mrf.mxu0  ;;  %v2788_v45 = vpop.f32.mrf.mxu1 }
 0x7f3   :  { %3620 = vpow2.f32 %v3318_v37  ;;  %v3319_v25 = vmul.f32 -1.442695, %v2792_v35  ;;  %v3320_v44 = vmul.f32 -1.442695, %v2794_v50 }
 0x7f4   :  { %v2748_v42 = vpop.f32.mrf.mxu0  ;;  %v2789_v55 = vpop.f32.mrf.mxu1 }
 0x7f5   :  { %3622 = vpow2.f32 %v3319_v25 }
 0x7f6   :  { %3624 = vtanh.f32 %v2793_v29 }
 0x7f7   :  { %3626 = vpow2.f32 %v3320_v44 }
 0x800   :  { %v3621_v63 = vpop.eup %3620 }
 0x801   :  { %v2798_v59 = vadd.f32 1.0, %v3621_v63 }
 0x802   :  { %v3623_v18 = vpop.eup %3622 }
 0x803   :  { %3628 = vrcp.f32 %v2798_v59  ;;  %v2804_v47 = vadd.f32 1.0, %v3623_v18  ;;  %v3625_v53 = vpop.eup %3624 }
 0x804   :  { %v3627_v48 = vpop.eup %3626 }
 0x805   :  { %3630 = vrcp.f32 %v2804_v47  ;;  %v2811_v20 = vadd.f32 1.0, %v3627_v48 }
 0x807   :  { %3632 = vrcp.f32 %v2811_v20 }
 0x80e   :  { %v3364_v49 = vpop.f32.mrf.mxu0 }
 0x80f   :  { %v2970_v51 = vadd.f32 %v3364_v49, %v3321_v2 }
 0x810   :  { %v3629_v43 = vpop.eup %3628  ;;  %v2961_v54 = vpop.f32.mrf.mxu0 }
 0x811   :  { %v2815_v52 = vmul.f32 %v3629_v43, %v3625_v53  ;;  %2994 = vst [vmem:[#allocation11 + $0x10] sm:$0xff] %v2970_v51  ;;  %v2962_v13 = vadd.f32 %v3321_v2, %v2961_v54 }
 0x812   :  { %v3631_v19 = vpop.eup %3630  ;;  %v3365_v12 = vpop.f32.mrf.mxu0 }
 0x813   :  { %v2814_v15 = vmul.f32 %v3631_v19, %v4340_v22  ;;  %2992 = vst [vmem:[#allocation11] sm:$0xff] %v2962_v13  ;;  %v2973_v17 = vadd.f32 %v3365_v12, %v3321_v2 }
 0x814   :  { %v2964_v38 = vpop.f32.mrf.mxu0  ;;  %v3633_v4 = vpop.eup %3632 }
 0x815   :  { %v2816_v40 = vadd.f32 %v2815_v52, %v2814_v15  ;;  %2995 = vst [vmem:[#allocation11 + $0x18] sm:$0xff] %v2973_v17  ;;  %v2965_v41 = vadd.f32 %v3321_v2, %v2964_v38 }
 0x817   :  { %3634 = vtanh.f32 %v2816_v40  ;;  %2993 = vst [vmem:[#allocation11 + $0x8] sm:$0xff] %v2965_v41 }
 0x824   :  { %v3635_v6 = vpop.eup %3634 }
 0x825   :  { %v2818_v7 = vmul.f32 %v3635_v6, %v3633_v4 }
 0x827   :  { %v2819_v31 = vpack.c.bf16 %v2818_v7, %v2818_v7 }
 0x829   :  { %2821 = vst [vmem:[#allocation4 + $0x1c] sm:$0xf] %v2819_v31 }
 0x830   :  { %v3507_v8 = vld [vmem:[#allocation4 + $0x18] sm:$0xff]  }
 0x831   :  { %3367 = vmatmul.mubr.bf16.gmra.mxu0 %v3507_v8 }
 0x8f1   :  { %v3368_v61 = vpop.f32.mrf.mxu0 }
 0x8f2   :  { %v2986_v21 = vadd.f32 %v3368_v61, %v3321_v2 }
 0x8f3   :  { %v2977_v46 = vpop.f32.mrf.mxu0 }
 0x8f4   :  { %2998 = vst [vmem:[#allocation11 + $0x30] sm:$0xff] %v2986_v21  ;;  %v2978_v10 = vadd.f32 %v3321_v2, %v2977_v46 }
 0x8f5   :  { %v3369_v22 = vpop.f32.mrf.mxu0 }
 0x8f6   :  { %2996 = vst [vmem:[#allocation11 + $0x20] sm:$0xff] %v2978_v10  ;;  %v2989_v23 = vadd.f32 %v3369_v22, %v3321_v2 }
 0x8f7   :  { %v2980_v11 = vpop.f32.mrf.mxu0 }
 0x8f8   :  { %2999 = vst [vmem:[#allocation11 + $0x38] sm:$0xff] %v2989_v23  ;;  %v2981_v9 = vadd.f32 %v3321_v2, %v2980_v11 }
 0x8fa   :  { %2997 = vst [vmem:[#allocation11 + $0x28] sm:$0xff] %v2981_v9 }
 0x8fb   :  { %3687 = shalt.err (!%p3684_p0)
}
 0x8fc   :  { %s3711_s28 = smov 128   ;;  %s3712_s29 = smov 8  }
 0x8fd   :  { %3011 = dma.vmem_to_hbm [thread:$0]  %s3006_s26, 1024, %s4361_s6, [#allocation8], %s3711_s28, %s3711_s28, %s3712_s29  }
 0x8fe   :  { %3700 = dma.done.wait [#allocation8], 1024  }
 0x8ff   :  { %3701 = vsyncadd [#allocation8], 4294966272 }
 0x900   :  { %3015 = vsyncpa [#allocation7], 1 }
 0x901   :  { %3016 = vsyncpa [#allocation10], 1 }
 0x902   :  { %3017 = vsyncpa [#allocation8], 1 }

// kernel: tpu_custom_call.1
= control target key start
LH: loop header
LB: loop body
LE: loop exit
PB: predicated region body
PF: predicated region fallthrough
CT: control target
= control target key end

     0   :  { %11 = vsyncpa [#allocation7], 0  ;;  %s4355_s0 = inlined_call_operand.vmem [shape: bf16[1,64,16], index: 0, kind: input, shape index: {}]   ;;  %s4356_s1 = inlined_call_operand.vmem [shape: bf16[16,512], index: 1, kind: input, shape index: {}]   ;;  %s4357_s2 = inlined_call_operand.hbm [shape: bf16[128,512], index: 2, kind: input, shape index: {}]   ;;  %s4358_s3 = inlined_call_operand.vmem [shape: f32[1,512], index: 3, kind: input, shape index: {}]   ;;  %s4359_s4 = inlined_call_operand.hbm [shape: bf16[128,128], index: 4, kind: input, shape index: {}]   ;;  %s4360_s5 = inlined_call_operand.vmem [shape: f32[1,128], index: 5, kind: input, shape index: {}]   ;;  %s4361_s6 = inlined_call_operand.hbm [shape: f32[1,64,128], index: 6, kind: output, shape index: {}]  }
   0x1   :  { %12 = vsyncpa [#allocation10], 0 }
   0x2   :  { %13 = vsyncpa [#allocation8], 0  ;;  %s3702_s21 = smov [#allocation6]  }
   0x3   :  { %s23_s22 = sshll.u32 %s3702_s21, 4  ;;  %s24_s22 = int_to_ptr.vmem [resolvable:$true] %s23_s22 }
   0x4   :  { %s3644_s23 = scalar_lea.vmem %s24_s22, 4096  ;;  %p3649_p1 = scmp.lt.s32.totalorder %s24_s22, %s24_s22 }
   0x5   :  { %p3645_p0 = scmp.ne.s32.totalorder %s24_s22, %s3644_s23  ;;  %p3650_p2 = scmp.lt.s32.totalorder %s3644_s23, %s3644_s23 }
   0x7   :  { %p3651_p3 = por %p3650_p2, %p3649_p1 }
   0x9   :  { %p3652_p4 = pnand %p3651_p3, %p3645_p0 }
   0xb   :  { %3655 = shalt.err (!%p3652_p4)
}
   0xc   :  { %s3703_s24 = smov 256   ;;  %s3704_s25 = smov 16  }
   0xd   :  { %29 = dma.hbm_to_vmem [thread:$0]  %s4357_s2, 4096, %s24_s22, [#allocation7], %s3703_s24, %s3703_s24, %s3704_s25  }
   0xe   :  { %s3705_s28 = smov [#allocation9]  }
   0xf   :  { %s37_s29 = sshll.u32 %s3705_s28, 4  ;;  %s38_s29 = int_to_ptr.vmem [resolvable:$true] %s37_s29 }
  0x10   :  { %s3664_s30 = scalar_lea.vmem %s38_s29, 1024  ;;  %p3669_p6 = scmp.lt.s32.totalorder %s38_s29, %s38_s29 }
  0x11   :  { %p3665_p5 = scmp.ne.s32.totalorder %s38_s29, %s3664_s30  ;;  %p3670_p7 = scmp.lt.s32.totalorder %s3664_s30, %s3664_s30 }
  0x13   :  { %p3671_p8 = por %p3670_p7, %p3669_p6 }
  0x15   :  { %p3672_p9 = pnand %p3671_p8, %p3665_p5 }
  0x17   :  { %3675 = shalt.err (!%p3672_p9)
}
  0x18   :  { %s3706_s7 = smov 64   ;;  %s3707_s8 = smov 4  }
  0x19   :  { %43 = dma.hbm_to_vmem [thread:$0]  %s4359_s4, 1024, %s38_s29, [#allocation10], %s3706_s7, %s3706_s7, %s3707_s8  }
  0x1a   :  { %3696 = dma.done.wait [#allocation7], 4096  }
  0x1b   :  { %3697 = vsyncadd [#allocation7], 4294963200 }
  0x1c   :  { %3698 = dma.done.wait [#allocation10], 1024  }
  0x1d   :  { %3699 = vsyncadd [#allocation10], 4294966272  ;;  %v4362_v0 = vmov 0   ;;  %v3381_v1 = vld [vmem:[%s4356_s1 + $0xc] ss:$16 sps:$4 sm:$0xff]   ;;  %v3384_v3 = vld [vmem:[%s4355_s0] sm:$0xff]   ;;  %v73_v42 = vlaneseq }
  0x1e   :  { %251 = vmatprep.mubr.bf16.mxu1 %v4362_v0  ;;  %178 = vmatprep.mubr.bf16.mxu0 %v4362_v0  ;;  %v3383_v2 = vld [vmem:[%s4356_s1 + $0x8] ss:$16 sps:$4 sm:$0xff]   ;;  %vm133_vm0 = vcmask 130048   ;;  %v3765_v4 = vld [vmem:[#allocation6 + $0xe0] ss:$16 sps:$4 sm:$0xff]   ;;  %v3709_v29 = vmov 0.0|0.0  }
  0x1f   :  { %233 = vmatprep.subr.bf16.mxu1 %v3381_v1  ;;  %v3767_v5 = vld [vmem:[#allocation6 + $0xe4] ss:$16 sps:$4 sm:$0xff]   ;;  %v3774_v7 = vld [vmem:[#allocation6 + $0xc0] ss:$16 sps:$4 sm:$0xff]   ;;  %v3391_v9 = vld [vmem:[%s4355_s0 + $0x8] sm:$0xff]   ;;  %v74_v43 = vshrl.u32 %v73_v42, 7 }
  0x20   :  { %234 = vmatpush1.bf16.msra.mxu1 %v3383_v2  ;;  %v3769_v6 = vld [vmem:[#allocation6 + $0xc4] ss:$16 sps:$4 sm:$0xff]   ;;  %v3784_v10 = vld [vmem:[#allocation6 + $0xa0] ss:$16 sps:$4 sm:$0xff]   ;;  %v3405_v21 = vld [vmem:[%s4355_s0 + $0x18] sm:$0xff]  }
  0x21   :  { %526 = vmatprep.subr.bf16.mxu1 %v3767_v5  ;;  %v3778_v8 = vld [vmem:[#allocation6 + $0xa4] ss:$16 sps:$4 sm:$0xff]   ;;  %v3790_v12 = vld [vmem:[#allocation6 + $0x80] ss:$16 sps:$4 sm:$0xff]   ;;  %v3840_v25 = vld [vmem:[#allocation6 + $0xec] ss:$16 sps:$4 sm:$0xff]  }
  0x22   :  { %v3787_v11 = vld [vmem:[#allocation6 + $0x84] ss:$16 sps:$4 sm:$0xff]   ;;  %v3411_v14 = vld [vmem:[%s4356_s1] ss:$16 sps:$4 sm:$0xff]   ;;  %v3847_v26 = vld [vmem:[#allocation6 + $0xe8] ss:$16 sps:$4 sm:$0xff]  }
  0x23   :  { %3037 = vmatmul.mubr.msk.bf16.vlgmr.msra.gmra.mxu1 %vm133_vm0, %v3384_v3  ;;  %v3409_v13 = vld [vmem:[%s4356_s1 + $0x4] ss:$16 sps:$4 sm:$0xff]   ;;  %v3807_v17 = vld [vmem:[#allocation6 + $0x60] ss:$16 sps:$4 sm:$0xff]   ;;  %v3850_v27 = vld [vmem:[#allocation6 + $0xcc] ss:$16 sps:$4 sm:$0xff]  }
  0x24   :  { %527 = vmatpush1.bf16.msra.mxu1 %v3765_v4  ;;  %261 = vmatprep.mubr.bf16.mxu1 %v4362_v0  ;;  %v3801_v15 = vld [vmem:[#allocation6 + $0x64] ss:$16 sps:$4 sm:$0xff]   ;;  %v3817_v19 = vld [vmem:[#allocation6 + $0x40] ss:$16 sps:$4 sm:$0xff]   ;;  %v3856_v28 = vld [vmem:[#allocation6 + $0xc8] ss:$16 sps:$4 sm:$0xff]  }
  0x25   :  { %528 = vmatprep.subr.bf16.mxu1 %v3769_v6  ;;  %160 = vmatprep.subr.bf16.mxu0 %v3409_v13  ;;  %v3398_v16 = vld [vmem:[%s4355_s0 + $0x10] sm:$0xff]   ;;  %v3859_v30 = vld [vmem:[#allocation6 + $0xac] ss:$16 sps:$4 sm:$0xff]   ;;  %v3866_v31 = vld [vmem:[#allocation6 + $0xa8] ss:$16 sps:$4 sm:$0xff]   ;;  %v83_v44 = vsub.s32 2, %v74_v43 }
  0x26   :  { %161 = vmatpush1.bf16.msra.mxu0 %v3411_v14  ;;  %v3811_v18 = vld [vmem:[#allocation6 + $0x44] ss:$16 sps:$4 sm:$0xff]   ;;  %v3830_v22 = vld [vmem:[#allocation6 + $0x20] ss:$16 sps:$4 sm:$0xff]   ;;  %v3869_v32 = vld [vmem:[#allocation6 + $0x8c] ss:$16 sps:$4 sm:$0xff]  }
  0x27   :  { %837 = vmatprep.subr.bf16.mxu0 %v3767_v5  ;;  %v3821_v20 = vld [vmem:[#allocation6 + $0x24] ss:$16 sps:$4 sm:$0xff]   ;;  %v3836_v24 = vld [vmem:[#allocation6] ss:$16 sps:$4 sm:$0xff]   ;;  %v3879_v33 = vld [vmem:[#allocation6 + $0x88] ss:$16 sps:$4 sm:$0xff]  }
  0x28   :  { %529 = vmatpush1.bf16.msra.mxu1 %v3774_v7  ;;  %v3834_v23 = vld [vmem:[#allocation6 + $0x4] ss:$16 sps:$4 sm:$0xff]   ;;  %v3883_v34 = vld [vmem:[#allocation6 + $0x6c] ss:$16 sps:$4 sm:$0xff]   ;;  %v3887_v35 = vld [vmem:[#allocation6 + $0x68] ss:$16 sps:$4 sm:$0xff]  }
  0x29   :  { %530 = vmatprep.subr.bf16.mxu1 %v3778_v8  ;;  %3033 = vmatmul.mubr.msk.bf16.vlgmr.msra.gmra.mxu0 %vm133_vm0, %v3384_v3  ;;  %v3891_v36 = vld [vmem:[#allocation6 + $0x4c] ss:$16 sps:$4 sm:$0xff]   ;;  %v3894_v37 = vld [vmem:[#allocation6 + $0x48] ss:$16 sps:$4 sm:$0xff]   ;;  %v71_v45 = vld [vmem:[%s4358_s3] sm:$0xf] }
  0x2a   :  { %838 = vmatpush1.bf16.msra.mxu0 %v3765_v4  ;;  %188 = vmatprep.mubr.bf16.mxu0 %v4362_v0  ;;  %v3897_v38 = vld [vmem:[#allocation6 + $0x2c] ss:$16 sps:$4 sm:$0xff]   ;;  %v3900_v39 = vld [vmem:[#allocation6 + $0x28] ss:$16 sps:$4 sm:$0xff]   ;;  %v87_v47 = vsub.s32 3, %v74_v43  ;;  %v3935_v49 = vrot.slane %v71_v45, %v83_v44  ;;  %v75_v13 = vsub.s32 0, %v74_v43 }
  0x2b   :  { %3038 = vmatmul.mubr.msk.bf16.gmra.mxu1 %vm133_vm0, %v3391_v9  ;;  %839 = vmatprep.subr.bf16.mxu0 %v3769_v6  ;;  %v3903_v40 = vld [vmem:[#allocation6 + $0xc] ss:$16 sps:$4 sm:$0xff]   ;;  %v3906_v41 = vld [vmem:[#allocation6 + $0x8] ss:$16 sps:$4 sm:$0xff]  }
  0x2c   :  { %531 = vmatpush1.bf16.msra.mxu1 %v3784_v10  ;;  %271 = vmatprep.mubr.bf16.mxu1 %v4362_v0  ;;  %v3937_v51 = vrot.slane %v71_v45, %v87_v47 }
  0x2d   :  { %532 = vmatprep.subr.bf16.mxu1 %v3787_v11 }
  0x2e   :  { %840 = vmatpush1.bf16.msra.mxu0 %v3774_v7 }
  0x2f   :  { %841 = vmatprep.subr.bf16.mxu0 %v3778_v8 }
  0x30   :  { %533 = vmatpush1.bf16.msra.mxu1 %v3790_v12 }
  0x31   :  { %534 = vmatprep.subr.bf16.mxu1 %v3801_v15  ;;  %3034 = vmatmul.mubr.msk.bf16.gmra.mxu0 %vm133_vm0, %v3391_v9 }
  0x32   :  { %842 = vmatpush1.bf16.msra.mxu0 %v3784_v10  ;;  %198 = vmatprep.mubr.bf16.mxu0 %v4362_v0 }
  0x33   :  { %3039 = vmatmul.mubr.msk.bf16.gmra.mxu1 %vm133_vm0, %v3398_v16  ;;  %843 = vmatprep.subr.bf16.mxu0 %v3787_v11 }
  0x34   :  { %535 = vmatpush1.bf16.msra.mxu1 %v3807_v17  ;;  %281 = vmatprep.mubr.bf16.mxu1 %v4362_v0 }
  0x35   :  { %536 = vmatprep.subr.bf16.mxu1 %v3811_v18 }
  0x36   :  { %844 = vmatpush1.bf16.msra.mxu0 %v3790_v12 }
  0x37   :  { %845 = vmatprep.subr.bf16.mxu0 %v3801_v15 }
  0x38   :  { %537 = vmatpush1.bf16.msra.mxu1 %v3817_v19 }
  0x39   :  { %538 = vmatprep.subr.bf16.mxu1 %v3821_v20  ;;  %3035 = vmatmul.mubr.msk.bf16.gmra.mxu0 %vm133_vm0, %v3398_v16 }
  0x3a   :  { %846 = vmatpush1.bf16.msra.mxu0 %v3807_v17  ;;  %208 = vmatprep.mubr.bf16.mxu0 %v4362_v0 }
  0x3b   :  { %3040 = vmatmul.mubr.msk.bf16.gmra.mxu1 %vm133_vm0, %v3405_v21  ;;  %847 = vmatprep.subr.bf16.mxu0 %v3811_v18 }
  0x3c   :  { %539 = vmatpush1.bf16.msra.mxu1 %v3830_v22  ;;  %558 = vmatprep.mubr.bf16.mxu1 %v4362_v0 }
  0x3d   :  { %540 = vmatprep.subr.bf16.mxu1 %v3834_v23 }
  0x3e   :  { %848 = vmatpush1.bf16.msra.mxu0 %v3817_v19 }
  0x3f   :  { %849 = vmatprep.subr.bf16.mxu0 %v3821_v20 }
  0x40   :  { %541 = vmatpush1.bf16.msra.mxu1 %v3836_v24 }
  0x41   :  { %567 = vmatprep.subr.bf16.mxu1 %v3840_v25  ;;  %3036 = vmatmul.mubr.msk.bf16.gmra.mxu0 %vm133_vm0, %v3405_v21 }
  0x42   :  { %850 = vmatpush1.bf16.msra.mxu0 %v3830_v22  ;;  %869 = vmatprep.mubr.bf16.mxu0 %v4362_v0 }
  0x43   :  { %559 = vmatmul.mubr.bf16.vlgmr.msra.gmra.mxu1 %v3709_v29  ;;  %851 = vmatprep.subr.bf16.mxu0 %v3834_v23 }
  0x44   :  { %568 = vmatpush1.bf16.msra.mxu1 %v3847_v26  ;;  %599 = vmatprep.mubr.bf16.mxu1 %v4362_v0 }
  0x45   :  { %569 = vmatprep.subr.bf16.mxu1 %v3850_v27 }
  0x46   :  { %852 = vmatpush1.bf16.msra.mxu0 %v3836_v24 }
  0x47   :  { %1149 = vmatprep.subr.bf16.mxu0 %v3767_v5 }
  0x48   :  { %570 = vmatpush1.bf16.msra.mxu1 %v3856_v28 }
  0x49   :  { %571 = vmatprep.subr.bf16.mxu1 %v3859_v30 }
  0x4c   :  { %572 = vmatpush1.bf16.msra.mxu1 %v3866_v31 }
  0x4d   :  { %573 = vmatprep.subr.bf16.mxu1 %v3869_v32 }
  0x50   :  { %574 = vmatpush1.bf16.msra.mxu1 %v3879_v33 }
  0x51   :  { %575 = vmatprep.subr.bf16.mxu1 %v3883_v34 }
  0x54   :  { %576 = vmatpush1.bf16.msra.mxu1 %v3887_v35 }
  0x55   :  { %577 = vmatprep.subr.bf16.mxu1 %v3891_v36 }
  0x58   :  { %578 = vmatpush1.bf16.msra.mxu1 %v3894_v37 }
  0x59   :  { %579 = vmatprep.subr.bf16.mxu1 %v3897_v38 }
  0x5c   :  { %580 = vmatpush1.bf16.msra.mxu1 %v3900_v39 }
  0x5d   :  { %581 = vmatprep.subr.bf16.mxu1 %v3903_v40 }
  0x60   :  { %582 = vmatpush1.bf16.msra.mxu1 %v3906_v41 }
  0x61   :  { %878 = vmatprep.subr.bf16.mxu1 %v3840_v25 }
  0x63   :  { %600 = vmatmul.mubr.bf16.vlgmr.msra.gmra.mxu1 %v3709_v29  ;;  %v79_v29 = vsub.s32 1, %v74_v43 }
  0x64   :  { %879 = vmatpush1.bf16.msra.mxu1 %v3847_v26  ;;  %910 = vmatprep.mubr.bf16.mxu1 %v4362_v0 }
  0x65   :  { %880 = vmatprep.subr.bf16.mxu1 %v3850_v27 }
  0x68   :  { %881 = vmatpush1.bf16.msra.mxu1 %v3856_v28 }
  0x69   :  { %882 = vmatprep.subr.bf16.mxu1 %v3859_v30 }
  0x6c   :  { %883 = vmatpush1.bf16.msra.mxu1 %v3866_v31 }
  0x6d   :  { %884 = vmatprep.subr.bf16.mxu1 %v3869_v32 }
  0x70   :  { %885 = vmatpush1.bf16.msra.mxu1 %v3879_v33 }
  0x71   :  { %886 = vmatprep.subr.bf16.mxu1 %v3883_v34 }
  0x74   :  { %887 = vmatpush1.bf16.msra.mxu1 %v3887_v35 }
  0x75   :  { %888 = vmatprep.subr.bf16.mxu1 %v3891_v36 }
  0x78   :  { %889 = vmatpush1.bf16.msra.mxu1 %v3894_v37 }
  0x79   :  { %890 = vmatprep.subr.bf16.mxu1 %v3897_v38 }
  0x7c   :  { %891 = vmatpush1.bf16.msra.mxu1 %v3900_v39 }
  0x7d   :  { %892 = vmatprep.subr.bf16.mxu1 %v3903_v40 }
  0x80   :  { %893 = vmatpush1.bf16.msra.mxu1 %v3906_v41 }
  0x81   :  { %1190 = vmatprep.subr.bf16.mxu1 %v3840_v25 }
  0xe3   :  { %v3931_v46 = vpop.f32.mrf.mxu1 }
  0xe5   :  { %v3933_v48 = vpop.f32.mrf.mxu1 }
  0xe7   :  { %v257_v50 = vpop.f32.mrf.mxu1 }
  0xe8   :  { %v3940_v52 = vadd.f32 %v257_v50, %v3935_v49  ;;  %v3970_v50 = vrot.slane %v71_v45, %v75_v13 }
  0xe9   :  { %v259_v53 = vpop.f32.mrf.mxu1  ;;  %v180_v63 = vpop.f32.mrf.mxu0 }
  0xea   :  { %v3943_v54 = vadd.f32 %v259_v53, %v3937_v51 }
  0xeb   :  { %v263_v55 = vpop.f32.mrf.mxu1  ;;  %v182_v3 = vpop.f32.mrf.mxu0 }
  0xec   :  { %v3946_v56 = vadd.f32 %v263_v55, %v3935_v49 }
  0xed   :  { %v265_v57 = vpop.f32.mrf.mxu1  ;;  %v3963_v16 = vpop.f32.mrf.mxu0 }
  0xee   :  { %v3949_v58 = vadd.f32 %v265_v57, %v3937_v51 }
  0xef   :  { %v267_v59 = vpop.f32.mrf.mxu1  ;;  %v3968_v44 = vpop.f32.mrf.mxu0 }
  0xf0   :  { %v3952_v60 = vadd.f32 %v267_v59, %v3935_v49  ;;  %v3975_v59 = vrot.slane %v71_v45, %v79_v29 }
  0xf1   :  { %v269_v61 = vpop.f32.mrf.mxu1  ;;  %v190_v55 = vpop.f32.mrf.mxu0 }
  0xf2   :  { %4364 = vst [vmem:[#allocation15_spill] sm:$0xff] %v3952_v60  ;;  %v3955_v62 = vadd.f32 %v269_v61, %v3937_v51  ;;  %v3978_v61 = vadd.f32 %v190_v55, %v3970_v50 }
  0xf3   :  { %v273_v1 = vpop.f32.mrf.mxu1 }
  0xf4   :  { %4365 = vst [vmem:[#allocation16_spill] sm:$0xff] %v3955_v62  ;;  %v3958_v2 = vadd.f32 %v273_v1, %v3935_v49  ;;  %v192_v1 = vpop.f32.mrf.mxu0 }
  0xf5   :  { %v275_v9 = vpop.f32.mrf.mxu1 }
  0xf6   :  { %4366 = vst [vmem:[#allocation17_spill] sm:$0xff] %v3958_v2  ;;  %v3961_v14 = vadd.f32 %v275_v9, %v3937_v51  ;;  %v181_v2 = vadd.f32 %v180_v63, %v3970_v50 }
  0xf7   :  { %v277_v21 = vpop.f32.mrf.mxu1 }
  0xf8   :  { %4367 = vst [vmem:[#allocation18_spill] sm:$0xff] %v3961_v14  ;;  %v3966_v42 = vadd.f32 %v277_v21, %v3935_v49  ;;  %v3984_v21 = vadd.f32 %v192_v1, %v3975_v59 }
  0xf9   :  { %v279_v47 = vpop.f32.mrf.mxu1 }
  0xfa   :  { %4368 = vst [vmem:[#allocation19_spill] sm:$0xff] %v3966_v42  ;;  %v3973_v53 = vadd.f32 %v279_v47, %v3937_v51  ;;  %v194_v47 = vpop.f32.mrf.mxu0 }
  0xfb   :  { %v283_v57 = vpop.f32.mrf.mxu1  ;;  %v3990_v42 = vadd.f32 %v194_v47, %v3970_v50 }
  0xfc   :  { %4369 = vst [vmem:[#allocation20_spill] sm:$0xff] %v3973_v53  ;;  %v3981_v43 = vadd.f32 %v283_v57, %v3935_v49  ;;  %v196_v29 = vpop.f32.mrf.mxu0 }
  0xfd   :  { %v285_v9 = vpop.f32.mrf.mxu1  ;;  %4372 = vst [vmem:[#allocation23_spill] sm:$0xff] %v3990_v42  ;;  %v3996_v57 = vadd.f32 %v196_v29, %v3975_v59 }
  0xfe   :  { %4370 = vst [vmem:[#allocation21_spill] sm:$0xff] %v3981_v43  ;;  %v3987_v13 = vadd.f32 %v285_v9, %v3937_v51  ;;  %v200_v1 = vpop.f32.mrf.mxu0 }
  0xff   :  { %v287_v0 = vpop.f32.mrf.mxu1  ;;  %4374 = vst [vmem:[#allocation25_spill] sm:$0xff] %v3996_v57  ;;  %v4002_v9 = vadd.f32 %v200_v1, %v3970_v50 }
 0x100   :  { %4371 = vst [vmem:[#allocation22_spill] sm:$0xff] %v3987_v13  ;;  %v3993_v45 = vadd.f32 %v287_v0, %v3935_v49  ;;  %v183_v13 = vadd.f32 %v182_v3, %v3975_v59  ;;  %v202_v47 = vpop.f32.mrf.mxu0 }
 0x101   :  { %v289_v55 = vpop.f32.mrf.mxu1  ;;  %4376 = vst [vmem:[#allocation27_spill] sm:$0xff] %v4002_v9 }
 0x102   :  { %4373 = vst [vmem:[#allocation24_spill] sm:$0xff] %v3993_v45  ;;  %v3999_v43 = vadd.f32 %v289_v55, %v3937_v51  ;;  %v4007_v45 = vadd.f32 %v202_v47, %v3975_v59  ;;  %v204_v14 = vpop.f32.mrf.mxu0 }
 0x103   :  { %v560_v53 = vpop.f32.mrf.mxu1  ;;  %v4010_v60 = vadd.f32 %v204_v14, %v3970_v50 }
 0x104   :  { %4375 = vst [vmem:[#allocation26_spill] sm:$0xff] %v3999_v43  ;;  %4377 = vst [vmem:[#allocation28_spill] sm:$0xff] %v4007_v45  ;;  %v206_v43 = vpop.f32.mrf.mxu0  ;;  %v608_v62 = vadd.f32 %v560_v53, %v181_v2 }
 0x105   :  { %v562_v0 = vpop.f32.mrf.mxu1  ;;  %v4013_v1 = vadd.f32 %v206_v43, %v3975_v59 }
 0x106   :  { %v609_v55 = vadd.f32 %v562_v0, %v183_v13  ;;  %v210_v3 = vpop.f32.mrf.mxu0  ;;  %v3073_v47 = vmul.f32 -1.442695, %v608_v62  ;;  %v256_v62 = vadd.f32 %v3933_v48, %v3937_v51 }
 0x107   :  { %v564_v29 = vpop.f32.mrf.mxu1  ;;  %4378 = vst [vmem:[#allocation29_spill] sm:$0xff] %v4013_v1  ;;  %v4016_v9 = vadd.f32 %v210_v3, %v3970_v50 }
 0x108   :  { %v3074_v63 = vmul.f32 -1.442695, %v609_v55  ;;  %v212_v42 = vpop.f32.mrf.mxu0 }
 0x109   :  { %v565_v57 = vpop.f32.mrf.mxu1  ;;  %4379 = vst [vmem:[#allocation30_spill] sm:$0xff] %v4016_v9  ;;  %v4019_v45 = vadd.f32 %v212_v42, %v3975_v59 }
 0x10a   :  { %v214_v29 = vpop.f32.mrf.mxu0  ;;  %3508 = vpow2.f32 %v3074_v63  ;;  %v254_v57 = vadd.f32 %v3931_v46, %v3935_v49 }
 0x10b   :  { %4380 = vst [vmem:[#allocation31_spill] sm:$0xff] %v4019_v45  ;;  %v4022_v14 = vadd.f32 %v214_v29, %v3970_v50  ;;  %3510 = vpow2.f32 %v3073_v47 }
 0x10d   :  { %4381 = vst [vmem:[#allocation32_spill] sm:$0xff] %v4022_v14 }
 0x117   :  { %v3509_v2 = vpop.eup %3508 }
 0x118   :  { %v3511_v53 = vpop.eup %3510  ;;  %v621_v43 = vadd.f32 1.0, %v3509_v2 }
 0x119   :  { %v615_v13 = vadd.f32 1.0, %v3511_v53 }
 0x11a   :  { %3512 = vrcp.f32 %v621_v43 }
 0x11b   :  { %3514 = vrcp.f32 %v615_v13 }
 0x123   :  { %v601_v0 = vpop.f32.mrf.mxu1 }
 0x124   :  { %v610_v42 = vadd.f32 %v601_v0, %v254_v57 }
 0x125   :  { %v603_v55 = vpop.f32.mrf.mxu1 }
 0x126   :  { %3516 = vtanh.f32 %v610_v42  ;;  %v611_v3 = vadd.f32 %v603_v55, %v256_v62 }
 0x127   :  { %v605_v29 = vpop.f32.mrf.mxu1  ;;  %v3513_v14 = vpop.eup %3512 }
 0x128   :  { %v3075_v63 = vmul.f32 -1.442695, %v611_v3  ;;  %v3515_v2 = vpop.eup %3514  ;;  %v631_v45 = vmul.f32 0.0, %v3513_v14 }
 0x129   :  { %v606_v47 = vpop.f32.mrf.mxu1 }
 0x12a   :  { %3518 = vpow2.f32 %v3075_v63 }
 0x133   :  { %v3517_v53 = vpop.eup %3516 }
 0x134   :  { %v632_v9 = vmul.f32 %v3517_v53, %v3515_v2 }
 0x136   :  { %v4028_v46 = vadd.f32 %v632_v9, %v631_v45  ;;  %v4382_v45 = vmov 0  }
 0x137   :  { %v3519_v49 = vpop.eup %3518 }
 0x138   :  { %v628_v1 = vadd.f32 1.0, %v3519_v49  ;;  %3520 = vtanh.f32 %v4028_v46 }
 0x13a   :  { %3522 = vrcp.f32 %v628_v1 }
 0x145   :  { %v3521_v48 = vpop.eup %3520 }
 0x147   :  { %v3523_v51 = vpop.eup %3522 }
 0x148   :  { %v635_v43 = vmul.f32 %v3523_v51, %v3521_v48 }
 0x14a   :  { %v636_v13 = vpack.c.bf16 %v635_v43, %v635_v43 }
 0x14c   :  { %637 = vst [vmem:[#allocation4] sm:$0xf] %v636_v13  ;;  %870 = vmatmul.mubr.bf16.vlgmr.msra.gmra.mxu0 %v636_v13  ;;  %911 = vmatmul.mubr.bf16.vlgmr.msra.gmra.mxu1 %v636_v13 }
 0x14d   :  { %1150 = vmatpush1.bf16.msra.mxu0 %v3765_v4  ;;  %1191 = vmatpush1.bf16.msra.mxu1 %v3847_v26 }
 0x14e   :  { %1151 = vmatprep.subr.bf16.mxu0 %v3769_v6  ;;  %1192 = vmatprep.subr.bf16.mxu1 %v3850_v27 }
 0x14f   :  { %1181 = vmatprep.mubr.bf16.mxu0 %v4382_v45  ;;  %1222 = vmatprep.mubr.bf16.mxu1 %v4382_v45 }
 0x151   :  { %1152 = vmatpush1.bf16.msra.mxu0 %v3774_v7  ;;  %1193 = vmatpush1.bf16.msra.mxu1 %v3856_v28 }
 0x152   :  { %1153 = vmatprep.subr.bf16.mxu0 %v3778_v8  ;;  %1194 = vmatprep.subr.bf16.mxu1 %v3859_v30 }
 0x155   :  { %1154 = vmatpush1.bf16.msra.mxu0 %v3784_v10  ;;  %1195 = vmatpush1.bf16.msra.mxu1 %v3866_v31 }
 0x156   :  { %1155 = vmatprep.subr.bf16.mxu0 %v3787_v11  ;;  %1196 = vmatprep.subr.bf16.mxu1 %v3869_v32 }
 0x159   :  { %1156 = vmatpush1.bf16.msra.mxu0 %v3790_v12  ;;  %1197 = vmatpush1.bf16.msra.mxu1 %v3879_v33 }
 0x15a   :  { %1157 = vmatprep.subr.bf16.mxu0 %v3801_v15  ;;  %1198 = vmatprep.subr.bf16.mxu1 %v3883_v34 }
 0x15d   :  { %1158 = vmatpush1.bf16.msra.mxu0 %v3807_v17  ;;  %1199 = vmatpush1.bf16.msra.mxu1 %v3887_v35 }
 0x15e   :  { %1159 = vmatprep.subr.bf16.mxu0 %v3811_v18  ;;  %1200 = vmatprep.subr.bf16.mxu1 %v3891_v36  ;;  %v4065_v18 = vpop.f32.mrf.mxu0 }
 0x161   :  { %1160 = vmatpush1.bf16.msra.mxu0 %v3817_v19  ;;  %1201 = vmatpush1.bf16.msra.mxu1 %v3894_v37  ;;  %v185_v19 = vadd.f32 %v3963_v16, %v3970_v50 }
 0x162   :  { %1161 = vmatprep.subr.bf16.mxu0 %v3821_v20  ;;  %1202 = vmatprep.subr.bf16.mxu1 %v3897_v38 }
 0x165   :  { %1162 = vmatpush1.bf16.msra.mxu0 %v3830_v22  ;;  %1203 = vmatpush1.bf16.msra.mxu1 %v3900_v39 }
 0x166   :  { %1163 = vmatprep.subr.bf16.mxu0 %v3834_v23  ;;  %1204 = vmatprep.subr.bf16.mxu1 %v3903_v40  ;;  %v187_v23 = vadd.f32 %v3968_v44, %v3975_v59 }
 0x169   :  { %1164 = vmatpush1.bf16.msra.mxu0 %v3836_v24  ;;  %1205 = vmatpush1.bf16.msra.mxu1 %v3906_v41 }
 0x16a   :  { %1461 = vmatprep.subr.bf16.mxu0 %v3767_v5  ;;  %1502 = vmatprep.subr.bf16.mxu1 %v3840_v25 }
 0x20c   :  { %v871_v20 = vpop.f32.mrf.mxu0  ;;  %v912_v22 = vpop.f32.mrf.mxu1 }
 0x20d   :  { %v919_v9 = vadd.f32 %v871_v20, %v185_v19  ;;  %v921_v16 = vadd.f32 %v912_v22, %v3940_v52 }
 0x20e   :  { %v873_v1 = vpop.f32.mrf.mxu0  ;;  %v914_v14 = vpop.f32.mrf.mxu1 }
 0x20f   :  { %v3108_v24 = vmul.f32 -1.442695, %v919_v9  ;;  %v920_v57 = vadd.f32 %v873_v1, %v187_v23  ;;  %v922_v55 = vadd.f32 %v914_v14, %v3943_v54 }
 0x210   :  { %v875_v0 = vpop.f32.mrf.mxu0  ;;  %v916_v62 = vpop.f32.mrf.mxu1 }
 0x211   :  { %3524 = vpow2.f32 %v3108_v24  ;;  %v3109_v5 = vmul.f32 -1.442695, %v920_v57  ;;  %v3110_v50 = vmul.f32 -1.442695, %v922_v55  ;;  %v4131_v62 = vld [vmem:[#allocation6 + $0xe4] ss:$16 sps:$4 sm:$0xff]  }
 0x212   :  { %v876_v25 = vpop.f32.mrf.mxu0  ;;  %v917_v42 = vpop.f32.mrf.mxu1  ;;  %v4143_v55 = vld [vmem:[#allocation6 + $0xc4] ss:$16 sps:$4 sm:$0xff]  }
 0x213   :  { %3526 = vpow2.f32 %v3109_v5  ;;  %v4133_v5 = vld [vmem:[#allocation6 + $0xec] ss:$16 sps:$4 sm:$0xff]   ;;  %v4135_v25 = vld [vmem:[#allocation6 + $0xe0] ss:$16 sps:$4 sm:$0xff]   ;;  %v4137_v42 = vld [vmem:[#allocation6 + $0xe8] ss:$16 sps:$4 sm:$0xff]  }
 0x214   :  { %3528 = vtanh.f32 %v921_v16  ;;  %v4145_v16 = vld [vmem:[#allocation6 + $0xcc] ss:$16 sps:$4 sm:$0xff]  }
 0x215   :  { %3530 = vpow2.f32 %v3110_v50  ;;  %v4147_v50 = vld [vmem:[#allocation6 + $0xc0] ss:$16 sps:$4 sm:$0xff]  }
 0x21e   :  { %v3525_v3 = vpop.eup %3524 }
 0x21f   :  { %v926_v29 = vadd.f32 1.0, %v3525_v3  ;;  %v4149_v3 = vld [vmem:[#allocation6 + $0xc8] ss:$16 sps:$4 sm:$0xff]  }
 0x220   :  { %v3527_v44 = vpop.eup %3526 }
 0x221   :  { %3532 = vrcp.f32 %v926_v29  ;;  %v932_v63 = vadd.f32 1.0, %v3527_v44  ;;  %v3529_v47 = vpop.eup %3528  ;;  %v4155_v29 = vld [vmem:[#allocation6 + $0xa4] ss:$16 sps:$4 sm:$0xff]   ;;  %v4157_v44 = vld [vmem:[#allocation6 + $0xac] ss:$16 sps:$4 sm:$0xff]  }
 0x222   :  { %v3531_v2 = vpop.eup %3530 }
 0x223   :  { %3534 = vrcp.f32 %v932_v63  ;;  %v939_v51 = vadd.f32 1.0, %v3531_v2  ;;  %v4159_v63 = vld [vmem:[#allocation6 + $0xa0] ss:$16 sps:$4 sm:$0xff]   ;;  %v4167_v2 = vld [vmem:[#allocation6 + $0x84] ss:$16 sps:$4 sm:$0xff]  }
 0x225   :  { %3536 = vrcp.f32 %v939_v51  ;;  %v4177_v51 = vld [vmem:[#allocation6 + $0x64] ss:$16 sps:$4 sm:$0xff]  }
 0x22e   :  { %v3533_v53 = vpop.eup %3532 }
 0x22f   :  { %v943_v49 = vmul.f32 %v3533_v53, %v3529_v47  ;;  %v4161_v47 = vld [vmem:[#allocation6 + $0xa8] ss:$16 sps:$4 sm:$0xff]   ;;  %v4169_v53 = vld [vmem:[#allocation6 + $0x8c] ss:$16 sps:$4 sm:$0xff]  }
 0x230   :  { %v3535_v48 = vpop.eup %3534 }
 0x231   :  { %v942_v43 = vmul.f32 %v3535_v48, %v4028_v46  ;;  %v4173_v48 = vld [vmem:[#allocation6 + $0x88] ss:$16 sps:$4 sm:$0xff]  }
 0x232   :  { %v3537_v52 = vpop.eup %3536 }
 0x233   :  { %v4074_v54 = vadd.f32 %v943_v49, %v942_v43  ;;  %v4171_v49 = vld [vmem:[#allocation6 + $0x80] ss:$16 sps:$4 sm:$0xff]   ;;  %v4179_v43 = vld [vmem:[#allocation6 + $0x6c] ss:$16 sps:$4 sm:$0xff]  }
 0x235   :  { %3538 = vtanh.f32 %v4074_v54 }
 0x242   :  { %v3539_v13 = vpop.eup %3538 }
 0x243   :  { %v946_v19 = vmul.f32 %v3539_v13, %v3537_v52  ;;  %v4185_v52 = vld [vmem:[#allocation6 + $0x68] ss:$16 sps:$4 sm:$0xff]   ;;  %v4189_v13 = vld [vmem:[#allocation6 + $0x4c] ss:$16 sps:$4 sm:$0xff]  }
 0x245   :  { %v947_v20 = vpack.c.bf16 %v946_v19, %v946_v19  ;;  %v4193_v19 = vld [vmem:[#allocation6 + $0x48] ss:$16 sps:$4 sm:$0xff]  }
 0x247   :  { %949 = vst [vmem:[#allocation4 + $0x4] sm:$0xf] %v947_v20  ;;  %1182 = vmatmul.mubr.bf16.vlgmr.msra.gmra.mxu0 %v947_v20  ;;  %1223 = vmatmul.mubr.bf16.vlgmr.msra.gmra.mxu1 %v947_v20  ;;  %v4197_v20 = vld [vmem:[#allocation6 + $0x2c] ss:$16 sps:$4 sm:$0xff]  }
 0x248   :  { %1462 = vmatpush1.bf16.msra.mxu0 %v3765_v4  ;;  %1503 = vmatpush1.bf16.msra.mxu1 %v3847_v26  ;;  %v4103_v4 = vld [vmem:[#allocation6 + $0x40] ss:$16 sps:$4 sm:$0xff]  }
 0x249   :  { %1463 = vmatprep.subr.bf16.mxu0 %v3769_v6  ;;  %1504 = vmatprep.subr.bf16.mxu1 %v3850_v27  ;;  %v4105_v6 = vld [vmem:[#allocation6 + $0x44] ss:$16 sps:$4 sm:$0xff]  }
 0x24a   :  { %1493 = vmatprep.mubr.bf16.mxu0 %v4382_v45  ;;  %1534 = vmatprep.mubr.bf16.mxu1 %v4382_v45 }
 0x24c   :  { %1464 = vmatpush1.bf16.msra.mxu0 %v3774_v7  ;;  %1505 = vmatpush1.bf16.msra.mxu1 %v3856_v28  ;;  %v4107_v7 = vld [vmem:[#allocation6 + $0x24] ss:$16 sps:$4 sm:$0xff]  }
 0x24d   :  { %1465 = vmatprep.subr.bf16.mxu0 %v3778_v8  ;;  %1506 = vmatprep.subr.bf16.mxu1 %v3859_v30  ;;  %v4111_v8 = vld [vmem:[#allocation6 + $0x20] ss:$16 sps:$4 sm:$0xff]  }
 0x250   :  { %1466 = vmatpush1.bf16.msra.mxu0 %v3784_v10  ;;  %1507 = vmatpush1.bf16.msra.mxu1 %v3866_v31  ;;  %v4114_v10 = vld [vmem:[#allocation6 + $0x4] ss:$16 sps:$4 sm:$0xff]  }
 0x251   :  { %1467 = vmatprep.subr.bf16.mxu0 %v3787_v11  ;;  %1508 = vmatprep.subr.bf16.mxu1 %v3869_v32  ;;  %v4117_v11 = vld [vmem:[#allocation6] ss:$16 sps:$4 sm:$0xff]  }
 0x254   :  { %1468 = vmatpush1.bf16.msra.mxu0 %v3790_v12  ;;  %1509 = vmatpush1.bf16.msra.mxu1 %v3879_v33 }
 0x255   :  { %1469 = vmatprep.subr.bf16.mxu0 %v3801_v15  ;;  %1510 = vmatprep.subr.bf16.mxu1 %v3883_v34 }
 0x258   :  { %1470 = vmatpush1.bf16.msra.mxu0 %v3807_v17  ;;  %1511 = vmatpush1.bf16.msra.mxu1 %v3887_v35 }
 0x259   :  { %1512 = vmatprep.subr.bf16.mxu1 %v3891_v36  ;;  %1471 = vmatprep.subr.bf16.mxu0 %v4105_v6 }
 0x25c   :  { %1513 = vmatpush1.bf16.msra.mxu1 %v3894_v37  ;;  %1472 = vmatpush1.bf16.msra.mxu0 %v4103_v4 }
 0x25d   :  { %1514 = vmatprep.subr.bf16.mxu1 %v3897_v38  ;;  %1473 = vmatprep.subr.bf16.mxu0 %v4107_v7 }
 0x260   :  { %1515 = vmatpush1.bf16.msra.mxu1 %v3900_v39  ;;  %1474 = vmatpush1.bf16.msra.mxu0 %v4111_v8 }
 0x261   :  { %1516 = vmatprep.subr.bf16.mxu1 %v3903_v40  ;;  %1475 = vmatprep.subr.bf16.mxu0 %v4114_v10 }
 0x264   :  { %1517 = vmatpush1.bf16.msra.mxu1 %v3906_v41  ;;  %1476 = vmatpush1.bf16.msra.mxu0 %v4117_v11 }
 0x265   :  { %1773 = vmatprep.subr.bf16.mxu0 %v4131_v62  ;;  %1814 = vmatprep.subr.bf16.mxu1 %v4133_v5 }
 0x307   :  { %v1183_v12 = vpop.f32.mrf.mxu0  ;;  %v1224_v15 = vpop.f32.mrf.mxu1 }
 0x308   :  { %v1231_v17 = vadd.f32 %v1183_v12, %v3978_v61  ;;  %v1233_v37 = vadd.f32 %v1224_v15, %v3946_v56  ;;  %v4201_v12 = vld [vmem:[#allocation6 + $0x28] ss:$16 sps:$4 sm:$0xff]   ;;  %v4205_v15 = vld [vmem:[#allocation6 + $0xc] ss:$16 sps:$4 sm:$0xff]  }
 0x309   :  { %v1185_v26 = vpop.f32.mrf.mxu0  ;;  %v1226_v27 = vpop.f32.mrf.mxu1 }
 0x30a   :  { %v3143_v28 = vmul.f32 -1.442695, %v1231_v17  ;;  %v1232_v30 = vadd.f32 %v1185_v26, %v3984_v21  ;;  %v1234_v36 = vadd.f32 %v1226_v27, %v3949_v58  ;;  %v4209_v17 = vld [vmem:[#allocation6 + $0x8] ss:$16 sps:$4 sm:$0xff]  }
 0x30b   :  { %v1187_v31 = vpop.f32.mrf.mxu0  ;;  %v1228_v32 = vpop.f32.mrf.mxu1 }
 0x30c   :  { %3540 = vpow2.f32 %v3143_v28  ;;  %v3144_v33 = vmul.f32 -1.442695, %v1232_v30  ;;  %v3145_v38 = vmul.f32 -1.442695, %v1234_v36  ;;  %v4383_v28 = vld [vmem:[#allocation23_spill] sm:$0xff] }
 0x30d   :  { %v1188_v34 = vpop.f32.mrf.mxu0  ;;  %v1229_v35 = vpop.f32.mrf.mxu1 }
 0x30e   :  { %3542 = vpow2.f32 %v3144_v33  ;;  %v4384_v34 = vld [vmem:[#allocation25_spill] sm:$0xff] }
 0x30f   :  { %3544 = vtanh.f32 %v1233_v37 }
 0x310   :  { %3546 = vpow2.f32 %v3145_v38 }
 0x319   :  { %v3541_v39 = vpop.eup %3540 }
 0x31a   :  { %v1238_v40 = vadd.f32 1.0, %v3541_v39 }
 0x31b   :  { %v3543_v41 = vpop.eup %3542 }
 0x31c   :  { %3548 = vrcp.f32 %v1238_v40  ;;  %v1244_v61 = vadd.f32 1.0, %v3543_v41  ;;  %v3545_v21 = vpop.eup %3544  ;;  %v4385_v41 = vld [vmem:[#allocation16_spill] sm:$0xff] }
 0x31d   :  { %v3547_v46 = vpop.eup %3546 }
 0x31e   :  { %3550 = vrcp.f32 %v1244_v61  ;;  %v1251_v1 = vadd.f32 1.0, %v3547_v46 }
 0x320   :  { %3552 = vrcp.f32 %v1251_v1 }
 0x329   :  { %v3549_v22 = vpop.eup %3548 }
 0x32a   :  { %v1255_v23 = vmul.f32 %v3549_v22, %v3545_v21  ;;  %v4386_v21 = vld [vmem:[#allocation15_spill] sm:$0xff] }
 0x32b   :  { %v3551_v9 = vpop.eup %3550 }
 0x32c   :  { %v1254_v14 = vmul.f32 %v3551_v9, %v4074_v54  ;;  %v4183_v54 = vld [vmem:[#allocation6 + $0x60] ss:$16 sps:$4 sm:$0xff]  }
 0x32d   :  { %v3553_v56 = vpop.eup %3552 }
 0x32e   :  { %v4126_v58 = vadd.f32 %v1255_v23, %v1254_v14 }
 0x330   :  { %3554 = vtanh.f32 %v4126_v58 }
 0x33d   :  { %v3555_v24 = vpop.eup %3554 }
 0x33e   :  { %v1258_v57 = vmul.f32 %v3555_v24, %v3553_v56 }
 0x340   :  { %v1259_v0 = vpack.c.bf16 %v1258_v57, %v1258_v57 }
 0x342   :  { %1261 = vst [vmem:[#allocation4 + $0x8] sm:$0xf] %v1259_v0  ;;  %1494 = vmatmul.mubr.bf16.vlgmr.msra.gmra.mxu0 %v1259_v0  ;;  %1535 = vmatmul.mubr.bf16.vlgmr.msra.gmra.mxu1 %v1259_v0 }
 0x343   :  { %1805 = vmatprep.mubr.bf16.mxu0 %v4382_v45  ;;  %1846 = vmatprep.mubr.bf16.mxu1 %v4382_v45 }
 0x344   :  { %1774 = vmatpush1.bf16.msra.mxu0 %v4135_v25  ;;  %1815 = vmatpush1.bf16.msra.mxu1 %v4137_v42 }
 0x345   :  { %1775 = vmatprep.subr.bf16.mxu0 %v4143_v55  ;;  %1816 = vmatprep.subr.bf16.mxu1 %v4145_v16 }
 0x348   :  { %1776 = vmatpush1.bf16.msra.mxu0 %v4147_v50  ;;  %1817 = vmatpush1.bf16.msra.mxu1 %v4149_v3 }
 0x349   :  { %1777 = vmatprep.subr.bf16.mxu0 %v4155_v29  ;;  %1818 = vmatprep.subr.bf16.mxu1 %v4157_v44 }
 0x34c   :  { %1778 = vmatpush1.bf16.msra.mxu0 %v4159_v63  ;;  %1819 = vmatpush1.bf16.msra.mxu1 %v4161_v47 }
 0x34d   :  { %1779 = vmatprep.subr.bf16.mxu0 %v4167_v2  ;;  %1820 = vmatprep.subr.bf16.mxu1 %v4169_v53 }
 0x350   :  { %1780 = vmatpush1.bf16.msra.mxu0 %v4171_v49  ;;  %1821 = vmatpush1.bf16.msra.mxu1 %v4173_v48 }
 0x351   :  { %1781 = vmatprep.subr.bf16.mxu0 %v4177_v51  ;;  %1822 = vmatprep.subr.bf16.mxu1 %v4179_v43 }
 0x354   :  { %1782 = vmatpush1.bf16.msra.mxu0 %v4183_v54  ;;  %1823 = vmatpush1.bf16.msra.mxu1 %v4185_v52 }
 0x355   :  { %1783 = vmatprep.subr.bf16.mxu0 %v4105_v6  ;;  %1824 = vmatprep.subr.bf16.mxu1 %v4189_v13 }
 0x358   :  { %1784 = vmatpush1.bf16.msra.mxu0 %v4103_v4  ;;  %1825 = vmatpush1.bf16.msra.mxu1 %v4193_v19 }
 0x359   :  { %1785 = vmatprep.subr.bf16.mxu0 %v4107_v7  ;;  %1826 = vmatprep.subr.bf16.mxu1 %v4197_v20 }
 0x35c   :  { %1786 = vmatpush1.bf16.msra.mxu0 %v4111_v8  ;;  %1827 = vmatpush1.bf16.msra.mxu1 %v4201_v12 }
 0x35d   :  { %1787 = vmatprep.subr.bf16.mxu0 %v4114_v10  ;;  %1828 = vmatprep.subr.bf16.mxu1 %v4205_v15 }
 0x360   :  { %1788 = vmatpush1.bf16.msra.mxu0 %v4117_v11  ;;  %1829 = vmatpush1.bf16.msra.mxu1 %v4209_v17 }
 0x361   :  { %2085 = vmatprep.subr.bf16.mxu0 %v4131_v62  ;;  %2126 = vmatprep.subr.bf16.mxu1 %v4133_v5 }
 0x402   :  { %v1495_v26 = vpop.f32.mrf.mxu0  ;;  %v1536_v27 = vpop.f32.mrf.mxu1 }
 0x403   :  { %v1543_v30 = vadd.f32 %v1495_v26, %v4383_v28  ;;  %v1545_v46 = vadd.f32 %v1536_v27, %v4386_v21 }
 0x404   :  { %v1497_v31 = vpop.f32.mrf.mxu0  ;;  %v1538_v32 = vpop.f32.mrf.mxu1 }
 0x405   :  { %v3178_v33 = vmul.f32 -1.442695, %v1543_v30  ;;  %v1544_v35 = vadd.f32 %v1497_v31, %v4384_v34  ;;  %v1546_v61 = vadd.f32 %v1538_v32, %v4385_v41  ;;  %v4388_v41 = vld [vmem:[#allocation28_spill] sm:$0xff] }
 0x406   :  { %v1499_v36 = vpop.f32.mrf.mxu0  ;;  %v1540_v37 = vpop.f32.mrf.mxu1 }
 0x407   :  { %3556 = vpow2.f32 %v3178_v33  ;;  %v3179_v38 = vmul.f32 -1.442695, %v1544_v35  ;;  %v3180_v22 = vmul.f32 -1.442695, %v1546_v61  ;;  %v4387_v36 = vld [vmem:[#allocation27_spill] sm:$0xff] }
 0x408   :  { %v1500_v39 = vpop.f32.mrf.mxu0  ;;  %v1541_v40 = vpop.f32.mrf.mxu1 }
 0x409   :  { %3558 = vpow2.f32 %v3179_v38 }
 0x40a   :  { %3560 = vtanh.f32 %v1545_v46 }
 0x40b   :  { %3562 = vpow2.f32 %v3180_v22 }
 0x414   :  { %v3557_v23 = vpop.eup %3556 }
 0x415   :  { %v1550_v9 = vadd.f32 1.0, %v3557_v23 }
 0x416   :  { %v3559_v1 = vpop.eup %3558 }
 0x417   :  { %3564 = vrcp.f32 %v1550_v9  ;;  %v1556_v14 = vadd.f32 1.0, %v3559_v1  ;;  %v3561_v56 = vpop.eup %3560  ;;  %v4389_v1 = vld [vmem:[#allocation18_spill] sm:$0xff] }
 0x418   :  { %v3563_v24 = vpop.eup %3562 }
 0x419   :  { %3566 = vrcp.f32 %v1556_v14  ;;  %v1563_v28 = vadd.f32 1.0, %v3563_v24 }
 0x41b   :  { %3568 = vrcp.f32 %v1563_v28 }
 0x424   :  { %v3565_v57 = vpop.eup %3564 }
 0x425   :  { %v1567_v0 = vmul.f32 %v3565_v57, %v3561_v56  ;;  %v4390_v56 = vld [vmem:[#allocation17_spill] sm:$0xff] }
 0x426   :  { %v3567_v26 = vpop.eup %3566 }
 0x427   :  { %v1566_v30 = vmul.f32 %v3567_v26, %v4126_v58 }
 0x428   :  { %v3569_v27 = vpop.eup %3568 }
 0x429   :  { %v4222_v31 = vadd.f32 %v1567_v0, %v1566_v30 }
 0x42b   :  { %3570 = vtanh.f32 %v4222_v31 }
 0x438   :  { %v3571_v32 = vpop.eup %3570 }
 0x439   :  { %v1570_v33 = vmul.f32 %v3571_v32, %v3569_v27 }
 0x43b   :  { %v1571_v34 = vpack.c.bf16 %v1570_v33, %v1570_v33 }
 0x43d   :  { %1573 = vst [vmem:[#allocation4 + $0xc] sm:$0xf] %v1571_v34  ;;  %1806 = vmatmul.mubr.bf16.vlgmr.msra.gmra.mxu0 %v1571_v34  ;;  %1847 = vmatmul.mubr.bf16.vlgmr.msra.gmra.mxu1 %v1571_v34 }
 0x43e   :  { %2086 = vmatpush1.bf16.msra.mxu0 %v4135_v25  ;;  %2127 = vmatpush1.bf16.msra.mxu1 %v4137_v42 }
 0x43f   :  { %2087 = vmatprep.subr.bf16.mxu0 %v4143_v55  ;;  %2128 = vmatprep.subr.bf16.mxu1 %v4145_v16 }
 0x440   :  { %2117 = vmatprep.mubr.bf16.mxu0 %v4382_v45  ;;  %2158 = vmatprep.mubr.bf16.mxu1 %v4382_v45 }
 0x442   :  { %2088 = vmatpush1.bf16.msra.mxu0 %v4147_v50  ;;  %2129 = vmatpush1.bf16.msra.mxu1 %v4149_v3 }
 0x443   :  { %2089 = vmatprep.subr.bf16.mxu0 %v4155_v29  ;;  %2130 = vmatprep.subr.bf16.mxu1 %v4157_v44 }
 0x446   :  { %2090 = vmatpush1.bf16.msra.mxu0 %v4159_v63  ;;  %2131 = vmatpush1.bf16.msra.mxu1 %v4161_v47 }
 0x447   :  { %2091 = vmatprep.subr.bf16.mxu0 %v4167_v2  ;;  %2132 = vmatprep.subr.bf16.mxu1 %v4169_v53 }
 0x44a   :  { %2092 = vmatpush1.bf16.msra.mxu0 %v4171_v49  ;;  %2133 = vmatpush1.bf16.msra.mxu1 %v4173_v48 }
 0x44b   :  { %2093 = vmatprep.subr.bf16.mxu0 %v4177_v51  ;;  %2134 = vmatprep.subr.bf16.mxu1 %v4179_v43 }
 0x44e   :  { %2094 = vmatpush1.bf16.msra.mxu0 %v4183_v54  ;;  %2135 = vmatpush1.bf16.msra.mxu1 %v4185_v52 }
 0x44f   :  { %2095 = vmatprep.subr.bf16.mxu0 %v4105_v6  ;;  %2136 = vmatprep.subr.bf16.mxu1 %v4189_v13 }
 0x452   :  { %2096 = vmatpush1.bf16.msra.mxu0 %v4103_v4  ;;  %2137 = vmatpush1.bf16.msra.mxu1 %v4193_v19 }
 0x453   :  { %2097 = vmatprep.subr.bf16.mxu0 %v4107_v7  ;;  %2138 = vmatprep.subr.bf16.mxu1 %v4197_v20 }
 0x456   :  { %2098 = vmatpush1.bf16.msra.mxu0 %v4111_v8  ;;  %2139 = vmatpush1.bf16.msra.mxu1 %v4201_v12 }
 0x457   :  { %2099 = vmatprep.subr.bf16.mxu0 %v4114_v10  ;;  %2140 = vmatprep.subr.bf16.mxu1 %v4205_v15 }
 0x45a   :  { %2100 = vmatpush1.bf16.msra.mxu0 %v4117_v11  ;;  %2141 = vmatpush1.bf16.msra.mxu1 %v4209_v17 }
 0x45b   :  { %2397 = vmatprep.subr.bf16.mxu0 %v4131_v62  ;;  %2438 = vmatprep.subr.bf16.mxu1 %v4133_v5 }
 0x4fd   :  { %v1807_v58 = vpop.f32.mrf.mxu0  ;;  %v1848_v35 = vpop.f32.mrf.mxu1 }
 0x4fe   :  { %v1855_v37 = vadd.f32 %v1807_v58, %v4387_v36  ;;  %v1857_v24 = vadd.f32 %v1848_v35, %v4390_v56 }
 0x4ff   :  { %v1809_v38 = vpop.f32.mrf.mxu0  ;;  %v1850_v39 = vpop.f32.mrf.mxu1 }
 0x500   :  { %v3213_v40 = vmul.f32 -1.442695, %v1855_v37  ;;  %v1856_v61 = vadd.f32 %v1809_v38, %v4388_v41  ;;  %v1858_v14 = vadd.f32 %v1850_v39, %v4389_v1  ;;  %v4392_v1 = vld [vmem:[#allocation20_spill] sm:$0xff] }
 0x501   :  { %v1811_v21 = vpop.f32.mrf.mxu0  ;;  %v1852_v46 = vpop.f32.mrf.mxu1 }
 0x502   :  { %3572 = vpow2.f32 %v3213_v40  ;;  %v3214_v22 = vmul.f32 -1.442695, %v1856_v61  ;;  %v3215_v57 = vmul.f32 -1.442695, %v1858_v14  ;;  %v4391_v21 = vld [vmem:[#allocation29_spill] sm:$0xff]  ;;  %v4393_v14 = vld [vmem:[#allocation19_spill] sm:$0xff] }
 0x503   :  { %v1812_v23 = vpop.f32.mrf.mxu0  ;;  %v1853_v9 = vpop.f32.mrf.mxu1 }
 0x504   :  { %3574 = vpow2.f32 %v3214_v22 }
 0x505   :  { %3576 = vtanh.f32 %v1857_v24 }
 0x506   :  { %3578 = vpow2.f32 %v3215_v57 }
 0x50f   :  { %v3573_v0 = vpop.eup %3572 }
 0x510   :  { %v1862_v26 = vadd.f32 1.0, %v3573_v0 }
 0x511   :  { %v3575_v28 = vpop.eup %3574 }
 0x512   :  { %3580 = vrcp.f32 %v1862_v26  ;;  %v1868_v30 = vadd.f32 1.0, %v3575_v28  ;;  %v3577_v27 = vpop.eup %3576 }
 0x513   :  { %v3579_v32 = vpop.eup %3578 }
 0x514   :  { %3582 = vrcp.f32 %v1868_v30  ;;  %v1875_v36 = vadd.f32 1.0, %v3579_v32 }
 0x516   :  { %3584 = vrcp.f32 %v1875_v36 }
 0x51f   :  { %v3581_v33 = vpop.eup %3580 }
 0x520   :  { %v1879_v34 = vmul.f32 %v3581_v33, %v3577_v27 }
 0x521   :  { %v3583_v58 = vpop.eup %3582 }
 0x522   :  { %v1878_v37 = vmul.f32 %v3583_v58, %v4222_v31 }
 0x523   :  { %v3585_v35 = vpop.eup %3584 }
 0x524   :  { %v4264_v38 = vadd.f32 %v1879_v34, %v1878_v37 }
 0x526   :  { %3586 = vtanh.f32 %v4264_v38 }
 0x533   :  { %v3587_v39 = vpop.eup %3586 }
 0x534   :  { %v1882_v40 = vmul.f32 %v3587_v39, %v3585_v35 }
 0x536   :  { %v1883_v41 = vpack.c.bf16 %v1882_v40, %v1882_v40 }
 0x538   :  { %1885 = vst [vmem:[#allocation4 + $0x10] sm:$0xf] %v1883_v41  ;;  %2118 = vmatmul.mubr.bf16.vlgmr.msra.gmra.mxu0 %v1883_v41  ;;  %2159 = vmatmul.mubr.bf16.vlgmr.msra.gmra.mxu1 %v1883_v41 }
 0x539   :  { %2398 = vmatpush1.bf16.msra.mxu0 %v4135_v25  ;;  %2439 = vmatpush1.bf16.msra.mxu1 %v4137_v42 }
 0x53a   :  { %2399 = vmatprep.subr.bf16.mxu0 %v4143_v55  ;;  %2440 = vmatprep.subr.bf16.mxu1 %v4145_v16 }
 0x53b   :  { %2429 = vmatprep.mubr.bf16.mxu0 %v4382_v45  ;;  %2470 = vmatprep.mubr.bf16.mxu1 %v4382_v45 }
 0x53d   :  { %2400 = vmatpush1.bf16.msra.mxu0 %v4147_v50  ;;  %2441 = vmatpush1.bf16.msra.mxu1 %v4149_v3 }
 0x53e   :  { %2401 = vmatprep.subr.bf16.mxu0 %v4155_v29  ;;  %2442 = vmatprep.subr.bf16.mxu1 %v4157_v44 }
 0x541   :  { %2402 = vmatpush1.bf16.msra.mxu0 %v4159_v63  ;;  %2443 = vmatpush1.bf16.msra.mxu1 %v4161_v47 }
 0x542   :  { %2403 = vmatprep.subr.bf16.mxu0 %v4167_v2  ;;  %2444 = vmatprep.subr.bf16.mxu1 %v4169_v53 }
 0x545   :  { %2404 = vmatpush1.bf16.msra.mxu0 %v4171_v49  ;;  %2445 = vmatpush1.bf16.msra.mxu1 %v4173_v48 }
 0x546   :  { %2405 = vmatprep.subr.bf16.mxu0 %v4177_v51  ;;  %2446 = vmatprep.subr.bf16.mxu1 %v4179_v43 }
 0x549   :  { %2406 = vmatpush1.bf16.msra.mxu0 %v4183_v54  ;;  %2447 = vmatpush1.bf16.msra.mxu1 %v4185_v52 }
 0x54a   :  { %2407 = vmatprep.subr.bf16.mxu0 %v4105_v6  ;;  %2448 = vmatprep.subr.bf16.mxu1 %v4189_v13 }
 0x54d   :  { %2408 = vmatpush1.bf16.msra.mxu0 %v4103_v4  ;;  %2449 = vmatpush1.bf16.msra.mxu1 %v4193_v19 }
 0x54e   :  { %2409 = vmatprep.subr.bf16.mxu0 %v4107_v7  ;;  %2450 = vmatprep.subr.bf16.mxu1 %v4197_v20 }
 0x551   :  { %2410 = vmatpush1.bf16.msra.mxu0 %v4111_v8  ;;  %2451 = vmatpush1.bf16.msra.mxu1 %v4201_v12 }
 0x552   :  { %2411 = vmatprep.subr.bf16.mxu0 %v4114_v10  ;;  %2452 = vmatprep.subr.bf16.mxu1 %v4205_v15 }
 0x555   :  { %2412 = vmatpush1.bf16.msra.mxu0 %v4117_v11  ;;  %2453 = vmatpush1.bf16.msra.mxu1 %v4209_v17 }
 0x556   :  { %2709 = vmatprep.subr.bf16.mxu0 %v4131_v62  ;;  %2750 = vmatprep.subr.bf16.mxu1 %v4133_v5 }
 0x5f8   :  { %v2119_v4 = vpop.f32.mrf.mxu0  ;;  %v2160_v6 = vpop.f32.mrf.mxu1 }
 0x5f9   :  { %v2167_v7 = vadd.f32 %v2119_v4, %v4010_v60  ;;  %v2169_v5 = vadd.f32 %v2160_v6, %v4393_v14  ;;  %v3497_v14 = vld [vmem:[#allocation4] sm:$0xff]  }
 0x5fa   :  { %v2121_v31 = vpop.f32.mrf.mxu0  ;;  %v2162_v8 = vpop.f32.mrf.mxu1 }
 0x5fb   :  { %v3248_v61 = vmul.f32 -1.442695, %v2167_v7  ;;  %v2168_v46 = vadd.f32 %v2121_v31, %v4391_v21  ;;  %v2170_v62 = vadd.f32 %v2162_v8, %v4392_v1 }
 0x5fc   :  { %v2123_v10 = vpop.f32.mrf.mxu0  ;;  %v2164_v22 = vpop.f32.mrf.mxu1 }
 0x5fd   :  { %3588 = vpow2.f32 %v3248_v61  ;;  %v3249_v23 = vmul.f32 -1.442695, %v2168_v46  ;;  %v3250_v56 = vmul.f32 -1.442695, %v2170_v62  ;;  %v3498_v62 = vld [vmem:[#allocation9 + $0x30] sm:$0xff]  }
 0x5fe   :  { %v2124_v11 = vpop.f32.mrf.mxu0  ;;  %v2165_v9 = vpop.f32.mrf.mxu1 }
 0x5ff   :  { %3590 = vpow2.f32 %v3249_v23 }
 0x600   :  { %3592 = vtanh.f32 %v2169_v5  ;;  %v3499_v5 = vld [vmem:[#allocation9 + $0x28] sm:$0xff]  }
 0x601   :  { %3594 = vpow2.f32 %v3250_v56  ;;  %v3500_v56 = vld [vmem:[#allocation9 + $0x20] sm:$0xff]  }
 0x60a   :  { %v3589_v24 = vpop.eup %3588 }
 0x60b   :  { %v2174_v57 = vadd.f32 1.0, %v3589_v24  ;;  %v3501_v24 = vld [vmem:[#allocation9 + $0x18] sm:$0xff]  }
 0x60c   :  { %v3591_v60 = vpop.eup %3590 }
 0x60d   :  { %3596 = vrcp.f32 %v2174_v57  ;;  %v2180_v0 = vadd.f32 1.0, %v3591_v60  ;;  %v3593_v26 = vpop.eup %3592  ;;  %v3502_v57 = vld [vmem:[#allocation9 + $0x10] sm:$0xff]   ;;  %v3503_v60 = vld [vmem:[#allocation9 + $0x8] sm:$0xff]  }
 0x60e   :  { %v3595_v28 = vpop.eup %3594 }
 0x60f   :  { %3598 = vrcp.f32 %v2180_v0  ;;  %v2187_v33 = vadd.f32 1.0, %v3595_v28  ;;  %v3504_v0 = vld [vmem:[#allocation9] sm:$0xff]  }
 0x611   :  { %3600 = vrcp.f32 %v2187_v33  ;;  %v4398_v33 = vld [vmem:[#allocation32_spill] sm:$0xff] }
 0x61a   :  { %v3597_v30 = vpop.eup %3596 }
 0x61b   :  { %v2191_v27 = vmul.f32 %v3597_v30, %v3593_v26  ;;  %v3505_v26 = vld [vmem:[#allocation4 + $0x8] sm:$0xff]  }
 0x61c   :  { %v3599_v32 = vpop.eup %3598 }
 0x61d   :  { %v2190_v34 = vmul.f32 %v3599_v32, %v4264_v38  ;;  %v217_v32 = vadd.f32 %v4065_v18, %v3975_v59 }
 0x61e   :  { %v3601_v36 = vpop.eup %3600 }
 0x61f   :  { %v4306_v58 = vadd.f32 %v2191_v27, %v2190_v34 }
 0x621   :  { %3602 = vtanh.f32 %v4306_v58 }
 0x62e   :  { %v3603_v37 = vpop.eup %3602 }
 0x62f   :  { %v2194_v35 = vmul.f32 %v3603_v37, %v3601_v36 }
 0x631   :  { %v2195_v39 = vpack.c.bf16 %v2194_v35, %v2194_v35 }
 0x633   :  { %2197 = vst [vmem:[#allocation4 + $0x14] sm:$0xf] %v2195_v39  ;;  %2430 = vmatmul.mubr.bf16.vlgmr.msra.gmra.mxu0 %v2195_v39  ;;  %2471 = vmatmul.mubr.bf16.vlgmr.msra.gmra.mxu1 %v2195_v39 }
 0x634   :  { %2710 = vmatpush1.bf16.msra.mxu0 %v4135_v25  ;;  %2751 = vmatpush1.bf16.msra.mxu1 %v4137_v42  ;;  %v3489_v25 = vld [vmem:[#allocation6 + $0x44] ss:$16 sps:$4 sm:$0xff]  }
 0x635   :  { %2711 = vmatprep.subr.bf16.mxu0 %v4143_v55  ;;  %2752 = vmatprep.subr.bf16.mxu1 %v4145_v16  ;;  %v3492_v42 = vld [vmem:[#allocation6 + $0x24] ss:$16 sps:$4 sm:$0xff]   ;;  %v3490_v55 = vld [vmem:[#allocation6 + $0x20] ss:$16 sps:$4 sm:$0xff]  }
 0x636   :  { %2741 = vmatprep.mubr.bf16.mxu0 %v4382_v45  ;;  %2782 = vmatprep.mubr.bf16.mxu1 %v4382_v45  ;;  %v3487_v45 = vld [vmem:[#allocation6 + $0x40] ss:$16 sps:$4 sm:$0xff]   ;;  %v3495_v16 = vld [vmem:[#allocation6 + $0x4] ss:$16 sps:$4 sm:$0xff]  }
 0x638   :  { %2712 = vmatpush1.bf16.msra.mxu0 %v4147_v50  ;;  %2753 = vmatpush1.bf16.msra.mxu1 %v4149_v3  ;;  %v3493_v50 = vld [vmem:[#allocation6] ss:$16 sps:$4 sm:$0xff]   ;;  %v3496_v3 = vld [vmem:[#allocation9 + $0x38] sm:$0xff]  }
 0x639   :  { %2713 = vmatprep.subr.bf16.mxu0 %v4155_v29  ;;  %2754 = vmatprep.subr.bf16.mxu1 %v4157_v44 }
 0x63a   :  { %v3506_v28 = vld [vmem:[#allocation4 + $0x10] sm:$0xff]  }
 0x63c   :  { %2714 = vmatpush1.bf16.msra.mxu0 %v4159_v63  ;;  %2755 = vmatpush1.bf16.msra.mxu1 %v4161_v47  ;;  %v4394_v63 = vld [vmem:[#allocation30_spill] sm:$0xff] }
 0x63d   :  { %2715 = vmatprep.subr.bf16.mxu0 %v4167_v2  ;;  %2756 = vmatprep.subr.bf16.mxu1 %v4169_v53 }
 0x640   :  { %2716 = vmatpush1.bf16.msra.mxu0 %v4171_v49  ;;  %2757 = vmatpush1.bf16.msra.mxu1 %v4173_v48  ;;  %v4395_v48 = vld [vmem:[#allocation31_spill] sm:$0xff] }
 0x641   :  { %2717 = vmatprep.subr.bf16.mxu0 %v4177_v51  ;;  %2758 = vmatprep.subr.bf16.mxu1 %v4179_v43 }
 0x644   :  { %2718 = vmatpush1.bf16.msra.mxu0 %v4183_v54  ;;  %2759 = vmatpush1.bf16.msra.mxu1 %v4185_v52 }
 0x645   :  { %2760 = vmatprep.subr.bf16.mxu1 %v4189_v13  ;;  %2719 = vmatprep.subr.bf16.mxu0 %v3489_v25 }
 0x648   :  { %2761 = vmatpush1.bf16.msra.mxu1 %v4193_v19  ;;  %2720 = vmatpush1.bf16.msra.mxu0 %v3487_v45 }
 0x649   :  { %2762 = vmatprep.subr.bf16.mxu1 %v4197_v20  ;;  %2721 = vmatprep.subr.bf16.mxu0 %v3492_v42  ;;  %v4396_v20 = vld [vmem:[#allocation22_spill] sm:$0xff] }
 0x64c   :  { %2763 = vmatpush1.bf16.msra.mxu1 %v4201_v12  ;;  %2722 = vmatpush1.bf16.msra.mxu0 %v3490_v55 }
 0x64d   :  { %2764 = vmatprep.subr.bf16.mxu1 %v4205_v15  ;;  %2723 = vmatprep.subr.bf16.mxu0 %v3495_v16  ;;  %v4397_v15 = vld [vmem:[#allocation21_spill] sm:$0xff]  ;;  %v4399_v16 = vld [vmem:[#allocation26_spill] sm:$0xff] }
 0x650   :  { %2765 = vmatpush1.bf16.msra.mxu1 %v4209_v17  ;;  %2724 = vmatpush1.bf16.msra.mxu0 %v3493_v50 }
 0x651   :  { %3346 = vmatprep.subr.bf16.mxu0 %v3496_v3 }
 0x6f3   :  { %v2431_v29 = vpop.f32.mrf.mxu0  ;;  %v2472_v44 = vpop.f32.mrf.mxu1 }
 0x6f4   :  { %v2479_v47 = vadd.f32 %v2431_v29, %v4394_v63  ;;  %v2481_v17 = vadd.f32 %v2472_v44, %v4397_v15 }
 0x6f5   :  { %v2433_v2 = vpop.f32.mrf.mxu0  ;;  %v2474_v53 = vpop.f32.mrf.mxu1 }
 0x6f6   :  { %v3283_v49 = vmul.f32 -1.442695, %v2479_v47  ;;  %v2480_v51 = vadd.f32 %v2433_v2, %v4395_v48  ;;  %v2482_v12 = vadd.f32 %v2474_v53, %v4396_v20  ;;  %v3321_v2 = vld [vmem:[%s4360_s5] ss:$0 sm:$0xff]  ;;  %s3710_s5 = smov [#allocation11]  }
 0x6f7   :  { %v2435_v43 = vpop.f32.mrf.mxu0  ;;  %v2476_v54 = vpop.f32.mrf.mxu1  ;;  %s3005_s26 = sshll.u32 %s3710_s5, 4  ;;  %s3006_s26 = int_to_ptr.vmem [resolvable:$true] %s3005_s26 }
 0x6f8   :  { %3604 = vpow2.f32 %v3283_v49  ;;  %v3284_v52 = vmul.f32 -1.442695, %v2480_v51  ;;  %v3285_v38 = vmul.f32 -1.442695, %v2482_v12  ;;  %s3676_s27 = scalar_lea.vmem %s3006_s26, 1024  ;;  %p3681_p11 = scmp.lt.s32.totalorder %s3006_s26, %s3006_s26 }
 0x6f9   :  { %v2436_v13 = vpop.f32.mrf.mxu0  ;;  %v2477_v19 = vpop.f32.mrf.mxu1  ;;  %p3677_p10 = scmp.ne.s32.totalorder %s3006_s26, %s3676_s27  ;;  %p3682_p12 = scmp.lt.s32.totalorder %s3676_s27, %s3676_s27 }
 0x6fa   :  { %3606 = vpow2.f32 %v3284_v52 }
 0x6fb   :  { %3608 = vtanh.f32 %v2481_v17  ;;  %p3683_p13 = por %p3682_p12, %p3681_p11 }
 0x6fc   :  { %3610 = vpow2.f32 %v3285_v38 }
 0x6fd   :  { %p3684_p0 = pnand %p3683_p13, %p3677_p10 }
 0x705   :  { %v3605_v40 = vpop.eup %3604 }
 0x706   :  { %v2486_v41 = vadd.f32 1.0, %v3605_v40 }
 0x707   :  { %v3607_v4 = vpop.eup %3606 }
 0x708   :  { %3612 = vrcp.f32 %v2486_v41  ;;  %v2492_v6 = vadd.f32 1.0, %v3607_v4  ;;  %v3609_v7 = vpop.eup %3608 }
 0x709   :  { %v3611_v31 = vpop.eup %3610 }
 0x70a   :  { %3614 = vrcp.f32 %v2492_v6  ;;  %v2499_v46 = vadd.f32 1.0, %v3611_v31 }
 0x70c   :  { %3616 = vrcp.f32 %v2499_v46 }
 0x715   :  { %v3613_v8 = vpop.eup %3612 }
 0x716   :  { %v2503_v61 = vmul.f32 %v3613_v8, %v3609_v7 }
 0x717   :  { %v3615_v21 = vpop.eup %3614 }
 0x718   :  { %v2502_v10 = vmul.f32 %v3615_v21, %v4306_v58 }
 0x719   :  { %v3617_v23 = vpop.eup %3616 }
 0x71a   :  { %v4340_v22 = vadd.f32 %v2503_v61, %v2502_v10 }
 0x71c   :  { %3618 = vtanh.f32 %v4340_v22 }
 0x729   :  { %v3619_v11 = vpop.eup %3618 }
 0x72a   :  { %v2506_v9 = vmul.f32 %v3619_v11, %v3617_v23 }
 0x72c   :  { %v2507_v1 = vpack.c.bf16 %v2506_v9, %v2506_v9 }
 0x72e   :  { %2509 = vst [vmem:[#allocation4 + $0x18] sm:$0xf] %v2507_v1  ;;  %2742 = vmatmul.mubr.bf16.vlgmr.msra.gmra.mxu0 %v2507_v1  ;;  %2783 = vmatmul.mubr.bf16.vlgmr.msra.gmra.mxu1 %v2507_v1 }
 0x72f   :  { %3347 = vmatpush3.bf16.msra.mxu0 %v3496_v3  ;;  %3362 = vmatprep.mubr.bf16.mxu0 %v3497_v14  ;;  %v4400_v3 = vld [vmem:[#allocation24_spill] sm:$0xff] }
 0x730   :  { %3348 = vmatprep.subr.bf16.mxu0 %v3498_v62 }
 0x733   :  { %3349 = vmatpush3.bf16.msra.mxu0 %v3498_v62 }
 0x734   :  { %3350 = vmatprep.subr.bf16.mxu0 %v3499_v5 }
 0x737   :  { %3351 = vmatpush3.bf16.msra.mxu0 %v3499_v5 }
 0x738   :  { %3352 = vmatprep.subr.bf16.mxu0 %v3500_v56 }
 0x73b   :  { %3353 = vmatpush3.bf16.msra.mxu0 %v3500_v56 }
 0x73c   :  { %3354 = vmatprep.subr.bf16.mxu0 %v3501_v24 }
 0x73f   :  { %3355 = vmatpush3.bf16.msra.mxu0 %v3501_v24 }
 0x740   :  { %3356 = vmatprep.subr.bf16.mxu0 %v3502_v57 }
 0x743   :  { %3357 = vmatpush3.bf16.msra.mxu0 %v3502_v57 }
 0x744   :  { %3358 = vmatprep.subr.bf16.mxu0 %v3503_v60 }
 0x747   :  { %3359 = vmatpush3.bf16.msra.mxu0 %v3503_v60 }
 0x748   :  { %3360 = vmatprep.subr.bf16.mxu0 %v3504_v0 }
 0x74b   :  { %3361 = vmatpush3.bf16.msra.mxu0 %v3504_v0 }
 0x74e   :  { %3363 = vmatmul.mubr.bf16.vlgmr.msra.gmra.mxu0 %v3505_v26 }
 0x74f   :  { %3366 = vmatprep.mubr.bf16.mxu0 %v3506_v28 }
 0x7ee   :  { %v2743_v30 = vpop.f32.mrf.mxu0  ;;  %v2784_v27 = vpop.f32.mrf.mxu1 }
 0x7ef   :  { %v2791_v34 = vadd.f32 %v2743_v30, %v4398_v33  ;;  %v2793_v29 = vadd.f32 %v2784_v27, %v4400_v3 }
 0x7f0   :  { %v2745_v58 = vpop.f32.mrf.mxu0  ;;  %v2786_v36 = vpop.f32.mrf.mxu1 }
 0x7f1   :  { %v3318_v37 = vmul.f32 -1.442695, %v2791_v34  ;;  %v2792_v35 = vadd.f32 %v2745_v58, %v217_v32  ;;  %v2794_v50 = vadd.f32 %v2786_v36, %v4399_v16 }
 0x7f2   :  { %v2747_v39 = vpop.f32.mrf.mxu0  ;;  %v2788_v45 = vpop.f32.mrf.mxu1 }
 0x7f3   :  { %3620 = vpow2.f32 %v3318_v37  ;;  %v3319_v25 = vmul.f32 -1.442695, %v2792_v35  ;;  %v3320_v44 = vmul.f32 -1.442695, %v2794_v50 }
 0x7f4   :  { %v2748_v42 = vpop.f32.mrf.mxu0  ;;  %v2789_v55 = vpop.f32.mrf.mxu1 }
 0x7f5   :  { %3622 = vpow2.f32 %v3319_v25 }
 0x7f6   :  { %3624 = vtanh.f32 %v2793_v29 }
 0x7f7   :  { %3626 = vpow2.f32 %v3320_v44 }
 0x800   :  { %v3621_v63 = vpop.eup %3620 }
 0x801   :  { %v2798_v59 = vadd.f32 1.0, %v3621_v63 }
 0x802   :  { %v3623_v18 = vpop.eup %3622 }
 0x803   :  { %3628 = vrcp.f32 %v2798_v59  ;;  %v2804_v47 = vadd.f32 1.0, %v3623_v18  ;;  %v3625_v53 = vpop.eup %3624 }
 0x804   :  { %v3627_v48 = vpop.eup %3626 }
 0x805   :  { %3630 = vrcp.f32 %v2804_v47  ;;  %v2811_v20 = vadd.f32 1.0, %v3627_v48 }
 0x807   :  { %3632 = vrcp.f32 %v2811_v20 }
 0x80e   :  { %v3364_v49 = vpop.f32.mrf.mxu0 }
 0x80f   :  { %v2970_v51 = vadd.f32 %v3364_v49, %v3321_v2 }
 0x810   :  { %v3629_v43 = vpop.eup %3628  ;;  %v2961_v54 = vpop.f32.mrf.mxu0 }
 0x811   :  { %v2815_v52 = vmul.f32 %v3629_v43, %v3625_v53  ;;  %2994 = vst [vmem:[#allocation11 + $0x10] sm:$0xff] %v2970_v51  ;;  %v2962_v13 = vadd.f32 %v3321_v2, %v2961_v54 }
 0x812   :  { %v3631_v19 = vpop.eup %3630  ;;  %v3365_v12 = vpop.f32.mrf.mxu0 }
 0x813   :  { %v2814_v15 = vmul.f32 %v3631_v19, %v4340_v22  ;;  %2992 = vst [vmem:[#allocation11] sm:$0xff] %v2962_v13  ;;  %v2973_v17 = vadd.f32 %v3365_v12, %v3321_v2 }
 0x814   :  { %v2964_v38 = vpop.f32.mrf.mxu0  ;;  %v3633_v4 = vpop.eup %3632 }
 0x815   :  { %v2816_v40 = vadd.f32 %v2815_v52, %v2814_v15  ;;  %2995 = vst [vmem:[#allocation11 + $0x18] sm:$0xff] %v2973_v17  ;;  %v2965_v41 = vadd.f32 %v3321_v2, %v2964_v38 }
 0x817   :  { %3634 = vtanh.f32 %v2816_v40  ;;  %2993 = vst [vmem:[#allocation11 + $0x8] sm:$0xff] %v2965_v41 }
 0x824   :  { %v3635_v6 = vpop.eup %3634 }
 0x825   :  { %v2818_v7 = vmul.f32 %v3635_v6, %v3633_v4 }
 0x827   :  { %v2819_v31 = vpack.c.bf16 %v2818_v7, %v2818_v7 }
 0x829   :  { %2821 = vst [vmem:[#allocation4 + $0x1c] sm:$0xf] %v2819_v31 }
 0x830   :  { %v3507_v8 = vld [vmem:[#allocation4 + $0x18] sm:$0xff]  }
 0x831   :  { %3367 = vmatmul.mubr.bf16.gmra.mxu0 %v3507_v8 }
 0x8f1   :  { %v3368_v61 = vpop.f32.mrf.mxu0 }
 0x8f2   :  { %v2986_v21 = vadd.f32 %v3368_v61, %v3321_v2 }
 0x8f3   :  { %v2977_v46 = vpop.f32.mrf.mxu0 }
 0x8f4   :  { %2998 = vst [vmem:[#allocation11 + $0x30] sm:$0xff] %v2986_v21  ;;  %v2978_v10 = vadd.f32 %v3321_v2, %v2977_v46 }
 0x8f5   :  { %v3369_v22 = vpop.f32.mrf.mxu0 }
 0x8f6   :  { %2996 = vst [vmem:[#allocation11 + $0x20] sm:$0xff] %v2978_v10  ;;  %v2989_v23 = vadd.f32 %v3369_v22, %v3321_v2 }
 0x8f7   :  { %v2980_v11 = vpop.f32.mrf.mxu0 }
 0x8f8   :  { %2999 = vst [vmem:[#allocation11 + $0x38] sm:$0xff] %v2989_v23  ;;  %v2981_v9 = vadd.f32 %v3321_v2, %v2980_v11 }
 0x8fa   :  { %2997 = vst [vmem:[#allocation11 + $0x28] sm:$0xff] %v2981_v9 }
 0x8fb   :  { %3687 = shalt.err (!%p3684_p0)
}
 0x8fc   :  { %s3711_s28 = smov 128   ;;  %s3712_s29 = smov 8  }
 0x8fd   :  { %3011 = dma.vmem_to_hbm [thread:$0]  %s3006_s26, 1024, %s4361_s6, [#allocation8], %s3711_s28, %s3711_s28, %s3712_s29  }
 0x8fe   :  { %3700 = dma.done.wait [#allocation8], 1024  }
 0x8ff   :  { %3701 = vsyncadd [#allocation8], 4294966272 }
 0x900   :  { %3015 = vsyncpa [#allocation7], 1 }
 0x901   :  { %3016 = vsyncpa [#allocation10], 1 }
 0x902   :  { %3017 = vsyncpa [#allocation8], 1 }

</bundles_post_ra>
